<compile_context>
chip_gen: v7x
topology: tpu7x:2x2x1
jax: 0.10.0
libtpu: 0.0.40
codegen_flags: <defaults>
</compile_context>

<pallas_src>
import functools

import jax
import jax.numpy as jnp
import numpy as np
from jax.experimental import pallas as pl
from jax.experimental.pallas import tpu as pltpu


# ----------------------------------------------------------------------------
# Pallas kernel: one grid step == one image of the batch.
#   conv1 (1x1) [+ fused projection shortcut] + bias + relu
#   conv2 (3x3, stride, pad=1) + bias + relu   (im2col matmul or 9 tap matmuls)
#   conv3 (1x1) + bias
#   + shortcut (fused / strided projection / exact identity add)
#   relu
# ----------------------------------------------------------------------------
def _bottleneck_kernel(*refs, stride, has_projection, fuse_shortcut, use_im2col):
    it = iter(refs)
    x_ref = next(it)
    w1_ref, b1_ref = next(it), next(it)
    w2_ref, b2_ref = next(it), next(it)
    w3_ref, b3_ref = next(it), next(it)
    if has_projection and not fuse_shortcut:
        wsc_ref, bsc_ref = next(it), next(it)
    else:
        wsc_ref = bsc_ref = None
    out_ref = next(it)
    pad_ref = next(it)
    slab_ref = next(it) if use_im2col else None

    _, H, W, Cin = x_ref.shape
    P = w2_ref.shape[-1]           # planes (conv2 output channels)
    Cout = w3_ref.shape[1]         # expansion * planes
    Ho = (H - 1) // stride + 1
    Wo = (W - 1) // stride + 1

    x = x_ref[0]                                       # (H, W, Cin)
    x_bf = x if x.dtype == jnp.bfloat16 else x.astype(jnp.bfloat16)
    x2d = x_bf.reshape(H * W, Cin)

    # ---- conv1 (1x1) [+ fused projection shortcut] + bias ------------------
    # BN scale is folded into the weights; bias is the folded BN bias.
    h = jnp.dot(x2d, w1_ref[...], preferred_element_type=jnp.float32) + b1_ref[...]
    if fuse_shortcut:
        h1 = jnp.maximum(h[:, :P], 0.0)                # conv1 + relu
        sc = h[:, P:]                                  # projection shortcut (stride==1)
    else:
        h1 = jnp.maximum(h, 0.0)

    # ---- zero-pad (pad=1) into the bf16 scratch for the 3x3 conv ------------
    # The interior plus the left/right zero columns are written in one aligned
    # store; only the top/bottom border rows need separate stores.  The border
    # is rewritten every step (cheap) so the kernel stays correct when the
    # batch axis is sharded across TensorCores ("parallel").
    h1_bf = h1.reshape(H, W, P).astype(jnp.bfloat16)
    zcol = jnp.zeros((H, 1, P), jnp.bfloat16)
    zrow = jnp.zeros((1, W + 2, P), jnp.bfloat16)
    pad_ref[1:H + 1, :, :] = jnp.concatenate([zcol, h1_bf, zcol], axis=1)
    pad_ref[0:1, :, :] = zrow
    pad_ref[H + 1:H + 2, :, :] = zrow

    def load_tap(dy, dx):
        # Ref-level (optionally strided) slice: no extra VMEM value copies.
        if stride == 1:
            t = pad_ref[dy:dy + Ho, dx:dx + Wo, :]
        else:
            t = pad_ref[pl.ds(dy, Ho, stride=stride),
                        pl.ds(dx, Wo, stride=stride), :]
        return t.reshape(Ho * Wo, P)

    # ---- conv2 (3x3, stride) + bias + relu ----------------------------------
    if use_im2col:
        # Single K = 9*P matmul: best MXU contraction-dim utilization when
        # P % 128 == 0 (real ResNet stages); slab columns are lane-aligned.
        for dy in range(3):
            for dx in range(3):
                t = dy * 3 + dx
                slab_ref[:, t * P:(t + 1) * P] = load_tap(dy, dx)
        h2 = jnp.dot(slab_ref[...], w2_ref[...],
                     preferred_element_type=jnp.float32) + b2_ref[...]
        h2 = jnp.maximum(h2, 0.0)
    else:
        # 9-tap decomposition for small / unaligned P; accumulator starts from
        # the broadcast bias (no zeros materialization + separate add).
        acc = jnp.broadcast_to(b2_ref[...], (Ho * Wo, P))
        for dy in range(3):
            for dx in range(3):
                acc = acc + jnp.dot(load_tap(dy, dx), w2_ref[dy, dx],
                                    preferred_element_type=jnp.float32)
        h2 = jnp.maximum(acc, 0.0)

    # ---- conv3 (1x1) + bias --------------------------------------------------
    h3 = jnp.dot(h2.astype(jnp.bfloat16), w3_ref[...],
                 preferred_element_type=jnp.float32) + b3_ref[...]   # (Ho*Wo, Cout)

    # ---- shortcut ------------------------------------------------------------
    if has_projection:
        if not fuse_shortcut:
            # stride > 1: strided ref-level sample of x (no value-level gather).
            xs = x_ref[0, pl.ds(0, Ho, stride=stride),
                       pl.ds(0, Wo, stride=stride), :]
            xs = xs if xs.dtype == jnp.bfloat16 else xs.astype(jnp.bfloat16)
            sc = jnp.dot(xs.reshape(Ho * Wo, Cin), wsc_ref[...],
                         preferred_element_type=jnp.float32) + bsc_ref[...]
    else:
        # identity shortcut: stride == 1 and Cin == Cout -> exact f32 add
        sc = x.reshape(H * W, Cin).astype(jnp.float32)

    out = jnp.maximum(h3 + sc, 0.0)
    out_ref[...] = out.reshape(1, Ho, Wo, Cout).astype(out_ref.dtype)


# ----------------------------------------------------------------------------
# Wrapper (NHWC — canonical path, no layout transposes)
# ----------------------------------------------------------------------------
def _vmem_limit_bytes(need_bytes):
    need = int(need_bytes * 1.25) + (4 << 20)          # headroom for internals
    try:
        cap = int(pltpu.get_tpu_info().vmem_capacity_bytes) * 3 // 4
    except Exception:                                  # pragma: no cover
        cap = 48 << 20                                 # conservative (v7x: 64 MiB/TC)
    return min(max(need, 32 << 20), max(cap, 32 << 20))


def bottleneck_forward_nhwc(x, p, stride, has_projection, *, out_dtype=None):
    N, H, W, Cin = x.shape
    P = p["w2"].shape[-1]
    Cout = p["w3"].shape[1]
    Ho = (H - 1) // stride + 1
    Wo = (W - 1) // stride + 1
    out_dtype = x.dtype if out_dtype is None else out_dtype   # bf16 I/O via x dtype

    fuse_shortcut = has_projection and stride == 1
    use_im2col = (P % 128 == 0)

    if fuse_shortcut:
        # conv1 and the projection shortcut read the same x: one wide matmul.
        w1 = jnp.concatenate([p["w1"], p["wsc"]], axis=1)     # (Cin, P+Cout) bf16
        b1 = jnp.concatenate([p["b1"], p["bsc"]], axis=1)     # (1, P+Cout) f32
    else:
        w1, b1 = p["w1"], p["b1"]
    w2 = p["w2"].reshape(9 * P, P) if use_im2col else p["w2"]

    inputs = [x, w1, b1, w2, p["b2"], p["w3"], p["b3"]]
    if has_projection and not fuse_shortcut:
        inputs += [p["wsc"], p["bsc"]]

    def full_spec(a):
        nd = a.ndim
        return pl.BlockSpec(a.shape, lambda n, nd=nd: (0,) * nd)

    in_specs = [pl.BlockSpec((1, H, W, Cin), lambda n: (n, 0, 0, 0))]
    in_specs += [full_spec(a) for a in inputs[1:]]

    scratch_shapes = [pltpu.VMEM((H + 2, W + 2, P), jnp.bfloat16)]
    if use_im2col:
        scratch_shapes.append(pltpu.VMEM((Ho * Wo, 9 * P), jnp.bfloat16))

    # VMEM budget derived from the actual block sizes (double-buffered x/out
    # blocks + weights + scratch), clamped to the chip's capacity.
    def nbytes(a):
        return int(np.prod(a.shape)) * jnp.dtype(a.dtype).itemsize
    need = 2 * H * W * Cin * jnp.dtype(x.dtype).itemsize
    need += 2 * Ho * Wo * Cout * jnp.dtype(out_dtype).itemsize
    need += 2 * sum(nbytes(a) for a in inputs[1:])
    need += (H + 2) * (W + 2) * P * 2
    if use_im2col:
        need += Ho * Wo * 9 * P * 2

    kernel = functools.partial(_bottleneck_kernel, stride=stride,
                               has_projection=has_projection,
                               fuse_shortcut=fuse_shortcut,
                               use_im2col=use_im2col)

    return pl.pallas_call(
        kernel,
        out_shape=jax.ShapeDtypeStruct((N, Ho, Wo, Cout), out_dtype),
        grid=(N,),
        in_specs=in_specs,
        out_specs=pl.BlockSpec((1, Ho, Wo, Cout), lambda n: (n, 0, 0, 0)),
        scratch_shapes=scratch_shapes,
        compiler_params=pltpu.CompilerParams(
            # batch images are independent; keep N even on v7x (2 TensorCores).
            dimension_semantics=("parallel",),
            vmem_limit_bytes=_vmem_limit_bytes(need)),
    )(*inputs)


def bottleneck_forward_nchw(x_nchw, p, stride, has_projection, *, out_dtype=None):
    # Discouraged: the kernel is HBM-bound and each transpose is an extra full
    # HBM round trip.  Kept only for drop-in PyTorch-layout compatibility; a
    # real model should stay NHWC end-to-end and call bottleneck_forward_nhwc.
    x_nhwc = jnp.transpose(x_nchw, (0, 2, 3, 1))
    out = bottleneck_forward_nhwc(x_nhwc, p, stride, has_projection,
                                  out_dtype=out_dtype)
    return jnp.transpose(out, (0, 3, 1, 2))


# ----------------------------------------------------------------------------
# Deterministic parameters (shapes from Bottleneck.__init__), eval-mode BN
# folded; BN scale pre-multiplied into the conv weights; weights stored bf16.
# ----------------------------------------------------------------------------
def init_params(key, in_planes, planes, stride, expansion=4, eps=1e-5):
    out_planes = expansion * planes
    has_projection = (stride != 1) or (in_planes != out_planes)
    ks = jax.random.split(key, 8)

    def bn_fold(k, c):
        kg, kb, km, kv = jax.random.split(k, 4)
        gamma = jax.random.uniform(kg, (1, c), jnp.float32, 0.5, 1.5)
        beta = jax.random.normal(kb, (1, c), jnp.float32) * 0.1
        mean = jax.random.normal(km, (1, c), jnp.float32) * 0.1
        var = jax.random.uniform(kv, (1, c), jnp.float32, 0.5, 1.5)
        scale = gamma / jnp.sqrt(var + eps)
        bias = beta - mean * scale
        return scale, bias

    w1 = jax.random.normal(ks[0], (in_planes, planes), jnp.float32) * 0.2
    s1, b1 = bn_fold(ks[1], planes)
    w2 = jax.random.normal(ks[2], (3, 3, planes, planes), jnp.float32) * 0.2  # HWIO
    s2, b2 = bn_fold(ks[3], planes)
    w3 = jax.random.normal(ks[4], (planes, out_planes), jnp.float32) * 0.2
    s3, b3 = bn_fold(ks[5], out_planes)

    p = dict(
        w1=(w1 * s1).astype(jnp.bfloat16), b1=b1,
        w2=(w2 * s2).astype(jnp.bfloat16), b2=b2,   # s2 scales output channels
        w3=(w3 * s3).astype(jnp.bfloat16), b3=b3,
    )
    if has_projection:
        wsc = jax.random.normal(ks[6], (in_planes, out_planes), jnp.float32) * 0.2
        ssc, bsc = bn_fold(ks[7], out_planes)
        p["wsc"] = (wsc * ssc).astype(jnp.bfloat16)
        p["bsc"] = bsc
    return p, has_projection


# ----------------------------------------------------------------------------
# Pure-JAX reference (NHWC, f32 convs on the same folded weight values)
# ----------------------------------------------------------------------------
def reference_nhwc(x, p, stride, has_projection):
    dn = ("NHWC", "HWIO", "NHWC")

    def conv1x1(h, w, s):
        w4 = w.reshape(1, 1, *w.shape)
        return jax.lax.conv_general_dilated(h, w4, (s, s), "VALID",
                                            dimension_numbers=dn)

    w1 = p["w1"].astype(jnp.float32)
    w2 = p["w2"].astype(jnp.float32)
    w3 = p["w3"].astype(jnp.float32)

    h = jax.nn.relu(conv1x1(x, w1, 1) + p["b1"])
    h = jax.lax.conv_general_dilated(h, w2, (stride, stride),
                                     ((1, 1), (1, 1)), dimension_numbers=dn)
    h = jax.nn.relu(h + p["b2"])
    h = conv1x1(h, w3, 1) + p["b3"]
    if has_projection:
        sc = conv1x1(x, p["wsc"].astype(jnp.float32), stride) + p["bsc"]
    else:
        sc = x
    return jax.nn.relu(h + sc)


def _check(x_nhwc, params, stride, has_proj, out_ch, rtol=3e-2, atol=3e-2):
    out = jax.block_until_ready(
        bottleneck_forward_nhwc(x_nhwc, params, stride, has_proj))
    N, H, W, _ = x_nhwc.shape
    Ho = (H - 1) // stride + 1
    Wo = (W - 1) // stride + 1
    assert out.shape == (N, Ho, Wo, out_ch), out.shape
    ref = reference_nhwc(x_nhwc.astype(jnp.float32), params, stride, has_proj)
    # Tolerance reflects bf16 MXU inputs (and optional bf16 I/O) vs f32 reference.
    np.testing.assert_allclose(np.asarray(out.astype(jnp.float32)),
                               np.asarray(ref), rtol=rtol, atol=atol)


# ----------------------------------------------------------------------------
if __name__ == "__main__":
    # NOTE: toy channel counts (P=4, Cout=16) leave lanes mostly empty; any
    # perf measurement should use real ResNet channel counts (multiples of 128)
    # where the im2col conv2 path and lane-dense stores engage.
    key = jax.random.PRNGKey(0)
    k_x1, k_p1, k_x2, k_p2 = jax.random.split(key, 4)

    N, H, W, planes = 2, 16, 16, 4

    # Case 1: projection shortcut (in_planes != expansion*planes), stride=1
    #         -> exercises the fused conv1+shortcut matmul.
    in_planes = 4
    x1 = jax.random.normal(k_x1, (N, H, W, in_planes), jnp.float32)
    p1, proj1 = init_params(k_p1, in_planes, planes, 1)
    _check(x1, p1, 1, proj1, 4 * planes)

    # Case 2: identity shortcut (in_planes == expansion*planes, stride=1)
    #         -> exercises the exact f32 identity add.
    in_planes2 = 4 * planes
    x2 = jax.random.normal(k_x2, (N, H, W, in_planes2), jnp.float32)
    p2, proj2 = init_params(k_p2, in_planes2, planes, 1)
    _check(x2, p2, 1, proj2, 4 * planes)

    # Case 3: bf16 HBM-boundary I/O (gated simply by the input dtype).
    _check(x1.astype(jnp.bfloat16), p1, 1, proj1, 4 * planes,
           rtol=6e-2, atol=6e-2)

    print("KERNEL_OK")
</pallas_src>

<mosaic_0001>
module attributes {stable_mosaic.version = 11 : i64} {
  func.func @_bottleneck_kernel(%arg0: i32, %arg1: memref<1x16x16x4xf32, #tpu.memory_space<vmem>>, %arg2: memref<4x20xbf16, #tpu.memory_space<vmem>>, %arg3: memref<1x20xf32, #tpu.memory_space<vmem>>, %arg4: memref<3x3x4x4xbf16, #tpu.memory_space<vmem>>, %arg5: memref<1x4xf32, #tpu.memory_space<vmem>>, %arg6: memref<4x16xbf16, #tpu.memory_space<vmem>>, %arg7: memref<1x16xf32, #tpu.memory_space<vmem>>, %arg8: memref<1x16x16x16xf32, #tpu.memory_space<vmem>>, %arg9: memref<18x18x4xbf16, #tpu.memory_space<vmem>>) attributes {dimension_semantics = [#tpu.dimension_semantics<parallel>], iteration_bounds = array<i64: 2>, scalar_prefetch = 0 : i64, scratch_operands = 1 : i64, tpu.core_type = #tpu.core_type<tc>, window_params = [{transform_indices = @transform_0, window_bounds = array<i64: 1, 16, 16, 4>}, {pipeline_mode = #tpu.pipeline_mode<synchronous>, transform_indices = @transform_1, window_bounds = array<i64: 4, 20>}, {pipeline_mode = #tpu.pipeline_mode<synchronous>, transform_indices = @transform_2, window_bounds = array<i64: 1, 20>}, {pipeline_mode = #tpu.pipeline_mode<synchronous>, transform_indices = @transform_3, window_bounds = array<i64: 3, 3, 4, 4>}, {pipeline_mode = #tpu.pipeline_mode<synchronous>, transform_indices = @transform_4, window_bounds = array<i64: 1, 4>}, {pipeline_mode = #tpu.pipeline_mode<synchronous>, transform_indices = @transform_5, window_bounds = array<i64: 4, 16>}, {pipeline_mode = #tpu.pipeline_mode<synchronous>, transform_indices = @transform_6, window_bounds = array<i64: 1, 16>}, {transform_indices = @transform_7, window_bounds = array<i64: 1, 16, 16, 16>}]} {
    %c0 = arith.constant 0 : index
    %c0_0 = arith.constant 0 : index
    %c0_1 = arith.constant 0 : index
    %c0_2 = arith.constant 0 : index
    %0 = vector.load %arg1[%c0, %c0_0, %c0_1, %c0_2] : memref<1x16x16x4xf32, #tpu.memory_space<vmem>>, vector<1x16x16x4xf32>
    %1 = vector.shape_cast %0 : vector<1x16x16x4xf32> to vector<16x16x4xf32>
    %2 = arith.truncf %1 : vector<16x16x4xf32> to vector<16x16x4xbf16>
    %3 = vector.shape_cast %2 : vector<16x16x4xbf16> to vector<256x4xbf16>
    %c0_3 = arith.constant 0 : index
    %c0_4 = arith.constant 0 : index
    %4 = vector.load %arg2[%c0_3, %c0_4] : memref<4x20xbf16, #tpu.memory_space<vmem>>, vector<4x20xbf16>
    %cst = arith.constant dense<0.000000e+00> : vector<256x20xf32>
    %5 = tpu.matmul %3, %4, %cst {dimension_numbers = #tpu.dot_dimension_numbers<[1], [0], [0], [1], [0, 0, 1, 1], [], []>} : vector<256x4xbf16>, vector<4x20xbf16>, vector<256x20xf32> -> vector<256x20xf32>
    %c0_5 = arith.constant 0 : index
    %c0_6 = arith.constant 0 : index
    %6 = vector.load %arg3[%c0_5, %c0_6] : memref<1x20xf32, #tpu.memory_space<vmem>>, vector<1x20xf32>
    %7 = vector.broadcast %6 : vector<1x20xf32> to vector<256x20xf32>
    %8 = arith.addf %5, %7 : vector<256x20xf32>
    %9 = vector.extract_strided_slice %8 {offsets = [0, 0], sizes = [256, 4], strides = [1, 1]} : vector<256x20xf32> to vector<256x4xf32>
    %cst_7 = arith.constant 0.000000e+00 : f32
    %10 = vector.broadcast %cst_7 : f32 to vector<256x4xf32>
    %11 = arith.maximumf %9, %10 : vector<256x4xf32>
    %12 = vector.extract_strided_slice %8 {offsets = [0, 4], sizes = [256, 16], strides = [1, 1]} : vector<256x20xf32> to vector<256x16xf32>
    %13 = vector.shape_cast %11 : vector<256x4xf32> to vector<16x16x4xf32>
    %14 = arith.truncf %13 : vector<16x16x4xf32> to vector<16x16x4xbf16>
    %cst_8 = arith.constant 0.000000e+00 : bf16
    %15 = vector.broadcast %cst_8 : bf16 to vector<16x1x4xbf16>
    %cst_9 = arith.constant 0.000000e+00 : bf16
    %16 = vector.broadcast %cst_9 : bf16 to vector<1x18x4xbf16>
    %17 = tpu.concatenate %15, %14, %15 in 1 : vector<16x1x4xbf16>, vector<16x16x4xbf16>, vector<16x1x4xbf16> -> vector<16x18x4xbf16>
    %c1 = arith.constant 1 : index
    %c0_10 = arith.constant 0 : index
    %c0_11 = arith.constant 0 : index
    %18 = vector.load %arg9[%c1, %c0_10, %c0_11] : memref<18x18x4xbf16, #tpu.memory_space<vmem>>, vector<16x18x4xbf16>
    tpu.vector_store %arg9[%c1, %c0_10, %c0_11], %17 {strides = array<i32>} : memref<18x18x4xbf16, #tpu.memory_space<vmem>>, vector<16x18x4xbf16>,
    %c0_12 = arith.constant 0 : index
    %c0_13 = arith.constant 0 : index
    %c0_14 = arith.constant 0 : index
    %19 = vector.load %arg9[%c0_12, %c0_13, %c0_14] : memref<18x18x4xbf16, #tpu.memory_space<vmem>>, vector<1x18x4xbf16>
    tpu.vector_store %arg9[%c0_12, %c0_13, %c0_14], %16 {strides = array<i32>} : memref<18x18x4xbf16, #tpu.memory_space<vmem>>, vector<1x18x4xbf16>,
    %c17 = arith.constant 17 : index
    %c0_15 = arith.constant 0 : index
    %c0_16 = arith.constant 0 : index
    %20 = vector.load %arg9[%c17, %c0_15, %c0_16] : memref<18x18x4xbf16, #tpu.memory_space<vmem>>, vector<1x18x4xbf16>
    tpu.vector_store %arg9[%c17, %c0_15, %c0_16], %16 {strides = array<i32>} : memref<18x18x4xbf16, #tpu.memory_space<vmem>>, vector<1x18x4xbf16>,
    %c0_17 = arith.constant 0 : index
    %c0_18 = arith.constant 0 : index
    %21 = vector.load %arg5[%c0_17, %c0_18] : memref<1x4xf32, #tpu.memory_space<vmem>>, vector<1x4xf32>
    %22 = vector.shape_cast %21 : vector<1x4xf32> to vector<1x4xf32>
    %23 = vector.broadcast %22 : vector<1x4xf32> to vector<256x4xf32>
    %c0_19 = arith.constant 0 : index
    %c0_20 = arith.constant 0 : index
    %c0_21 = arith.constant 0 : index
    %24 = vector.load %arg9[%c0_19, %c0_20, %c0_21] : memref<18x18x4xbf16, #tpu.memory_space<vmem>>, vector<16x16x4xbf16>
    %25 = vector.shape_cast %24 : vector<16x16x4xbf16> to vector<256x4xbf16>
    %c0_22 = arith.constant 0 : index
    %c0_23 = arith.constant 0 : index
    %c0_24 = arith.constant 0 : index
    %c0_25 = arith.constant 0 : index
    %26 = vector.load %arg4[%c0_22, %c0_23, %c0_24, %c0_25] : memref<3x3x4x4xbf16, #tpu.memory_space<vmem>>, vector<1x1x4x4xbf16>
    %27 = vector.shape_cast %26 : vector<1x1x4x4xbf16> to vector<4x4xbf16>
    %cst_26 = arith.constant dense<0.000000e+00> : vector<256x4xf32>
    %28 = tpu.matmul %25, %27, %cst_26 {dimension_numbers = #tpu.dot_dimension_numbers<[1], [0], [0], [1], [0, 0, 1, 1], [], []>} : vector<256x4xbf16>, vector<4x4xbf16>, vector<256x4xf32> -> vector<256x4xf32>
    %29 = arith.addf %23, %28 : vector<256x4xf32>
    %c0_27 = arith.constant 0 : index
    %c1_28 = arith.constant 1 : index
    %c0_29 = arith.constant 0 : index
    %30 = vector.load %arg9[%c0_27, %c1_28, %c0_29] : memref<18x18x4xbf16, #tpu.memory_space<vmem>>, vector<16x16x4xbf16>
    %31 = vector.shape_cast %30 : vector<16x16x4xbf16> to vector<256x4xbf16>
    %c0_30 = arith.constant 0 : index
    %c1_31 = arith.constant 1 : index
    %c0_32 = arith.constant 0 : index
    %c0_33 = arith.constant 0 : index
    %32 = vector.load %arg4[%c0_30, %c1_31, %c0_32, %c0_33] : memref<3x3x4x4xbf16, #tpu.memory_space<vmem>>, vector<1x1x4x4xbf16>
    %33 = vector.shape_cast %32 : vector<1x1x4x4xbf16> to vector<4x4xbf16>
    %cst_34 = arith.constant dense<0.000000e+00> : vector<256x4xf32>
    %34 = tpu.matmul %31, %33, %cst_34 {dimension_numbers = #tpu.dot_dimension_numbers<[1], [0], [0], [1], [0, 0, 1, 1], [], []>} : vector<256x4xbf16>, vector<4x4xbf16>, vector<256x4xf32> -> vector<256x4xf32>
    %35 = arith.addf %29, %34 : vector<256x4xf32>
    %c0_35 = arith.constant 0 : index
    %c2 = arith.constant 2 : index
    %c0_36 = arith.constant 0 : index
    %36 = vector.load %arg9[%c0_35, %c2, %c0_36] : memref<18x18x4xbf16, #tpu.memory_space<vmem>>, vector<16x16x4xbf16>
    %37 = vector.shape_cast %36 : vector<16x16x4xbf16> to vector<256x4xbf16>
    %c0_37 = arith.constant 0 : index
    %c2_38 = arith.constant 2 : index
    %c0_39 = arith.constant 0 : index
    %c0_40 = arith.constant 0 : index
    %38 = vector.load %arg4[%c0_37, %c2_38, %c0_39, %c0_40] : memref<3x3x4x4xbf16, #tpu.memory_space<vmem>>, vector<1x1x4x4xbf16>
    %39 = vector.shape_cast %38 : vector<1x1x4x4xbf16> to vector<4x4xbf16>
    %cst_41 = arith.constant dense<0.000000e+00> : vector<256x4xf32>
    %40 = tpu.matmul %37, %39, %cst_41 {dimension_numbers = #tpu.dot_dimension_numbers<[1], [0], [0], [1], [0, 0, 1, 1], [], []>} : vector<256x4xbf16>, vector<4x4xbf16>, vector<256x4xf32> -> vector<256x4xf32>
    %41 = arith.addf %35, %40 : vector<256x4xf32>
    %c1_42 = arith.constant 1 : index
    %c0_43 = arith.constant 0 : index
    %c0_44 = arith.constant 0 : index
    %42 = vector.load %arg9[%c1_42, %c0_43, %c0_44] : memref<18x18x4xbf16, #tpu.memory_space<vmem>>, vector<16x16x4xbf16>
    %43 = vector.shape_cast %42 : vector<16x16x4xbf16> to vector<256x4xbf16>
    %c1_45 = arith.constant 1 : index
    %c0_46 = arith.constant 0 : index
    %c0_47 = arith.constant 0 : index
    %c0_48 = arith.constant 0 : index
    %44 = vector.load %arg4[%c1_45, %c0_46, %c0_47, %c0_48] : memref<3x3x4x4xbf16, #tpu.memory_space<vmem>>, vector<1x1x4x4xbf16>
    %45 = vector.shape_cast %44 : vector<1x1x4x4xbf16> to vector<4x4xbf16>
    %cst_49 = arith.constant dense<0.000000e+00> : vector<256x4xf32>
    %46 = tpu.matmul %43, %45, %cst_49 {dimension_numbers = #tpu.dot_dimension_numbers<[1], [0], [0], [1], [0, 0, 1, 1], [], []>} : vector<256x4xbf16>, vector<4x4xbf16>, vector<256x4xf32> -> vector<256x4xf32>
    %47 = arith.addf %41, %46 : vector<256x4xf32>
    %c1_50 = arith.constant 1 : index
    %c1_51 = arith.constant 1 : index
    %c0_52 = arith.constant 0 : index
    %48 = vector.load %arg9[%c1_50, %c1_51, %c0_52] : memref<18x18x4xbf16, #tpu.memory_space<vmem>>, vector<16x16x4xbf16>
    %49 = vector.shape_cast %48 : vector<16x16x4xbf16> to vector<256x4xbf16>
    %c1_53 = arith.constant 1 : index
    %c1_54 = arith.constant 1 : index
    %c0_55 = arith.constant 0 : index
    %c0_56 = arith.constant 0 : index
    %50 = vector.load %arg4[%c1_53, %c1_54, %c0_55, %c0_56] : memref<3x3x4x4xbf16, #tpu.memory_space<vmem>>, vector<1x1x4x4xbf16>
    %51 = vector.shape_cast %50 : vector<1x1x4x4xbf16> to vector<4x4xbf16>
    %cst_57 = arith.constant dense<0.000000e+00> : vector<256x4xf32>
    %52 = tpu.matmul %49, %51, %cst_57 {dimension_numbers = #tpu.dot_dimension_numbers<[1], [0], [0], [1], [0, 0, 1, 1], [], []>} : vector<256x4xbf16>, vector<4x4xbf16>, vector<256x4xf32> -> vector<256x4xf32>
    %53 = arith.addf %47, %52 : vector<256x4xf32>
    %c1_58 = arith.constant 1 : index
    %c2_59 = arith.constant 2 : index
    %c0_60 = arith.constant 0 : index
    %54 = vector.load %arg9[%c1_58, %c2_59, %c0_60] : memref<18x18x4xbf16, #tpu.memory_space<vmem>>, vector<16x16x4xbf16>
    %55 = vector.shape_cast %54 : vector<16x16x4xbf16> to vector<256x4xbf16>
    %c1_61 = arith.constant 1 : index
    %c2_62 = arith.constant 2 : index
    %c0_63 = arith.constant 0 : index
    %c0_64 = arith.constant 0 : index
    %56 = vector.load %arg4[%c1_61, %c2_62, %c0_63, %c0_64] : memref<3x3x4x4xbf16, #tpu.memory_space<vmem>>, vector<1x1x4x4xbf16>
    %57 = vector.shape_cast %56 : vector<1x1x4x4xbf16> to vector<4x4xbf16>
    %cst_65 = arith.constant dense<0.000000e+00> : vector<256x4xf32>
    %58 = tpu.matmul %55, %57, %cst_65 {dimension_numbers = #tpu.dot_dimension_numbers<[1], [0], [0], [1], [0, 0, 1, 1], [], []>} : vector<256x4xbf16>, vector<4x4xbf16>, vector<256x4xf32> -> vector<256x4xf32>
    %59 = arith.addf %53, %58 : vector<256x4xf32>
    %c2_66 = arith.constant 2 : index
    %c0_67 = arith.constant 0 : index
    %c0_68 = arith.constant 0 : index
    %60 = vector.load %arg9[%c2_66, %c0_67, %c0_68] : memref<18x18x4xbf16, #tpu.memory_space<vmem>>, vector<16x16x4xbf16>
    %61 = vector.shape_cast %60 : vector<16x16x4xbf16> to vector<256x4xbf16>
    %c2_69 = arith.constant 2 : index
    %c0_70 = arith.constant 0 : index
    %c0_71 = arith.constant 0 : index
    %c0_72 = arith.constant 0 : index
    %62 = vector.load %arg4[%c2_69, %c0_70, %c0_71, %c0_72] : memref<3x3x4x4xbf16, #tpu.memory_space<vmem>>, vector<1x1x4x4xbf16>
    %63 = vector.shape_cast %62 : vector<1x1x4x4xbf16> to vector<4x4xbf16>
    %cst_73 = arith.constant dense<0.000000e+00> : vector<256x4xf32>
    %64 = tpu.matmul %61, %63, %cst_73 {dimension_numbers = #tpu.dot_dimension_numbers<[1], [0], [0], [1], [0, 0, 1, 1], [], []>} : vector<256x4xbf16>, vector<4x4xbf16>, vector<256x4xf32> -> vector<256x4xf32>
    %65 = arith.addf %59, %64 : vector<256x4xf32>
    %c2_74 = arith.constant 2 : index
    %c1_75 = arith.constant 1 : index
    %c0_76 = arith.constant 0 : index
    %66 = vector.load %arg9[%c2_74, %c1_75, %c0_76] : memref<18x18x4xbf16, #tpu.memory_space<vmem>>, vector<16x16x4xbf16>
    %67 = vector.shape_cast %66 : vector<16x16x4xbf16> to vector<256x4xbf16>
    %c2_77 = arith.constant 2 : index
    %c1_78 = arith.constant 1 : index
    %c0_79 = arith.constant 0 : index
    %c0_80 = arith.constant 0 : index
    %68 = vector.load %arg4[%c2_77, %c1_78, %c0_79, %c0_80] : memref<3x3x4x4xbf16, #tpu.memory_space<vmem>>, vector<1x1x4x4xbf16>
    %69 = vector.shape_cast %68 : vector<1x1x4x4xbf16> to vector<4x4xbf16>
    %cst_81 = arith.constant dense<0.000000e+00> : vector<256x4xf32>
    %70 = tpu.matmul %67, %69, %cst_81 {dimension_numbers = #tpu.dot_dimension_numbers<[1], [0], [0], [1], [0, 0, 1, 1], [], []>} : vector<256x4xbf16>, vector<4x4xbf16>, vector<256x4xf32> -> vector<256x4xf32>
    %71 = arith.addf %65, %70 : vector<256x4xf32>
    %c2_82 = arith.constant 2 : index
    %c2_83 = arith.constant 2 : index
    %c0_84 = arith.constant 0 : index
    %72 = vector.load %arg9[%c2_82, %c2_83, %c0_84] : memref<18x18x4xbf16, #tpu.memory_space<vmem>>, vector<16x16x4xbf16>
    %73 = vector.shape_cast %72 : vector<16x16x4xbf16> to vector<256x4xbf16>
    %c2_85 = arith.constant 2 : index
    %c2_86 = arith.constant 2 : index
    %c0_87 = arith.constant 0 : index
    %c0_88 = arith.constant 0 : index
    %74 = vector.load %arg4[%c2_85, %c2_86, %c0_87, %c0_88] : memref<3x3x4x4xbf16, #tpu.memory_space<vmem>>, vector<1x1x4x4xbf16>
    %75 = vector.shape_cast %74 : vector<1x1x4x4xbf16> to vector<4x4xbf16>
    %cst_89 = arith.constant dense<0.000000e+00> : vector<256x4xf32>
    %76 = tpu.matmul %73, %75, %cst_89 {dimension_numbers = #tpu.dot_dimension_numbers<[1], [0], [0], [1], [0, 0, 1, 1], [], []>} : vector<256x4xbf16>, vector<4x4xbf16>, vector<256x4xf32> -> vector<256x4xf32>
    %77 = arith.addf %71, %76 : vector<256x4xf32>
    %cst_90 = arith.constant 0.000000e+00 : f32
    %78 = vector.broadcast %cst_90 : f32 to vector<256x4xf32>
    %79 = arith.maximumf %77, %78 : vector<256x4xf32>
    %80 = arith.truncf %79 : vector<256x4xf32> to vector<256x4xbf16>
    %c0_91 = arith.constant 0 : index
    %c0_92 = arith.constant 0 : index
    %81 = vector.load %arg6[%c0_91, %c0_92] : memref<4x16xbf16, #tpu.memory_space<vmem>>, vector<4x16xbf16>
    %cst_93 = arith.constant dense<0.000000e+00> : vector<256x16xf32>
    %82 = tpu.matmul %80, %81, %cst_93 {dimension_numbers = #tpu.dot_dimension_numbers<[1], [0], [0], [1], [0, 0, 1, 1], [], []>} : vector<256x4xbf16>, vector<4x16xbf16>, vector<256x16xf32> -> vector<256x16xf32>
    %c0_94 = arith.constant 0 : index
    %c0_95 = arith.constant 0 : index
    %83 = vector.load %arg7[%c0_94, %c0_95] : memref<1x16xf32, #tpu.memory_space<vmem>>, vector<1x16xf32>
    %84 = vector.broadcast %83 : vector<1x16xf32> to vector<256x16xf32>
    %85 = arith.addf %82, %84 : vector<256x16xf32>
    %86 = arith.addf %85, %12 : vector<256x16xf32>
    %cst_96 = arith.constant 0.000000e+00 : f32
    %87 = vector.broadcast %cst_96 : f32 to vector<256x16xf32>
    %88 = arith.maximumf %86, %87 : vector<256x16xf32>
    %89 = vector.shape_cast %88 : vector<256x16xf32> to vector<1x16x16x16xf32>
    %c0_97 = arith.constant 0 : index
    %c0_98 = arith.constant 0 : index
    %c0_99 = arith.constant 0 : index
    %c0_100 = arith.constant 0 : index
    %90 = vector.load %arg8[%c0_97, %c0_98, %c0_99, %c0_100] : memref<1x16x16x16xf32, #tpu.memory_space<vmem>>, vector<1x16x16x16xf32>
    tpu.vector_store %arg8[%c0_97, %c0_98, %c0_99, %c0_100], %89 {strides = array<i32>} : memref<1x16x16x16xf32, #tpu.memory_space<vmem>>, vector<1x16x16x16xf32>,
    return
  }
  func.func @transform_0(%arg0: i32) -> (i32, i32, i32, i32) {
    %c0_i32 = arith.constant 0 : i32
    %c0_i32_0 = arith.constant 0 : i32
    %c0_i32_1 = arith.constant 0 : i32
    %c0_i32_2 = arith.constant 0 : i32
    return %arg0, %c0_i32, %c0_i32_0, %c0_i32_1 : i32, i32, i32, i32
  }
  func.func @transform_1(%arg0: i32) -> (i32, i32) {
    %c0_i32 = arith.constant 0 : i32
    %c0_i32_0 = arith.constant 0 : i32
    %c0_i32_1 = arith.constant 0 : i32
    return %c0_i32, %c0_i32_0 : i32, i32
  }
  func.func @transform_2(%arg0: i32) -> (i32, i32) {
    %c0_i32 = arith.constant 0 : i32
    %c0_i32_0 = arith.constant 0 : i32
    %c0_i32_1 = arith.constant 0 : i32
    return %c0_i32, %c0_i32_0 : i32, i32
  }
  func.func @transform_3(%arg0: i32) -> (i32, i32, i32, i32) {
    %c0_i32 = arith.constant 0 : i32
    %c0_i32_0 = arith.constant 0 : i32
    %c0_i32_1 = arith.constant 0 : i32
    %c0_i32_2 = arith.constant 0 : i32
    %c0_i32_3 = arith.constant 0 : i32
    return %c0_i32, %c0_i32_0, %c0_i32_1, %c0_i32_2 : i32, i32, i32, i32
  }
  func.func @transform_4(%arg0: i32) -> (i32, i32) {
    %c0_i32 = arith.constant 0 : i32
    %c0_i32_0 = arith.constant 0 : i32
    %c0_i32_1 = arith.constant 0 : i32
    return %c0_i32, %c0_i32_0 : i32, i32
  }
  func.func @transform_5(%arg0: i32) -> (i32, i32) {
    %c0_i32 = arith.constant 0 : i32
    %c0_i32_0 = arith.constant 0 : i32
    %c0_i32_1 = arith.constant 0 : i32
    return %c0_i32, %c0_i32_0 : i32, i32
  }
  func.func @transform_6(%arg0: i32) -> (i32, i32) {
    %c0_i32 = arith.constant 0 : i32
    %c0_i32_0 = arith.constant 0 : i32
    %c0_i32_1 = arith.constant 0 : i32
    return %c0_i32, %c0_i32_0 : i32, i32
  }
  func.func @transform_7(%arg0: i32) -> (i32, i32, i32, i32) {
    %c0_i32 = arith.constant 0 : i32
    %c0_i32_0 = arith.constant 0 : i32
    %c0_i32_1 = arith.constant 0 : i32
    %c0_i32_2 = arith.constant 0 : i32
    return %arg0, %c0_i32, %c0_i32_0, %c0_i32_1 : i32, i32, i32, i32
  }
}

</mosaic_0001>

<bundles_post_ra>
// kernel: tpu_custom_call.1
= control target key start
LH: loop header
LB: loop body
LE: loop exit
PB: predicated region body
PF: predicated region fallthrough
CT: control target
= control target key end

     0   :  { %12 = vsyncpa [#allocation4], 0  ;;  %s9569_s0 = inlined_call_operand.vmem [shape: f32[2,16,16,4], index: 0, kind: input, shape index: {}]   ;;  %s9570_s1 = inlined_call_operand.vmem [shape: bf16[4,20], index: 1, kind: input, shape index: {}]   ;;  %s9571_s2 = inlined_call_operand.vmem [shape: f32[1,20], index: 2, kind: input, shape index: {}]   ;;  %s9572_s3 = inlined_call_operand.vmem [shape: bf16[3,3,4,4], index: 3, kind: input, shape index: {}]   ;;  %s9573_s4 = inlined_call_operand.vmem [shape: f32[1,4], index: 4, kind: input, shape index: {}]   ;;  %s9574_s5 = inlined_call_operand.vmem [shape: bf16[4,16], index: 5, kind: input, shape index: {}]   ;;  %s9575_s6 = inlined_call_operand.vmem [shape: f32[1,16], index: 6, kind: input, shape index: {}]   ;;  %s9576_s7 = inlined_call_operand.hbm [shape: f32[2,16,16,16], index: 7, kind: output, shape index: {}]  }
   0x1   :  { %14 = vsyncpa [#allocation4 + $0x1], 0  ;;  %s7797_s24 = smov 0   ;;  %s7799_s25 = smov 0  }
   0x2   :  { %s7801_s26 = smov 0   ;;  %s7803_s27 = smov 0  }
   0x3 LB: > { %s7818_s28 = sadd.s32 4294967295, %s7750_s27   ;;  %s6253_s29 = sadd.s32 4294967294, %s7750_s27   ;;  %s7750_s27 = sphi %s7803_s27, %s9661_s27   ;;  %s7746_s26 = sphi %s7801_s26, %s9660_s26   ;;  %s7742_s25 = sphi %s7799_s25, %s9659_s25   ;;  %s7738_s24 = sphi %s7797_s24, %s9658_s24  }
   0x4   : > { %s7822_s30 = sadd.s32 1, %s7750_s27   ;;  %s179_s8 = sadd.s32 1, %s7746_s26 }
   0x5   : > { %s176_s9 = ssub.s32 %s7750_s27, %s7822_s30  ;;  %p189_p0 = scmp.ne.s32.totalorder %s7746_s26, %s7742_s25 }
   0x6   : > { %p177_p1 = scmp.eq.s32.totalorder %s176_s9, 0  ;;  %p190_p2 = scmp.eq.s32.totalorder %s7818_s28, 1 }
   0x7   : > { %p195_p3 = scmp.ne.s32.totalorder %s7742_s25, %s7738_s24  ;;  %p196_p4 = scmp.eq.s32.totalorder %s6253_s29, 1 }
   0x8   : > { %s7833_s10 = scalar_select %p177_p1, %s7746_s26, %s179_s8  }
   0x9   : > { %p7835_p5 = por %p190_p2, %p189_p0  ;;  %p7839_p6 = por %p196_p4, %p195_p3 }
   0xa   : > { %p6256_p7 = scmp.ge.s32.totalorder %s7750_s27, 1  ;;  %p240_p8 = scmp.lt.s32.totalorder %s7750_s27, 3 }
   0xc   : > { %p241_p9 = pnand %p6256_p7, %p240_p8 }
   0xe   : > { %244 = sbr.rel (%p241_p9) target bundleno = 1165 (0x48d), region = 48 }
  0x15   : > { %v326_v0 = vld [vmem:[%s9570_s1] sm:$0x3]  ;;  %vm383_vm0 = vcmask 1041408   ;;  %p272_p10 = scmp.lt.s32.totalorder %s7818_s28, 1  ;;  %vm334_vm1 = vcmask 31744   ;;  %vm952_vm2 = vcmask 27648  }
  0x16   : > { %7545 = vmatprep.subr.msk.bf16.mxu0 %vm383_vm0, %v326_v0  ;;  %v385_v1 = vsel %vm383_vm0, %v326_v0, 0  ;;  %vm955_vm3 = vcmask 24576   ;;  %v7752_v50 = vmov 0   ;;  %v1048_v51 = vld [vmem:[%s9572_s3] sm:$0x3]  ;;  %vm740_vm4 = vcmask 1040384  }
  0x17   : > { %6882 = vmatpush3.bf16.msra.mxu0 %v385_v1  ;;  %s273_s15 = scalar_select %p272_p10, %s7818_s28, 1  ;;  %1002 = vst.msk [vmem:[#allocation2] sm:$0xf] %vm952_vm2, %v7752_v50  ;;  %1003 = vst.msk [vmem:[#allocation2 + $0x4] sm:$0xf] %vm952_vm2, %v7752_v50  ;;  %v1178_v52 = vsel %vm383_vm0, %v1048_v51, 0 }
  0x18   : > { %1004 = vst.msk [vmem:[#allocation2 + $0x8] sm:$0x1] %vm955_vm3, %v7752_v50  ;;  %1008 = vst.msk [vmem:[#allocation2 + $0xd4] sm:$0x1] %vm955_vm3, %v7752_v50  ;;  %7546 = vmatprep.subr.msk.bf16.mxu0 %vm383_vm0, %v1048_v51  ;;  %v6440_v54 = vld [vmem:[%s9572_s3 + $0x6] sm:$0x3] }
  0x19   : > { %s6692_s16 = sshll.u32 %s273_s15, 8  ;;  %1006 = vst.msk [vmem:[#allocation2 + $0xcc] sm:$0xf] %vm952_vm2, %v7752_v50  ;;  %1007 = vst.msk [vmem:[#allocation2 + $0xd0] sm:$0xf] %vm952_vm2, %v7752_v50  ;;  %7550 = vmatprep.subr.msk.bf16.mxu1 %vm383_vm0, %v6440_v54  ;;  %v7922_v55 = vsel %vm383_vm0, %v6440_v54, 0 }
  0x1a   : > { %s7855_s19 = scalar_lea.vmem %s9569_s0, %s6692_s16  ;;  %7256 = vmatpush3.bf16.msra.mxu1 %v7922_v55  ;;  %v6473_v56 = vld [vmem:[%s9572_s3 + $0x8] sm:$0x3]  ;;  %v6358_v57 = vld [vmem:[%s9572_s3 + $0x2] sm:$0x3]  ;;  %v7936_v58 = vld [vmem:[%s9571_s2] ss:$0 sm:$0xff] }
  0x1b   : > { %v278_v2 = vld [vmem:[%s7855_s19] sm:$0xff]  ;;  %v279_v3 = vld [vmem:[%s7855_s19 + $0x8] sm:$0xff]  ;;  %v280_v4 = vld [vmem:[%s7855_s19 + $0x10] sm:$0xff]  ;;  %7551 = vmatprep.subr.msk.bf16.mxu1 %vm383_vm0, %v6473_v56  ;;  %s7753_s16 = smov 124   ;;  %vm741_vm5 = vsmask.f32 256 }
  0x1c   : > { %v310_v5 = vpack.c.bf16 %v279_v3, %v278_v2  ;;  %v281_v6 = vld [vmem:[%s7855_s19 + $0x18] sm:$0xff]  ;;  %v282_v7 = vld [vmem:[%s7855_s19 + $0x20] sm:$0xff]  ;;  %v283_v8 = vld [vmem:[%s7855_s19 + $0x28] sm:$0xff]  ;;  %vm1421_vm7 = vsmask.f32 3328  ;;  %vm2166_vm10 = vcmask 1042432  }
  0x1d   : > { %v311_v9 = vpack.c.bf16 %v281_v6, %v280_v4  ;;  %v312_v10 = vpack.c.bf16 %v283_v8, %v282_v7  ;;  %v284_v11 = vld [vmem:[%s7855_s19 + $0x30] sm:$0xff]  ;;  %v285_v12 = vld [vmem:[%s7855_s19 + $0x38] sm:$0xff]  ;;  %v286_v13 = vld [vmem:[%s7855_s19 + $0x40] sm:$0xff]  ;;  %vm1422_vm8 = vsmask.f32 7440  ;;  %vm2167_vm11 = vcmask 1046532  }
  0x1e   : > { %6883 = vmatprep.mubr.msk.bf16.mxu0 %vm334_vm1, %v310_v5  ;;  %v287_v14 = vld [vmem:[%s7855_s19 + $0x48] sm:$0xff]  ;;  %v313_v15 = vpack.c.bf16 %v285_v12, %v284_v11  ;;  %v288_v17 = vld [vmem:[%s7855_s19 + $0x50] sm:$0xff]  ;;  %v289_v18 = vld [vmem:[%s7855_s19 + $0x58] sm:$0xff]  ;;  %s269_s21 = sand.u32 1, %s7742_s25   ;;  %vm6144_vm13 = vcmask 130048   ;;  %s6693_s9 = sshll.u32 %s7818_s28, 12 }
  0x1f   : > { %6884 = vmatmul.mubr.msk.bf16.vlgmr.msra.gmra.mrb[0].mxu0 %vm334_vm1, %v311_v9  ;;  %v314_v16 = vpack.c.bf16 %v287_v14, %v286_v13  ;;  %v290_v19 = vld [vmem:[%s7855_s19 + $0x60] sm:$0xff]  ;;  %v291_v20 = vld [vmem:[%s7855_s19 + $0x68] sm:$0xff]  ;;  %v315_v21 = vpack.c.bf16 %v289_v18, %v288_v17  ;;  %v292_v23 = vld [vmem:[%s7855_s19 + $0x70] sm:$0xff]  ;;  %s6257_s29 = sshll.u32 %s269_s21, 8  ;;  %s9528_s28 = scalar_lea.sflag [#allocation4], %s269_s21 }
  0x20   : > { %6887 = vmatprep.mubr.msk.bf16.mxu0 %vm334_vm1, %v312_v10  ;;  %v316_v22 = vpack.c.bf16 %v291_v20, %v290_v19  ;;  %v293_v24 = vld [vmem:[%s7855_s19 + $0x78] sm:$0xff]  ;;  %v294_v25 = vld [vmem:[%s7855_s19 + $0x80] sm:$0xff]  ;;  %v295_v26 = vld [vmem:[%s7855_s19 + $0x88] sm:$0xff]  ;;  %6916 = vmatpush3.bf16.msra.mxu0 %v1178_v52  ;;  %v7947_v19 = vsel %vm383_vm0, %v6473_v56, 0  ;;  %s9419_s8 = scalar_lea.vmem [#allocation3], %s6257_s29  ;;  %s7754_s18 = smov [#allocation3]  }
  0x21   : > { %v317_v27 = vpack.c.bf16 %v293_v24, %v292_v23  ;;  %v318_v28 = vpack.c.bf16 %v295_v26, %v294_v25  ;;  %v296_v29 = vld [vmem:[%s7855_s19 + $0x90] sm:$0xff]  ;;  %v297_v30 = vld [vmem:[%s7855_s19 + $0x98] sm:$0xff]  ;;  %v298_v31 = vld [vmem:[%s7855_s19 + $0xa0] sm:$0xff]  ;;  %7547 = vmatprep.subr.msk.bf16.mxu0 %vm383_vm0, %v6358_v57  ;;  %v7951_v23 = vsel %vm383_vm0, %v6358_v57, 0  ;;  %s6191_s13 = sshll.u32 %s9419_s8, 4  ;;  %s9518_s13 = int_to_ptr.vmem [resolvable:$true] %s6191_s13 }
  0x22   : > { %v299_v32 = vld [vmem:[%s7855_s19 + $0xa8] sm:$0xff]  ;;  %v319_v33 = vpack.c.bf16 %v297_v30, %v296_v29  ;;  %v300_v35 = vld [vmem:[%s7855_s19 + $0xb0] sm:$0xff]  ;;  %v301_v36 = vld [vmem:[%s7855_s19 + $0xb8] sm:$0xff]  ;;  %s7688_s17 = scalar_lea.vmem %s9518_s13, 4096 }
  0x23   : > { %v320_v34 = vpack.c.bf16 %v299_v32, %v298_v31  ;;  %v302_v37 = vld [vmem:[%s7855_s19 + $0xc0] sm:$0xff]  ;;  %v303_v38 = vld [vmem:[%s7855_s19 + $0xc8] sm:$0xff]  ;;  %v321_v39 = vpack.c.bf16 %v301_v36, %v300_v35  ;;  %v304_v41 = vld [vmem:[%s7855_s19 + $0xd0] sm:$0xff]  ;;  %p7689_p11 = scmp.ne.s32.totalorder %s9518_s13, %s7688_s17 }
  0x24   : > { %v322_v40 = vpack.c.bf16 %v303_v38, %v302_v37  ;;  %v305_v42 = vld [vmem:[%s7855_s19 + $0xd8] sm:$0xff]  ;;  %v306_v43 = vld [vmem:[%s7855_s19 + $0xe0] sm:$0xff]  ;;  %v307_v44 = vld [vmem:[%s7855_s19 + $0xe8] sm:$0xff] }
  0x25   : > { %v323_v45 = vpack.c.bf16 %v305_v42, %v304_v41  ;;  %v324_v46 = vpack.c.bf16 %v307_v44, %v306_v43  ;;  %v308_v47 = vld [vmem:[%s7855_s19 + $0xf0] sm:$0xff]  ;;  %v309_v48 = vld [vmem:[%s7855_s19 + $0xf8] sm:$0xff]  ;;  %v7600_v53 = vld [vmem:[#allocation2] sm:$0xff]   ;;  %p7690_p12 = pnand %p7689_p11, %p7835_p5  ;;  %s7692_s19 = sshll.u32 %s7754_s18, 4  ;;  %s7693_s19 = int_to_ptr.vmem [resolvable:$false] %s7692_s19 }
  0x26   : > { %v325_v49 = vpack.c.bf16 %v309_v48, %v308_v47  ;;  %v1373_v60 = vld [vmem:[#allocation2] sm:$0xf]  ;;  %v1374_v3 = vld [vmem:[#allocation2 + $0x4] sm:$0xf]  ;;  %v1375_v11 = vld [vmem:[#allocation2 + $0x8] sm:$0x1]  ;;  %p7695_p0 = scmp.lt.s32.totalorder %s9518_s13, %s7693_s19 }
  0x27   : > { %6888 = vmatmul.mubr.msk.bf16.gmra.mrb[4].mxu0 %vm334_vm1, %v313_v15  ;;  %v1425_v4 = vshrl.u32 %v1373_v60, 16  ;;  %v1428_v5 = vshll.u32 %v1373_v60, 16  ;;  %v1434_v12 = vshll.u32 %v1374_v3, 16  ;;  %v1438_v13 = vshrl.u32 %v1374_v3, 16  ;;  %vm7954_vm6 = vmand %vm740_vm4, %vm741_vm5  ;;  %p7691_p13 = pneg %p7690_p12  ;;  %s7694_s20 = scalar_lea.vmem %s7693_s19, 8192 }
  0x28   : > { %6891 = vmatprep.mubr.msk.bf16.mxu0 %vm334_vm1, %v314_v16  ;;  %v1444_v24 = vshll.u32 %v1375_v11, 16  ;;  %vm8182_vm9 = vmor %vm1421_vm7, %vm1422_vm8  ;;  %p7696_p1 = scmp.lt.s32.totalorder %s7694_s20, %s7688_s17 }
  0x29   : > { %v1427_v15 = vrot.slane %v1425_v4, 4  ;;  %v1430_v16 = vrot.slane %v1428_v5, 5  ;;  %v7959_v29 = vrot.slane %v1434_v12, 5  ;;  %v1440_v30 = vrot.slane %v1438_v13, 4  ;;  %vm8461_vm12 = vmor %vm2166_vm10, %vm2167_vm11 }
  0x2a   : > { %p7697_p2 = por %p7696_p1, %p7695_p0 }
  0x2b   : > { %v1431_v35 = vor.u32 %v1430_v16, %v1427_v15  ;;  %v1441_v51 = vor.u32 %v1440_v30, %v7959_v29 }
  0x2c   : > { %p7698_p3 = pnand %p7697_p2, %p7691_p13 }
  0x2d   : > { %v7984_v4 = vrot.slane %v1431_v35, 4 }
  0x2f   : > { %6892 = vmatmul.mubr.msk.bf16.gmra.mrb[8].mxu0 %vm334_vm1, %v315_v21 }
  0x30   : > { %6895 = vmatprep.mubr.msk.bf16.mxu0 %vm334_vm1, %v316_v22 }
  0x37   : > { %6896 = vmatmul.mubr.msk.bf16.gmra.mrb[12].mxu0 %vm334_vm1, %v317_v27 }
  0x38   : > { %6899 = vmatprep.mubr.msk.bf16.mxu0 %vm334_vm1, %v318_v28 }
  0x3f   : > { %6900 = vmatmul.mubr.msk.bf16.gmra.mrb[16].mxu0 %vm334_vm1, %v319_v33 }
  0x40   : > { %6903 = vmatprep.mubr.msk.bf16.mxu0 %vm334_vm1, %v320_v34 }
  0x47   : > { %6904 = vmatmul.mubr.msk.bf16.gmra.mrb[20].mxu0 %vm334_vm1, %v321_v39 }
  0x48   : > { %6907 = vmatprep.mubr.msk.bf16.mxu0 %vm334_vm1, %v322_v40 }
  0x4f   : > { %6908 = vmatmul.mubr.msk.bf16.gmra.mrb[24].mxu0 %vm334_vm1, %v323_v45 }
  0x50   : > { %6911 = vmatprep.mubr.msk.bf16.mxu0 %vm334_vm1, %v324_v46 }
  0x57   : > { %6912 = vmatmul.mubr.msk.bf16.gmra.mrb[28].mxu0 %vm334_vm1, %v325_v49 }
  0x58   : > { %6917 = vmatprep.mubr.msk.bf16.mxu0 %vm334_vm1, %v7600_v53 }
  0xf2   : > { %v6885_v59 = vpop.f32.mrb[0].mxu0 }
  0xf3   : > { %v430_v61 = vadd.f32 %v6885_v59, %v7936_v58  ;;  %v421_v62 = vpop.f32.mrb[1].mxu0 }
  0xf4   : > { %v422_v63 = vadd.f32 %v7936_v58, %v421_v62  ;;  %v6886_v0 = vpop.f32.mrb[2].mxu0 }
  0xf5   : > { %v433_v1 = vadd.f32 %v6886_v0, %v7936_v58  ;;  %5988 = vrot.lane.b32.xlu1 %v430_v61, %s7753_s16  ;;  %v424_v2 = vpop.f32.mrb[3].mxu0  ;;  %v550_v7 = vmax.f32 %v430_v61, 0.0 }
  0xf6   : > { %v425_v6 = vadd.f32 %v7936_v58, %v424_v2  ;;  %5984 = vrot.lane.b32.xlu0 %v422_v63, %s7753_s16  ;;  %v548_v9 = vmax.f32 %v422_v63, 0.0  ;;  %v7978_v63 = vrot.slane %v1444_v24, 5 }
  0xf7   : > { %v551_v8 = vmax.f32 %v433_v1, 0.0 }
  0xf8   : > { %v549_v10 = vmax.f32 %v425_v6, 0.0 }
  0xf9   : > { %v581_v14 = vpack.c.bf16 %v551_v8, %v550_v7  ;;  %5990 = vrot.lane.b32.xlu1 %v433_v1, %s7753_s16 }
  0xfa   : > { %v580_v17 = vpack.c.bf16 %v549_v10, %v548_v9  ;;  %v6889_v18 = vpop.f32.mrb[4].mxu0  ;;  %5986 = vrot.lane.b32.xlu0 %v425_v6, %s7753_s16  ;;  %v7989_v9 = vrot.slane %v1441_v51, 4 }
  0xfb   : > { %v604_v20 = vshrl.u32 %v581_v14, 16  ;;  %v446_v21 = vadd.f32 %v6889_v18, %v7936_v58  ;;  %v437_v22 = vpop.f32.mrb[5].mxu0  ;;  %v607_v32 = vshll.u32 %v581_v14, 16  ;;  %v7996_v14 = vld [vmem:[%s9572_s3 + $0xa] sm:$0x3] }
  0xfc   : > { %v597_v26 = vshrl.u32 %v580_v17, 16  ;;  %v438_v27 = vadd.f32 %v7936_v58, %v437_v22  ;;  %v6890_v28 = vpop.f32.mrb[6].mxu0  ;;  %v600_v37 = vshll.u32 %v580_v17, 16  ;;  %v8007_v30 = vsel %vm383_vm0, %v7996_v14, 0 }
  0xfd   : > { %v606_v31 = vrot.slane %v604_v20, 7  ;;  %v449_v33 = vadd.f32 %v6890_v28, %v7936_v58  ;;  %v440_v34 = vpop.f32.mrb[7].mxu0  ;;  %v554_v38 = vmax.f32 %v446_v21, 0.0 }
  0xfe   : > { %v599_v36 = vrot.slane %v597_v26, 7  ;;  %v441_v39 = vadd.f32 %v7936_v58, %v440_v34  ;;  %5996 = vrot.lane.b32.xlu0 %v446_v21, %s7753_s16  ;;  %v552_v42 = vmax.f32 %v438_v27, 0.0 }
  0xff   : > { %v609_v40 = vor.u32 %v607_v32, %v606_v31  ;;  %v760_v41 = vsel %vm7954_vm6, %v606_v31, 0  ;;  %v555_v43 = vmax.f32 %v449_v33, 0.0  ;;  %5998 = vrot.lane.b32.xlu1 %v449_v33, %s7753_s16 }
 0x100   : > { %v6282_v44 = vcombine.low %v760_v41, %v760_v41  ;;  %v602_v45 = vor.u32 %v600_v37, %v599_v36  ;;  %v759_v46 = vsel %vm7954_vm6, %v599_v36, 0  ;;  %v553_v47 = vmax.f32 %v441_v39, 0.0 }
 0x101   : > { %v744_v48 = vsel %vm7954_vm6, 0, %v609_v40  ;;  %v6279_v49 = vcombine.low %v759_v46, %v759_v46  ;;  %v583_v50 = vpack.c.bf16 %v555_v43, %v554_v38 }
 0x102   : > { %v6280_v52 = vcombine.low %v744_v48, %v744_v48  ;;  %v6281_v53 = vcombine.high %v744_v48, %v744_v48  ;;  %959 = vst.msk [vmem:[#allocation2 + $0x20] sm:$0x1] %vm955_vm3, %v6282_v44  ;;  %v743_v54 = vsel %vm7954_vm6, 0, %v602_v45  ;;  %v582_v56 = vpack.c.bf16 %v553_v47, %v552_v42  ;;  %v6893_v57 = vpop.f32.mrb[8].mxu0  ;;  %5992 = vrot.lane.b32.xlu0 %v438_v27, %s7753_s16 }
 0x103   : > { %v6277_v59 = vcombine.low %v743_v54, %v743_v54  ;;  %v6278_v60 = vcombine.high %v743_v54, %v743_v54  ;;  %956 = vst.msk [vmem:[#allocation2 + $0x14] sm:$0x1] %vm955_vm3, %v6279_v49  ;;  %v618_v61 = vshrl.u32 %v583_v50, 16  ;;  %v453_v62 = vpop.f32.mrb[9].mxu0  ;;  %5994 = vrot.lane.b32.xlu1 %v441_v39, %s7753_s16  ;;  %v462_v1 = vadd.f32 %v6893_v57, %v7936_v58 }
 0x104   : > { %957 = vst.msk [vmem:[#allocation2 + $0x18] sm:$0xf] %vm952_vm2, %v6280_v52  ;;  %958 = vst.msk [vmem:[#allocation2 + $0x1c] sm:$0xf] %vm952_vm2, %v6281_v53  ;;  %v611_v0 = vshrl.u32 %v582_v56, 16  ;;  %v454_v2 = vadd.f32 %v7936_v58, %v453_v62  ;;  %v6894_v3 = vpop.f32.mrb[10].mxu0 }
 0x105   : > { %953 = vst.msk [vmem:[#allocation2 + $0xc] sm:$0xf] %vm952_vm2, %v6277_v59  ;;  %954 = vst.msk [vmem:[#allocation2 + $0x10] sm:$0xf] %vm952_vm2, %v6278_v60  ;;  %v620_v5 = vrot.slane %v618_v61, 7  ;;  %v621_v6 = vshll.u32 %v583_v50, 16  ;;  %v465_v7 = vadd.f32 %v6894_v3, %v7936_v58 }
 0x106   : > { %v456_v8 = vpop.f32.mrb[11].mxu0  ;;  %v613_v10 = vrot.slane %v611_v0, 7  ;;  %v614_v11 = vshll.u32 %v582_v56, 16  ;;  %v558_v12 = vmax.f32 %v462_v1, 0.0  ;;  %6004 = vrot.lane.b32.xlu0 %v462_v1, %s7753_s16  ;;  %v556_v17 = vmax.f32 %v454_v2, 0.0 }
 0x107   : > { %v457_v13 = vadd.f32 %v7936_v58, %v456_v8  ;;  %v623_v15 = vor.u32 %v621_v6, %v620_v5  ;;  %v762_v16 = vsel %vm7954_vm6, %v620_v5, 0  ;;  %v559_v18 = vmax.f32 %v465_v7, 0.0  ;;  %6006 = vrot.lane.b32.xlu1 %v465_v7, %s7753_s16 }
 0x108   : > { %v6288_v20 = vcombine.low %v762_v16, %v762_v16  ;;  %v616_v21 = vor.u32 %v614_v11, %v613_v10  ;;  %v761_v22 = vsel %vm7954_vm6, %v613_v10, 0 }
 0x109   : > { %v557_v24 = vmax.f32 %v457_v13, 0.0  ;;  %v746_v26 = vsel %vm7954_vm6, 0, %v623_v15  ;;  %v6285_v27 = vcombine.low %v761_v22, %v761_v22  ;;  %v585_v28 = vpack.c.bf16 %v559_v18, %v558_v12 }
 0x10a   : > { %v6286_v31 = vcombine.low %v746_v26, %v746_v26  ;;  %v6287_v32 = vcombine.high %v746_v26, %v746_v26  ;;  %965 = vst.msk [vmem:[#allocation2 + $0x38] sm:$0x1] %vm955_vm3, %v6288_v20  ;;  %v745_v33 = vsel %vm7954_vm6, 0, %v616_v21  ;;  %v6897_v35 = vpop.f32.mrb[12].mxu0  ;;  %6000 = vrot.lane.b32.xlu0 %v454_v2, %s7753_s16 }
 0x10b   : > { %v584_v34 = vpack.c.bf16 %v557_v24, %v556_v17  ;;  %v6283_v36 = vcombine.low %v745_v33, %v745_v33  ;;  %v6284_v37 = vcombine.high %v745_v33, %v745_v33  ;;  %962 = vst.msk [vmem:[#allocation2 + $0x2c] sm:$0x1] %vm955_vm3, %v6285_v27  ;;  %v632_v38 = vshrl.u32 %v585_v28, 16  ;;  %v469_v40 = vpop.f32.mrb[13].mxu0  ;;  %6002 = vrot.lane.b32.xlu1 %v457_v13, %s7753_s16  ;;  %v7602_v41 = vld [vmem:[#allocation2 + $0x18] sm:$0xff]  }
 0x10c   : > { %v635_v39 = vshll.u32 %v585_v28, 16  ;;  %963 = vst.msk [vmem:[#allocation2 + $0x30] sm:$0xf] %vm952_vm2, %v6286_v31  ;;  %964 = vst.msk [vmem:[#allocation2 + $0x34] sm:$0xf] %vm952_vm2, %v6287_v32  ;;  %v478_v44 = vadd.f32 %v6897_v35, %v7936_v58  ;;  %v470_v45 = vadd.f32 %v7936_v58, %v469_v40  ;;  %v6898_v46 = vpop.f32.mrb[14].mxu0 }
 0x10d   : > { %v625_v42 = vshrl.u32 %v584_v34, 16  ;;  %v628_v43 = vshll.u32 %v584_v34, 16  ;;  %v7601_v47 = vld [vmem:[#allocation2 + $0xc] sm:$0xff]   ;;  %960 = vst.msk [vmem:[#allocation2 + $0x24] sm:$0xf] %vm952_vm2, %v6283_v36  ;;  %v634_v48 = vrot.slane %v632_v38, 7  ;;  %v481_v49 = vadd.f32 %v6898_v46, %v7936_v58 }
 0x10e   : > { %961 = vst.msk [vmem:[#allocation2 + $0x28] sm:$0xf] %vm952_vm2, %v6284_v37  ;;  %v472_v50 = vpop.f32.mrb[15].mxu0  ;;  %v562_v52 = vmax.f32 %v478_v44, 0.0  ;;  %v560_v53 = vmax.f32 %v470_v45, 0.0  ;;  %6012 = vrot.lane.b32.xlu0 %v478_v44, %s7753_s16  ;;  %6918 = vmatmul.mubr.msk.bf16.vlgmr.msra.gmra.mrb[32].mxu0 %vm334_vm1, %v7601_v47 }
 0x10f   : > { %v627_v51 = vrot.slane %v625_v42, 7  ;;  %v473_v54 = vadd.f32 %v7936_v58, %v472_v50  ;;  %v8025_v56 = vld [vmem:[#allocation2 + $0xc] sm:$0xf]  ;;  %v637_v57 = vor.u32 %v635_v39, %v634_v48  ;;  %v764_v59 = vsel %vm7954_vm6, %v634_v48, 0  ;;  %6014 = vrot.lane.b32.xlu1 %v481_v49, %s7753_s16  ;;  %6921 = vmatprep.mubr.msk.bf16.mxu0 %vm334_vm1, %v7602_v41 }
 0x110   : > { %v563_v60 = vmax.f32 %v481_v49, 0.0  ;;  %v2982_v61 = vshrl.u32 %v8025_v56, 16  ;;  %v6294_v62 = vcombine.low %v764_v59, %v764_v59  ;;  %6950 = vmatpush3.bf16.msra.mxu0 %v7951_v23  ;;  %v2985_v41 = vshll.u32 %v8025_v56, 16 }
 0x111   : > { %v630_v0 = vor.u32 %v628_v43, %v627_v51  ;;  %v763_v1 = vsel %vm7954_vm6, %v627_v51, 0  ;;  %v561_v2 = vmax.f32 %v473_v54, 0.0  ;;  %v748_v3 = vsel %vm7954_vm6, 0, %v637_v57 }
 0x112   : > { %v6291_v5 = vcombine.low %v763_v1, %v763_v1  ;;  %v587_v6 = vpack.c.bf16 %v563_v60, %v562_v52  ;;  %v8037_v7 = vrot.slane %v2982_v61, 4  ;;  %v6292_v8 = vcombine.low %v748_v3, %v748_v3  ;;  %971 = vst.msk [vmem:[#allocation2 + $0x50] sm:$0x1] %vm955_vm3, %v6294_v62  ;;  %v6901_v13 = vpop.f32.mrb[16].mxu0  ;;  %6008 = vrot.lane.b32.xlu0 %v470_v45, %s7753_s16 }
 0x113   : > { %v6293_v10 = vcombine.high %v748_v3, %v748_v3  ;;  %v747_v11 = vsel %vm7954_vm6, 0, %v630_v0  ;;  %v586_v12 = vpack.c.bf16 %v561_v2, %v560_v53  ;;  %v485_v18 = vpop.f32.mrb[17].mxu0  ;;  %6010 = vrot.lane.b32.xlu1 %v473_v54, %s7753_s16  ;;  %v7604_v20 = vld [vmem:[#allocation2 + $0x30] sm:$0xff]   ;;  %v494_v24 = vadd.f32 %v6901_v13, %v7936_v58 }
 0x114   : > { %v6289_v15 = vcombine.low %v747_v11, %v747_v11  ;;  %v6290_v23 = vcombine.high %v747_v11, %v747_v11  ;;  %968 = vst.msk [vmem:[#allocation2 + $0x44] sm:$0x1] %vm955_vm3, %v6291_v5  ;;  %v646_v16 = vshrl.u32 %v587_v6, 16  ;;  %v649_v17 = vshll.u32 %v587_v6, 16  ;;  %v6902_v27 = vpop.f32.mrb[18].mxu0 }
 0x115   : > { %969 = vst.msk [vmem:[#allocation2 + $0x48] sm:$0xf] %vm952_vm2, %v6292_v8  ;;  %970 = vst.msk [vmem:[#allocation2 + $0x4c] sm:$0xf] %vm952_vm2, %v6293_v10  ;;  %v639_v21 = vshrl.u32 %v586_v12, 16  ;;  %v642_v22 = vshll.u32 %v586_v12, 16  ;;  %v486_v26 = vadd.f32 %v7936_v58, %v485_v18  ;;  %v497_v32 = vadd.f32 %v6902_v27, %v7936_v58 }
 0x116   : > { %v7603_v28 = vld [vmem:[#allocation2 + $0x24] sm:$0xff]   ;;  %966 = vst.msk [vmem:[#allocation2 + $0x3c] sm:$0xf] %vm952_vm2, %v6289_v15  ;;  %967 = vst.msk [vmem:[#allocation2 + $0x40] sm:$0xf] %vm952_vm2, %v6290_v23  ;;  %v648_v31 = vrot.slane %v646_v16, 7  ;;  %6020 = vrot.lane.b32.xlu0 %v494_v24, %s7753_s16 }
 0x117   : > { %v488_v33 = vpop.f32.mrb[19].mxu0  ;;  %v641_v34 = vrot.slane %v639_v21, 7  ;;  %v566_v35 = vmax.f32 %v494_v24, 0.0  ;;  %v564_v36 = vmax.f32 %v486_v26, 0.0  ;;  %6922 = vmatmul.mubr.msk.bf16.gmra.mrb[36].mxu0 %vm334_vm1, %v7603_v28  ;;  %v567_v40 = vmax.f32 %v497_v32, 0.0  ;;  %6022 = vrot.lane.b32.xlu1 %v497_v32, %s7753_s16 }
 0x118   : > { %v489_v37 = vadd.f32 %v7936_v58, %v488_v33  ;;  %v651_v38 = vor.u32 %v649_v17, %v648_v31  ;;  %v766_v39 = vsel %vm7954_vm6, %v648_v31, 0  ;;  %6925 = vmatprep.mubr.msk.bf16.mxu0 %vm334_vm1, %v7604_v20  ;;  %v8064_v49 = vrot.slane %v2985_v41, 5  ;;  %v8082_v23 = vld [vmem:[#allocation2 + $0x10] sm:$0xf] }
 0x119   : > { %v6300_v42 = vcombine.low %v766_v39, %v766_v39  ;;  %v644_v43 = vor.u32 %v642_v22, %v641_v34  ;;  %v765_v44 = vsel %vm7954_vm6, %v641_v34, 0  ;;  %v589_v48 = vpack.c.bf16 %v567_v40, %v566_v35 }
 0x11a   : > { %v565_v45 = vmax.f32 %v489_v37, 0.0  ;;  %v750_v46 = vsel %vm7954_vm6, 0, %v651_v38  ;;  %v6297_v47 = vcombine.low %v765_v44, %v765_v44  ;;  %v6905_v54 = vpop.f32.mrb[20].mxu0  ;;  %6016 = vrot.lane.b32.xlu0 %v486_v26, %s7753_s16  ;;  %v2991_v32 = vshll.u32 %v8082_v23, 16 }
 0x11b   : > { %v6298_v50 = vcombine.low %v750_v46, %v750_v46  ;;  %v6299_v51 = vcombine.high %v750_v46, %v750_v46  ;;  %977 = vst.msk [vmem:[#allocation2 + $0x68] sm:$0x1] %vm955_vm3, %v6300_v42  ;;  %v749_v52 = vsel %vm7954_vm6, 0, %v644_v43  ;;  %v660_v59 = vshrl.u32 %v589_v48, 16  ;;  %v501_v61 = vpop.f32.mrb[21].mxu0  ;;  %6018 = vrot.lane.b32.xlu1 %v489_v37, %s7753_s16 }
 0x11c   : > { %v588_v53 = vpack.c.bf16 %v565_v45, %v564_v36  ;;  %v6295_v56 = vcombine.low %v749_v52, %v749_v52  ;;  %v6296_v57 = vcombine.high %v749_v52, %v749_v52  ;;  %974 = vst.msk [vmem:[#allocation2 + $0x5c] sm:$0x1] %vm955_vm3, %v6297_v47  ;;  %v663_v60 = vshll.u32 %v589_v48, 16  ;;  %v6906_v2 = vpop.f32.mrb[22].mxu0  ;;  %v7606_v5 = vld [vmem:[#allocation2 + $0x48] sm:$0xff]  }
 0x11d   : > { %975 = vst.msk [vmem:[#allocation2 + $0x60] sm:$0xf] %vm952_vm2, %v6298_v50  ;;  %976 = vst.msk [vmem:[#allocation2 + $0x64] sm:$0xf] %vm952_vm2, %v6299_v51  ;;  %v510_v0 = vadd.f32 %v6905_v54, %v7936_v58  ;;  %v502_v1 = vadd.f32 %v7936_v58, %v501_v61  ;;  %v7605_v3 = vld [vmem:[#allocation2 + $0x3c] sm:$0xff]   ;;  %v662_v6 = vrot.slane %v660_v59, 7  ;;  %v513_v8 = vadd.f32 %v6906_v2, %v7936_v58 }
 0x11e   : > { %v653_v62 = vshrl.u32 %v588_v53, 16  ;;  %972 = vst.msk [vmem:[#allocation2 + $0x54] sm:$0xf] %vm952_vm2, %v6295_v56  ;;  %973 = vst.msk [vmem:[#allocation2 + $0x58] sm:$0xf] %vm952_vm2, %v6296_v57  ;;  %v504_v10 = vpop.f32.mrb[23].mxu0 }
 0x11f   : > { %v656_v12 = vshll.u32 %v588_v53, 16  ;;  %v570_v13 = vmax.f32 %v510_v0, 0.0  ;;  %v505_v15 = vadd.f32 %v7936_v58, %v504_v10  ;;  %6028 = vrot.lane.b32.xlu0 %v510_v0, %s7753_s16  ;;  %6926 = vmatmul.mubr.msk.bf16.gmra.mrb[40].mxu0 %vm334_vm1, %v7605_v3  ;;  %v665_v16 = vor.u32 %v663_v60, %v662_v6 }
 0x120   : > { %v655_v11 = vrot.slane %v653_v62, 7  ;;  %v768_v17 = vsel %vm7954_vm6, %v662_v6, 0  ;;  %v568_v18 = vmax.f32 %v502_v1, 0.0  ;;  %v571_v20 = vmax.f32 %v513_v8, 0.0  ;;  %6030 = vrot.lane.b32.xlu1 %v513_v8, %s7753_s16  ;;  %6929 = vmatprep.mubr.msk.bf16.mxu0 %vm334_vm1, %v7606_v5 }
 0x121   : > { %v6306_v21 = vcombine.low %v768_v17, %v768_v17  ;;  %v569_v26 = vmax.f32 %v505_v15, 0.0  ;;  %v752_v27 = vsel %vm7954_vm6, 0, %v665_v16  ;;  %v8117_v10 = vrot.slane %v2991_v32, 5 }
 0x122   : > { %v658_v22 = vor.u32 %v656_v12, %v655_v11  ;;  %v767_v24 = vsel %vm7954_vm6, %v655_v11, 0  ;;  %v591_v31 = vpack.c.bf16 %v571_v20, %v570_v13  ;;  %v6304_v33 = vcombine.low %v752_v27, %v752_v27  ;;  %v6909_v37 = vpop.f32.mrb[24].mxu0 }
 0x123   : > { %v6303_v28 = vcombine.low %v767_v24, %v767_v24  ;;  %v6305_v34 = vcombine.high %v752_v27, %v752_v27  ;;  %983 = vst.msk [vmem:[#allocation2 + $0x80] sm:$0x1] %vm955_vm3, %v6306_v21  ;;  %v590_v36 = vpack.c.bf16 %v569_v26, %v568_v18  ;;  %6024 = vrot.lane.b32.xlu0 %v502_v1, %s7753_s16  ;;  %v517_v42 = vpop.f32.mrb[25].mxu0 }
 0x124   : > { %v751_v35 = vsel %vm7954_vm6, 0, %v658_v22  ;;  %v674_v40 = vshrl.u32 %v591_v31, 16  ;;  %v677_v41 = vshll.u32 %v591_v31, 16  ;;  %6026 = vrot.lane.b32.xlu1 %v505_v15, %s7753_s16  ;;  %981 = vst.msk [vmem:[#allocation2 + $0x78] sm:$0xf] %vm952_vm2, %v6304_v33  ;;  %v526_v44 = vadd.f32 %v6909_v37, %v7936_v58  ;;  %v6910_v46 = vpop.f32.mrb[26].mxu0 }
 0x125   : > { %v6301_v38 = vcombine.low %v751_v35, %v751_v35  ;;  %v6302_v39 = vcombine.high %v751_v35, %v751_v35  ;;  %980 = vst.msk [vmem:[#allocation2 + $0x74] sm:$0x1] %vm955_vm3, %v6303_v28  ;;  %v667_v43 = vshrl.u32 %v590_v36, 16  ;;  %v518_v45 = vadd.f32 %v7936_v58, %v517_v42  ;;  %v7607_v47 = vld [vmem:[#allocation2 + $0x54] sm:$0xff]   ;;  %v7608_v48 = vld [vmem:[#allocation2 + $0x60] sm:$0xff]   ;;  %v520_v52 = vpop.f32.mrb[27].mxu0 }
 0x126   : > { %982 = vst.msk [vmem:[#allocation2 + $0x7c] sm:$0xf] %vm952_vm2, %v6305_v34  ;;  %v676_v50 = vrot.slane %v674_v40, 7  ;;  %v529_v51 = vadd.f32 %v6910_v46, %v7936_v58  ;;  %v670_v54 = vshll.u32 %v590_v36, 16  ;;  %v574_v56 = vmax.f32 %v526_v44, 0.0 }
 0x127   : > { %978 = vst.msk [vmem:[#allocation2 + $0x6c] sm:$0xf] %vm952_vm2, %v6301_v38  ;;  %979 = vst.msk [vmem:[#allocation2 + $0x70] sm:$0xf] %vm952_vm2, %v6302_v39  ;;  %v669_v53 = vrot.slane %v667_v43, 7  ;;  %v521_v57 = vadd.f32 %v7936_v58, %v520_v52  ;;  %6036 = vrot.lane.b32.xlu0 %v526_v44, %s7753_s16  ;;  %6930 = vmatmul.mubr.msk.bf16.gmra.mrb[44].mxu0 %vm334_vm1, %v7607_v47  ;;  %v572_v61 = vmax.f32 %v518_v45, 0.0 }
 0x128   : > { %v679_v59 = vor.u32 %v677_v41, %v676_v50  ;;  %v770_v60 = vsel %vm7954_vm6, %v676_v50, 0  ;;  %v575_v62 = vmax.f32 %v529_v51, 0.0  ;;  %6038 = vrot.lane.b32.xlu1 %v529_v51, %s7753_s16  ;;  %6933 = vmatprep.mubr.msk.bf16.mxu0 %vm334_vm1, %v7608_v48 }
 0x129   : > { %v6312_v0 = vcombine.low %v770_v60, %v770_v60  ;;  %v672_v1 = vor.u32 %v670_v54, %v669_v53  ;;  %v769_v2 = vsel %vm7954_vm6, %v669_v53, 0  ;;  %v573_v3 = vmax.f32 %v521_v57, 0.0  ;;  %v2935_v60 = vld [vmem:[#allocation2 + $0x14] sm:$0x1] }
 0x12a   : > { %v754_v5 = vsel %vm7954_vm6, 0, %v679_v59  ;;  %v6309_v6 = vcombine.low %v769_v2, %v769_v2  ;;  %v593_v8 = vpack.c.bf16 %v575_v62, %v574_v56  ;;  %v6913_v16 = vpop.f32.mrb[28].mxu0  ;;  %v2995_v53 = vshrl.u32 %v8082_v23, 16 }
 0x12b   : > { %v6310_v11 = vcombine.low %v754_v5, %v754_v5  ;;  %v6311_v12 = vcombine.high %v754_v5, %v754_v5  ;;  %989 = vst.msk [vmem:[#allocation2 + $0x98] sm:$0x1] %vm955_vm3, %v6312_v0  ;;  %v753_v13 = vsel %vm7954_vm6, 0, %v672_v1  ;;  %v592_v15 = vpack.c.bf16 %v573_v3, %v572_v61  ;;  %6032 = vrot.lane.b32.xlu0 %v518_v45, %s7753_s16  ;;  %v533_v22 = vpop.f32.mrb[29].mxu0  ;;  %v1376_v61 = vld [vmem:[#allocation2 + $0xc] sm:$0xf] }
 0x12c   : > { %v6307_v17 = vcombine.low %v753_v13, %v753_v13  ;;  %v6308_v18 = vcombine.high %v753_v13, %v753_v13  ;;  %986 = vst.msk [vmem:[#allocation2 + $0x8c] sm:$0x1] %vm955_vm3, %v6309_v6  ;;  %v688_v20 = vshrl.u32 %v593_v8, 16  ;;  %v691_v21 = vshll.u32 %v593_v8, 16  ;;  %6034 = vrot.lane.b32.xlu1 %v521_v57, %s7753_s16  ;;  %v6914_v31 = vpop.f32.mrb[30].mxu0 }
 0x12d   : > { %987 = vst.msk [vmem:[#allocation2 + $0x90] sm:$0xf] %vm952_vm2, %v6310_v11  ;;  %988 = vst.msk [vmem:[#allocation2 + $0x94] sm:$0xf] %vm952_vm2, %v6311_v12  ;;  %v681_v24 = vshrl.u32 %v592_v15, 16  ;;  %v684_v26 = vshll.u32 %v592_v15, 16  ;;  %v542_v27 = vadd.f32 %v6913_v16, %v7936_v58  ;;  %v534_v28 = vadd.f32 %v7936_v58, %v533_v22 }
 0x12e   : > { %v7609_v32 = vld [vmem:[#allocation2 + $0x6c] sm:$0xff]   ;;  %984 = vst.msk [vmem:[#allocation2 + $0x84] sm:$0xf] %vm952_vm2, %v6307_v17  ;;  %985 = vst.msk [vmem:[#allocation2 + $0x88] sm:$0xf] %vm952_vm2, %v6308_v18  ;;  %v690_v33 = vrot.slane %v688_v20, 7  ;;  %v545_v34 = vadd.f32 %v6914_v31, %v7936_v58  ;;  %v2988_v6 = vor.u32 %v8064_v49, %v8037_v7 }
 0x12f   : > { %v536_v35 = vpop.f32.mrb[31].mxu0  ;;  %v7611_v36 = vld [vmem:[#allocation2 + $0x78] sm:$0xff]   ;;  %v683_v37 = vrot.slane %v681_v24, 7  ;;  %v578_v38 = vmax.f32 %v542_v27, 0.0  ;;  %v576_v39 = vmax.f32 %v534_v28, 0.0  ;;  %6040 = vrot.lane.b32.xlu0 %v534_v28, %s7753_s16  ;;  %6934 = vmatmul.mubr.msk.bf16.gmra.mrb[48].mxu0 %vm334_vm1, %v7609_v32  ;;  %v7610_v41 = vld [vmem:[#allocation2 + $0x6c] sm:$0xff]  }
 0x130   : > { %v537_v40 = vadd.f32 %v7936_v58, %v536_v35  ;;  %v693_v42 = vor.u32 %v691_v21, %v690_v33  ;;  %v772_v43 = vsel %vm7954_vm6, %v690_v33, 0  ;;  %v579_v44 = vmax.f32 %v545_v34, 0.0  ;;  %7035 = vmatprep.mubr.msk.bf16.mxu1 %vm334_vm1, %v7610_v41  ;;  %v7612_v58 = vld [vmem:[#allocation2 + $0x78] sm:$0xff]   ;;  %v1377_v28 = vld [vmem:[#allocation2 + $0x10] sm:$0xf] }
 0x131   : > { %v6318_v45 = vcombine.low %v772_v43, %v772_v43  ;;  %v686_v46 = vor.u32 %v684_v26, %v683_v37  ;;  %v771_v47 = vsel %vm7954_vm6, %v683_v37, 0  ;;  %7036 = vmatmul.mubr.msk.bf16.vlgmr.msra.gmra.mrb[0].mxu1 %vm334_vm1, %v7611_v36  ;;  %6937 = vmatprep.mubr.msk.bf16.mxu0 %vm334_vm1, %v7612_v58  ;;  %v2997_v12 = vrot.slane %v2995_v53, 4  ;;  %v1379_v36 = vld [vmem:[#allocation2 + $0x18] sm:$0xf]  ;;  %v1381_v43 = vld [vmem:[#allocation2 + $0x20] sm:$0x1] }
 0x132   : > { %v577_v48 = vmax.f32 %v537_v40, 0.0  ;;  %6042 = vrot.lane.b32.xlu1 %v537_v40, %s7753_s16  ;;  %v756_v50 = vsel %vm7954_vm6, 0, %v693_v42  ;;  %v6315_v51 = vcombine.low %v771_v47, %v771_v47  ;;  %v595_v52 = vpack.c.bf16 %v579_v44, %v578_v38  ;;  %7052 = vmatpush3.bf16.msra.mxu1 %v7947_v19  ;;  %v1380_v42 = vld [vmem:[#allocation2 + $0x1c] sm:$0xf] }
 0x133   : > { %v6316_v54 = vcombine.low %v756_v50, %v756_v50  ;;  %v6317_v56 = vcombine.high %v756_v50, %v756_v50  ;;  %995 = vst.msk [vmem:[#allocation2 + $0xb0] sm:$0x1] %vm955_vm3, %v6318_v45  ;;  %v755_v57 = vsel %vm7954_vm6, 0, %v686_v46  ;;  %6044 = vrot.lane.b32.xlu0 %v542_v27, %s7753_s16  ;;  %7552 = vmatprep.subr.msk.bf16.mxu1 %vm383_vm0, %v7996_v14  ;;  %v3001_v17 = vshll.u32 %v2935_v60, 16  ;;  %v2936_v60 = vld [vmem:[#allocation2 + $0x18] sm:$0xf] }
 0x134   : > { %v594_v59 = vpack.c.bf16 %v577_v48, %v576_v39  ;;  %v6313_v62 = vcombine.low %v755_v57, %v755_v57  ;;  %v6314_v0 = vcombine.high %v755_v57, %v755_v57  ;;  %992 = vst.msk [vmem:[#allocation2 + $0xa4] sm:$0x1] %vm955_vm3, %v6315_v51  ;;  %v702_v1 = vshrl.u32 %v595_v52, 16  ;;  %v7615_v14 = vld [vmem:[#allocation2 + $0x90] sm:$0xff]  }
 0x135   : > { %v705_v23 = vshll.u32 %v595_v52, 16  ;;  %993 = vst.msk [vmem:[#allocation2 + $0xa8] sm:$0xf] %vm952_vm2, %v6316_v54  ;;  %994 = vst.msk [vmem:[#allocation2 + $0xac] sm:$0xf] %vm952_vm2, %v6317_v56  ;;  %v7613_v5 = vld [vmem:[#allocation2 + $0x84] sm:$0xff]   ;;  %v2998_v7 = vor.u32 %v2997_v12, %v8117_v10  ;;  %v1437_v58 = vsel %vm8182_vm9, %v7984_v4, %v7959_v29  ;;  %v1447_v50 = vsel %vm8182_vm9, %v7989_v9, %v7978_v63 }
 0x136   : > { %v695_v19 = vshrl.u32 %v594_v59, 16  ;;  %v698_v2 = vshll.u32 %v594_v59, 16  ;;  %6046 = vrot.lane.b32.xlu1 %v545_v34, %s7753_s16  ;;  %990 = vst.msk [vmem:[#allocation2 + $0x9c] sm:$0xf] %vm952_vm2, %v6313_v62  ;;  %991 = vst.msk [vmem:[#allocation2 + $0xa0] sm:$0xf] %vm952_vm2, %v6314_v0  ;;  %s9516_s16 = scalar_lea.hbm %s9576_s7, %s6693_s9 }
 0x137   : > { %v704_v3 = vrot.slane %v702_v1, 7  ;;  %v7614_v11 = vld [vmem:[#allocation2 + $0x84] sm:$0xff]   ;;  %6938 = vmatmul.mubr.msk.bf16.gmra.mrb[52].mxu0 %vm334_vm1, %v7613_v5  ;;  %v7616_v16 = vld [vmem:[#allocation2 + $0x90] sm:$0xff]   ;;  %v1449_v18 = vshrl.u32 %v1376_v61, 16  ;;  %v8172_v26 = vrot.slane %v2988_v6, 4  ;;  %v8174_v27 = vrot.slane %v3001_v17, 5 }
 0x138   : > { %v697_v8 = vrot.slane %v695_v19, 7  ;;  %7039 = vmatprep.mubr.msk.bf16.mxu1 %vm334_vm1, %v7614_v11  ;;  %6941 = vmatprep.mubr.msk.bf16.mxu0 %vm334_vm1, %v7615_v14  ;;  %v1378_v34 = vld [vmem:[#allocation2 + $0x14] sm:$0x1]  ;;  %v2999_v40 = vrot.slane %v2998_v7, 4  ;;  %v1452_v41 = vshll.u32 %v1376_v61, 16  ;;  %v1458_v44 = vshll.u32 %v1377_v28, 16 }
 0x139   : > { %v707_v13 = vor.u32 %v705_v23, %v704_v3  ;;  %v774_v15 = vsel %vm7954_vm6, %v704_v3, 0  ;;  %7040 = vmatmul.mubr.msk.bf16.gmra.mrb[4].mxu1 %vm334_vm1, %v7616_v16  ;;  %v1451_v35 = vrot.slane %v1449_v18, 4  ;;  %v2994_v48 = vsel %vm8182_vm9, %v8172_v26, %v8117_v10  ;;  %v2938_v3 = vld [vmem:[#allocation2 + $0x20] sm:$0x1] }
 0x13a   : > { %v6324_v20 = vcombine.low %v774_v15, %v774_v15  ;;  %v700_v21 = vor.u32 %v698_v2, %v697_v8  ;;  %v773_v22 = vsel %vm7954_vm6, %v697_v8, 0  ;;  %v1454_v46 = vrot.slane %v1452_v41, 5  ;;  %v2937_v2 = vld [vmem:[#allocation2 + $0x1c] sm:$0xf] }
 0x13b   : > { %v758_v49 = vsel %vm7954_vm6, 0, %v707_v13  ;;  %v6321_v24 = vcombine.low %v773_v22, %v773_v22  ;;  %v1460_v51 = vrot.slane %v1458_v44, 5  ;;  %v1462_v54 = vshrl.u32 %v1377_v28, 16 }
 0x13c   : > { %v6322_v31 = vcombine.low %v758_v49, %v758_v49  ;;  %v6323_v32 = vcombine.high %v758_v49, %v758_v49  ;;  %1001 = vst.msk [vmem:[#allocation2 + $0xc8] sm:$0x1] %vm955_vm3, %v6324_v20  ;;  %v757_v33 = vsel %vm7954_vm6, 0, %v700_v21  ;;  %v7619_v47 = vld [vmem:[#allocation2 + $0xa8] sm:$0xff]   ;;  %v1455_v53 = vor.u32 %v1454_v46, %v1451_v35 }
 0x13d   : > { %v6319_v37 = vcombine.low %v757_v33, %v757_v33  ;;  %v6320_v38 = vcombine.high %v757_v33, %v757_v33  ;;  %998 = vst.msk [vmem:[#allocation2 + $0xbc] sm:$0x1] %vm955_vm3, %v6321_v24  ;;  %v7617_v25 = vld [vmem:[#allocation2 + $0x9c] sm:$0xff]   ;;  %v7620_v52 = vld [vmem:[#allocation2 + $0xa8] sm:$0xff]   ;;  %v1468_v56 = vshll.u32 %v1378_v34, 16  ;;  %v1473_v10 = vshrl.u32 %v1379_v36, 16 }
 0x13e   : > { %999 = vst.msk [vmem:[#allocation2 + $0xc0] sm:$0xf] %vm952_vm2, %v6322_v31  ;;  %1000 = vst.msk [vmem:[#allocation2 + $0xc4] sm:$0xf] %vm952_vm2, %v6323_v32  ;;  %v7618_v45 = vld [vmem:[#allocation2 + $0x9c] sm:$0xff]   ;;  %v1476_v57 = vshll.u32 %v1379_v36, 16  ;;  %v3004_v63 = vsel %vm8182_vm9, %v2999_v40, %v8174_v27  ;;  %v6359_v14 = vcombine.low %v1437_v58, %v1447_v50 }
 0x13f   : > { %996 = vst.msk [vmem:[#allocation2 + $0xb4] sm:$0xf] %vm952_vm2, %v6319_v37  ;;  %997 = vst.msk [vmem:[#allocation2 + $0xb8] sm:$0xf] %vm952_vm2, %v6320_v38  ;;  %6942 = vmatmul.mubr.msk.bf16.gmra.mrb[56].mxu0 %vm334_vm1, %v7617_v25  ;;  %7043 = vmatprep.mubr.msk.bf16.mxu1 %vm334_vm1, %v7618_v45  ;;  %v1482_v59 = vshll.u32 %v1380_v42, 16  ;;  %v1486_v29 = vshrl.u32 %v1380_v42, 16  ;;  %v6474_v17 = vcombine.low %v2994_v48, %v3004_v63 }
 0x140   : > { %6945 = vmatprep.mubr.msk.bf16.mxu0 %vm334_vm1, %v7619_v47  ;;  %v1492_v4 = vshll.u32 %v1381_v43, 16  ;;  %v1456_v9 = vrot.slane %v1455_v53, 4  ;;  %v1464_v61 = vrot.slane %v1462_v54, 4  ;;  %v1475_v62 = vrot.slane %v1473_v10, 4  ;;  %v2939_v24 = vld [vmem:[#allocation2 + $0x24] sm:$0xf] }
 0x141   : > { %7044 = vmatmul.mubr.msk.bf16.gmra.mrb[8].mxu1 %vm334_vm1, %v7620_v52  ;;  %v1470_v0 = vrot.slane %v1468_v56, 5  ;;  %v1478_v1 = vrot.slane %v1476_v57, 5  ;;  %v1484_v23 = vrot.slane %v1482_v59, 5  ;;  %v1488_v19 = vrot.slane %v1486_v29, 4  ;;  %v2940_v33 = vld [vmem:[#allocation2 + $0x28] sm:$0xf] }
 0x142   : > { %v1465_v5 = vor.u32 %v1464_v61, %v1460_v51  ;;  %v1494_v6 = vrot.slane %v1492_v4, 5  ;;  %v3006_v8 = vshrl.u32 %v2936_v60, 16  ;;  %v3009_v15 = vshll.u32 %v2936_v60, 16  ;;  %v2941_v38 = vld [vmem:[#allocation2 + $0x2c] sm:$0x1] }
 0x143   : > { %v1479_v12 = vor.u32 %v1478_v1, %v1475_v62  ;;  %v1489_v13 = vor.u32 %v1488_v19, %v1484_v23  ;;  %v1461_v18 = vsel %vm8182_vm9, %v1456_v9, %v1460_v51  ;;  %v3015_v28 = vshll.u32 %v2937_v2, 16  ;;  %v1382_v40 = vld [vmem:[#allocation2 + $0x24] sm:$0xf]  ;;  %v1383_v48 = vld [vmem:[#allocation2 + $0x28] sm:$0xf] }
 0x144   : > { %v1466_v20 = vrot.slane %v1465_v5, 4  ;;  %v3008_v7 = vrot.slane %v3006_v8, 4  ;;  %v3011_v49 = vrot.slane %v3009_v15, 5  ;;  %v3019_v31 = vshrl.u32 %v2937_v2, 16  ;;  %v1384_v52 = vld [vmem:[#allocation2 + $0x2c] sm:$0x1] }
 0x145   : > { %v1480_v21 = vrot.slane %v1479_v12, 4  ;;  %v1490_v22 = vrot.slane %v1489_v13, 4  ;;  %v7623_v26 = vld [vmem:[#allocation2 + $0xc0] sm:$0xff]   ;;  %v3025_v32 = vshll.u32 %v2938_v3, 16  ;;  %v3017_v42 = vrot.slane %v3015_v28, 5 }
 0x146   : > { %v7621_v11 = vld [vmem:[#allocation2 + $0xb4] sm:$0xff]   ;;  %v1471_v27 = vsel %vm8182_vm9, %v1466_v20, %v1470_v0  ;;  %v3012_v37 = vor.u32 %v3011_v49, %v3008_v7  ;;  %v3021_v43 = vrot.slane %v3019_v31, 4  ;;  %v3030_v45 = vshrl.u32 %v2939_v24, 16  ;;  %v1385_v59 = vld [vmem:[#allocation2 + $0x30] sm:$0xf] }
 0x147   : > { %v7622_v16 = vld [vmem:[#allocation2 + $0xb4] sm:$0xff]   ;;  %6946 = vmatmul.mubr.msk.bf16.gmra.mrb[60].mxu0 %vm334_vm1, %v7621_v11  ;;  %v6360_v34 = vcombine.low %v1461_v18, %v1471_v27  ;;  %v1485_v35 = vsel %vm8182_vm9, %v1480_v21, %v1484_v23  ;;  %v1495_v36 = vsel %vm8182_vm9, %v1490_v22, %v1494_v6  ;;  %v3027_v25 = vrot.slane %v3025_v32, 5  ;;  %v2942_v22 = vld [vmem:[#allocation2 + $0x30] sm:$0xf] }
 0x148   : > { %7047 = vmatprep.mubr.msk.bf16.mxu1 %vm334_vm1, %v7622_v16  ;;  %6951 = vmatprep.mubr.msk.bf16.mxu0 %vm334_vm1, %v6359_v14  ;;  %v6361_v41 = vcombine.low %v1485_v35, %v1495_v36  ;;  %v3013_v44 = vrot.slane %v3012_v37, 4  ;;  %v3033_v46 = vshll.u32 %v2939_v24, 16  ;;  %v3039_v47 = vshll.u32 %v2940_v33, 16  ;;  %v1386_v2 = vld [vmem:[#allocation2 + $0x34] sm:$0xf] }
 0x149   : > { %7048 = vmatmul.mubr.msk.bf16.gmra.mrb[12].mxu1 %vm334_vm1, %v7623_v26  ;;  %v3022_v58 = vor.u32 %v3021_v43, %v3017_v42  ;;  %v3043_v50 = vshrl.u32 %v2940_v33, 16  ;;  %v3049_v51 = vshll.u32 %v2941_v38, 16  ;;  %v1497_v53 = vshrl.u32 %v1382_v40, 16  ;;  %v1387_v14 = vld [vmem:[#allocation2 + $0x38] sm:$0x1] }
 0x14a   : > { %7053 = vmatprep.mubr.msk.bf16.mxu1 %vm334_vm1, %v6474_v17  ;;  %v3018_v54 = vsel %vm8182_vm9, %v3013_v44, %v3017_v42  ;;  %v3032_v56 = vrot.slane %v3030_v45, 4  ;;  %v3035_v10 = vrot.slane %v3033_v46, 5  ;;  %v3041_v57 = vrot.slane %v3039_v47, 5  ;;  %v2943_v27 = vld [vmem:[#allocation2 + $0x34] sm:$0xf] }
 0x14b   : > { %v3023_v29 = vrot.slane %v3022_v58, 4  ;;  %v3045_v4 = vrot.slane %v3043_v50, 4  ;;  %v3051_v60 = vrot.slane %v3049_v51, 5  ;;  %v1499_v63 = vrot.slane %v1497_v53, 4  ;;  %v2945_v43 = vld [vmem:[#allocation2 + $0x3c] sm:$0xf] }
 0x14c   : > { %v3036_v9 = vor.u32 %v3035_v10, %v3032_v56  ;;  %v1500_v61 = vshll.u32 %v1382_v40, 16  ;;  %v1506_v62 = vshll.u32 %v1383_v48, 16  ;;  %v1510_v0 = vshrl.u32 %v1383_v48, 16  ;;  %v2944_v40 = vld [vmem:[#allocation2 + $0x38] sm:$0x1] }
 0x14d   : > { %v3028_v1 = vsel %vm8182_vm9, %v3023_v29, %v3027_v25  ;;  %v3046_v23 = vor.u32 %v3045_v4, %v3041_v57  ;;  %v1516_v19 = vshll.u32 %v1384_v52, 16  ;;  %v1521_v3 = vshrl.u32 %v1385_v59, 16  ;;  %v2946_v47 = vld [vmem:[#allocation2 + $0x40] sm:$0xf] }
 0x14e   : > { %v6475_v5 = vcombine.low %v3018_v54, %v3028_v1  ;;  %v3037_v6 = vrot.slane %v3036_v9, 4  ;;  %v1502_v8 = vrot.slane %v1500_v61, 5  ;;  %v1508_v11 = vrot.slane %v1506_v62, 5 }
 0x14f   : > { %6952 = vmatmul.mubr.msk.bf16.vlgmr.msra.gmra.mrb[32].mxu0 %vm334_vm1, %v6360_v34  ;;  %v3047_v12 = vrot.slane %v3046_v23, 4  ;;  %v1512_v13 = vrot.slane %v1510_v0, 4  ;;  %v1518_v15 = vrot.slane %v1516_v19, 5  ;;  %v1523_v16 = vrot.slane %v1521_v3, 4  ;;  %v1389_v0 = vld [vmem:[#allocation2 + $0x40] sm:$0xf] }
 0x150   : > { %6955 = vmatprep.mubr.msk.bf16.mxu0 %vm334_vm1, %v6361_v41  ;;  %v3042_v17 = vsel %vm8182_vm9, %v3037_v6, %v3041_v57  ;;  %v1503_v18 = vor.u32 %v1502_v8, %v1499_v63  ;;  %v1524_v20 = vshll.u32 %v1385_v59, 16  ;;  %v1530_v21 = vshll.u32 %v1386_v2, 16  ;;  %v2947_v59 = vld [vmem:[#allocation2 + $0x44] sm:$0x1] }
 0x151   : > { %7054 = vmatmul.mubr.msk.bf16.vlgmr.msra.gmra.mrb[16].mxu1 %vm334_vm1, %v6475_v5  ;;  %v3052_v7 = vsel %vm8182_vm9, %v3047_v12, %v3051_v60  ;;  %v1513_v49 = vor.u32 %v1512_v13, %v1508_v11  ;;  %v1534_v24 = vshrl.u32 %v1386_v2, 16  ;;  %v1540_v26 = vshll.u32 %v1387_v14, 16  ;;  %v1388_v60 = vld [vmem:[#allocation2 + $0x3c] sm:$0xf]  ;;  %v1390_v12 = vld [vmem:[#allocation2 + $0x44] sm:$0x1] }
 0x152   : > { %7086 = vmatpush3.bf16.msra.mxu1 %v8007_v30  ;;  %v6476_v28 = vcombine.low %v3042_v17, %v3052_v7  ;;  %v1504_v31 = vrot.slane %v1503_v18, 4  ;;  %v1526_v32 = vrot.slane %v1524_v20, 5  ;;  %v1532_v33 = vrot.slane %v1530_v21, 5 }
 0x153   : > { %v1514_v34 = vrot.slane %v1513_v49, 4  ;;  %v1536_v35 = vrot.slane %v1534_v24, 4  ;;  %v1542_v36 = vrot.slane %v1540_v26, 5  ;;  %v3054_v37 = vshrl.u32 %v2942_v22, 16 }
 0x154   : > { %7057 = vmatprep.mubr.msk.bf16.mxu1 %vm334_vm1, %v6476_v28  ;;  %v1509_v30 = vsel %vm8182_vm9, %v1504_v31, %v1508_v11  ;;  %v1527_v38 = vor.u32 %v1526_v32, %v1523_v16  ;;  %v3057_v41 = vshll.u32 %v2942_v22, 16  ;;  %v3063_v42 = vshll.u32 %v2943_v27, 16  ;;  %v1391_v16 = vld [vmem:[#allocation2 + $0x48] sm:$0xf]  ;;  %v1392_v22 = vld [vmem:[#allocation2 + $0x4c] sm:$0xf] }
 0x155   : > { %v1519_v25 = vsel %vm8182_vm9, %v1514_v34, %v1518_v15  ;;  %v1537_v44 = vor.u32 %v1536_v35, %v1532_v33  ;;  %v3056_v45 = vrot.slane %v3054_v37, 4  ;;  %v3067_v46 = vshrl.u32 %v2943_v27, 16  ;;  %v1393_v35 = vld [vmem:[#allocation2 + $0x50] sm:$0x1] }
 0x156   : > { %v6362_v48 = vcombine.low %v1509_v30, %v1519_v25  ;;  %v1528_v58 = vrot.slane %v1527_v38, 4  ;;  %v3059_v50 = vrot.slane %v3057_v41, 5  ;;  %v3065_v51 = vrot.slane %v3063_v42, 5  ;;  %v2948_v30 = vld [vmem:[#allocation2 + $0x48] sm:$0xf] }
 0x157   : > { %v1538_v52 = vrot.slane %v1537_v44, 4  ;;  %v3069_v53 = vrot.slane %v3067_v46, 4  ;;  %v3073_v54 = vshll.u32 %v2944_v40, 16  ;;  %v3078_v56 = vshrl.u32 %v2945_v43, 16 }
 0x158   : > { %6956 = vmatmul.mubr.msk.bf16.gmra.mrb[36].mxu0 %vm334_vm1, %v6362_v48  ;;  %v1533_v10 = vsel %vm8182_vm9, %v1528_v58, %v1532_v33  ;;  %v3060_v57 = vor.u32 %v3059_v50, %v3056_v45  ;;  %v3081_v29 = vshll.u32 %v2945_v43, 16  ;;  %v3087_v4 = vshll.u32 %v2946_v47, 16  ;;  %v2949_v58 = vld [vmem:[#allocation2 + $0x4c] sm:$0xf]  ;;  %v2950_v50 = vld [vmem:[#allocation2 + $0x50] sm:$0x1] }
 0x159   : > { %v1543_v63 = vsel %vm8182_vm9, %v1538_v52, %v1542_v36  ;;  %v3070_v9 = vor.u32 %v3069_v53, %v3065_v51  ;;  %v3075_v61 = vrot.slane %v3073_v54, 5  ;;  %v3080_v62 = vrot.slane %v3078_v56, 4 }
 0x15a   : > { %v6363_v1 = vcombine.low %v1533_v10, %v1543_v63  ;;  %v3061_v23 = vrot.slane %v3060_v57, 4  ;;  %v3083_v19 = vrot.slane %v3081_v29, 5  ;;  %v3089_v2 = vrot.slane %v3087_v4, 5  ;;  %v2951_v10 = vld [vmem:[#allocation2 + $0x54] sm:$0xf] }
 0x15b   : > { %v3071_v3 = vrot.slane %v3070_v9, 4  ;;  %v3091_v5 = vshrl.u32 %v2946_v47, 16  ;;  %v3097_v6 = vshll.u32 %v2947_v59, 16  ;;  %v1545_v8 = vshrl.u32 %v1388_v60, 16  ;;  %v8259_v57 = vld [vmem:[%s9572_s3 + $0x4] sm:$0x3] }
 0x15c   : > { %6959 = vmatprep.mubr.msk.bf16.mxu0 %vm334_vm1, %v6363_v1  ;;  %v3066_v11 = vsel %vm8182_vm9, %v3061_v23, %v3065_v51  ;;  %v3084_v14 = vor.u32 %v3083_v19, %v3080_v62  ;;  %v1548_v13 = vshll.u32 %v1388_v60, 16  ;;  %v1554_v15 = vshll.u32 %v1389_v0, 16  ;;  %7548 = vmatprep.subr.msk.bf16.mxu0 %vm383_vm0, %v8259_v57 }
 0x15d   : > { %v3076_v17 = vsel %vm8182_vm9, %v3071_v3, %v3075_v61  ;;  %v3093_v18 = vrot.slane %v3091_v5, 4  ;;  %v3099_v20 = vrot.slane %v3097_v6, 5  ;;  %v1547_v21 = vrot.slane %v1545_v8, 4  ;;  %v6555_v3 = vld [vmem:[%s9572_s3 + $0xc] sm:$0x3] }
 0x15e   : > { %v6477_v7 = vcombine.low %v3066_v11, %v3076_v17  ;;  %v3085_v49 = vrot.slane %v3084_v14, 4  ;;  %v1550_v24 = vrot.slane %v1548_v13, 5  ;;  %v1556_v26 = vrot.slane %v1554_v15, 5  ;;  %v2953_v14 = vld [vmem:[#allocation2 + $0x5c] sm:$0x1]  ;;  %7553 = vmatprep.subr.msk.bf16.mxu1 %vm383_vm0, %v6555_v3 }
 0x15f   : > { %v3094_v27 = vor.u32 %v3093_v18, %v3089_v2  ;;  %v1558_v28 = vshrl.u32 %v1389_v0, 16  ;;  %v1564_v31 = vshll.u32 %v1390_v12, 16  ;;  %v1569_v32 = vshrl.u32 %v1391_v16, 16  ;;  %v2952_v0 = vld [vmem:[#allocation2 + $0x58] sm:$0xf] }
 0x160   : > { %7058 = vmatmul.mubr.msk.bf16.gmra.mrb[20].mxu1 %vm334_vm1, %v6477_v7  ;;  %v3090_v33 = vsel %vm8182_vm9, %v3085_v49, %v3089_v2  ;;  %v1551_v34 = vor.u32 %v1550_v24, %v1547_v21  ;;  %v1572_v36 = vshll.u32 %v1391_v16, 16  ;;  %v1578_v37 = vshll.u32 %v1392_v22, 16  ;;  %v1394_v17 = vld [vmem:[#allocation2 + $0x54] sm:$0xf] }
 0x161   : > { %v3095_v38 = vrot.slane %v3094_v27, 4  ;;  %v1560_v40 = vrot.slane %v1558_v28, 4  ;;  %v1566_v41 = vrot.slane %v1564_v31, 5  ;;  %v1571_v42 = vrot.slane %v1569_v32, 4  ;;  %v1395_v27 = vld [vmem:[#allocation2 + $0x58] sm:$0xf] }
 0x162   : > { %v1552_v43 = vrot.slane %v1551_v34, 4  ;;  %v1574_v25 = vrot.slane %v1572_v36, 5  ;;  %v1580_v44 = vrot.slane %v1578_v37, 5  ;;  %v1582_v45 = vshrl.u32 %v1392_v22, 16 }
 0x163   : > { %v3100_v46 = vsel %vm8182_vm9, %v3095_v38, %v3099_v20  ;;  %v1561_v47 = vor.u32 %v1560_v40, %v1556_v26  ;;  %v1588_v48 = vshll.u32 %v1393_v35, 16  ;;  %v3102_v51 = vshrl.u32 %v2948_v30, 16 }
 0x164   : > { %v6478_v52 = vcombine.low %v3090_v33, %v3100_v46  ;;  %v1557_v53 = vsel %vm8182_vm9, %v1552_v43, %v1556_v26  ;;  %v1575_v54 = vor.u32 %v1574_v25, %v1571_v42  ;;  %v1584_v56 = vrot.slane %v1582_v45, 4  ;;  %v1396_v33 = vld [vmem:[#allocation2 + $0x5c] sm:$0x1]  ;;  %v1397_v43 = vld [vmem:[#allocation2 + $0x60] sm:$0xf] }
 0x165   : > { %v1562_v59 = vrot.slane %v1561_v47, 4  ;;  %v1590_v29 = vrot.slane %v1588_v48, 5  ;;  %v3104_v4 = vrot.slane %v3102_v51, 4  ;;  %v3105_v60 = vshll.u32 %v2948_v30, 16  ;;  %v1398_v47 = vld [vmem:[#allocation2 + $0x64] sm:$0xf] }
 0x166   : > { %7061 = vmatprep.mubr.msk.bf16.mxu1 %vm334_vm1, %v6478_v52  ;;  %v1576_v63 = vrot.slane %v1575_v54, 4  ;;  %v1585_v9 = vor.u32 %v1584_v56, %v1580_v44  ;;  %v3111_v61 = vshll.u32 %v2949_v58, 16  ;;  %v3115_v62 = vshrl.u32 %v2949_v58, 16  ;;  %v1399_v56 = vld [vmem:[#allocation2 + $0x68] sm:$0x1] }
 0x167   : > { %v1567_v1 = vsel %vm8182_vm9, %v1562_v59, %v1566_v41  ;;  %v3107_v23 = vrot.slane %v3105_v60, 5  ;;  %v3121_v19 = vshll.u32 %v2950_v50, 16  ;;  %v3126_v2 = vshrl.u32 %v2951_v10, 16 }
 0x168   : > { %v6364_v5 = vcombine.low %v1557_v53, %v1567_v1  ;;  %v1581_v6 = vsel %vm8182_vm9, %v1576_v63, %v1580_v44  ;;  %v1586_v8 = vrot.slane %v1585_v9, 4  ;;  %v3113_v11 = vrot.slane %v3111_v61, 5  ;;  %v2954_v63 = vld [vmem:[#allocation2 + $0x60] sm:$0xf]  ;;  %v2955_v1 = vld [vmem:[#allocation2 + $0x64] sm:$0xf] }
 0x169   : > { %v3108_v12 = vor.u32 %v3107_v23, %v3104_v4  ;;  %v3117_v13 = vrot.slane %v3115_v62, 4  ;;  %v3123_v15 = vrot.slane %v3121_v19, 5  ;;  %v3128_v16 = vrot.slane %v3126_v2, 4 }
 0x16a   : > { %6960 = vmatmul.mubr.msk.bf16.gmra.mrb[40].mxu0 %vm334_vm1, %v6364_v5  ;;  %v1591_v18 = vsel %vm8182_vm9, %v1586_v8, %v1590_v29  ;;  %v3129_v20 = vshll.u32 %v2951_v10, 16  ;;  %v3135_v21 = vshll.u32 %v2952_v0, 16  ;;  %v3139_v22 = vshrl.u32 %v2952_v0, 16  ;;  %v2956_v8 = vld [vmem:[#allocation2 + $0x68] sm:$0x1] }
 0x16b   : > { %v6365_v7 = vcombine.low %v1581_v6, %v1591_v18  ;;  %v3109_v49 = vrot.slane %v3108_v12, 4  ;;  %v3118_v24 = vor.u32 %v3117_v13, %v3113_v11  ;;  %v3145_v26 = vshll.u32 %v2953_v14, 16 }
 0x16c   : > { %v3131_v28 = vrot.slane %v3129_v20, 5  ;;  %v3137_v31 = vrot.slane %v3135_v21, 5  ;;  %v3141_v32 = vrot.slane %v3139_v22, 4  ;;  %v1593_v34 = vshrl.u32 %v1394_v17, 16 }
 0x16d   : > { %6963 = vmatprep.mubr.msk.bf16.mxu0 %vm334_vm1, %v6365_v7  ;;  %v3114_v35 = vsel %vm8182_vm9, %v3109_v49, %v3113_v11  ;;  %v3119_v36 = vrot.slane %v3118_v24, 4  ;;  %v3147_v37 = vrot.slane %v3145_v26, 5  ;;  %v1596_v30 = vshll.u32 %v1394_v17, 16  ;;  %v2957_v17 = vld [vmem:[#allocation2 + $0x6c] sm:$0xf] }
 0x16e   : > { %v3132_v38 = vor.u32 %v3131_v28, %v3128_v16  ;;  %v3142_v40 = vor.u32 %v3141_v32, %v3137_v31  ;;  %v1595_v41 = vrot.slane %v1593_v34, 4  ;;  %v1602_v42 = vshll.u32 %v1395_v27, 16  ;;  %v2958_v7 = vld [vmem:[#allocation2 + $0x70] sm:$0xf] }
 0x16f   : > { %v3124_v25 = vsel %vm8182_vm9, %v3119_v36, %v3123_v15  ;;  %v1598_v44 = vrot.slane %v1596_v30, 5  ;;  %v1606_v45 = vshrl.u32 %v1395_v27, 16  ;;  %v1612_v46 = vshll.u32 %v1396_v33, 16  ;;  %v2959_v33 = vld [vmem:[#allocation2 + $0x74] sm:$0x1] }
 0x170   : > { %v6479_v48 = vcombine.low %v3114_v35, %v3124_v25  ;;  %v3133_v58 = vrot.slane %v3132_v38, 4  ;;  %v3143_v50 = vrot.slane %v3142_v40, 4  ;;  %v1604_v51 = vrot.slane %v1602_v42, 5  ;;  %v1400_v38 = vld [vmem:[#allocation2 + $0x6c] sm:$0xf] }
 0x171   : > { %v1599_v52 = vor.u32 %v1598_v44, %v1595_v41  ;;  %v1608_v53 = vrot.slane %v1606_v45, 4  ;;  %v1614_v54 = vrot.slane %v1612_v46, 5  ;;  %v1617_v10 = vshrl.u32 %v1397_v43, 16  ;;  %v1401_v25 = vld [vmem:[#allocation2 + $0x70] sm:$0xf] }
 0x172   : > { %7062 = vmatmul.mubr.msk.bf16.gmra.mrb[24].mxu1 %vm334_vm1, %v6479_v48  ;;  %v3138_v59 = vsel %vm8182_vm9, %v3133_v58, %v3137_v31  ;;  %v3148_v29 = vsel %vm8182_vm9, %v3143_v50, %v3147_v37  ;;  %v1620_v4 = vshll.u32 %v1397_v43, 16  ;;  %v1626_v60 = vshll.u32 %v1398_v47, 16  ;;  %v1402_v48 = vld [vmem:[#allocation2 + $0x74] sm:$0x1] }
 0x173   : > { %v6480_v9 = vcombine.low %v3138_v59, %v3148_v29  ;;  %v1600_v61 = vrot.slane %v1599_v52, 4  ;;  %v1609_v62 = vor.u32 %v1608_v53, %v1604_v51  ;;  %v1619_v0 = vrot.slane %v1617_v10, 4  ;;  %v1403_v53 = vld [vmem:[#allocation2 + $0x78] sm:$0xf] }
 0x174   : > { %v1622_v23 = vrot.slane %v1620_v4, 5  ;;  %v1628_v19 = vrot.slane %v1626_v60, 5  ;;  %v1630_v2 = vshrl.u32 %v1398_v47, 16  ;;  %v1636_v3 = vshll.u32 %v1399_v56, 16 }
 0x175   : > { %7065 = vmatprep.mubr.msk.bf16.mxu1 %vm334_vm1, %v6480_v9  ;;  %v1605_v5 = vsel %vm8182_vm9, %v1600_v61, %v1604_v51  ;;  %v1610_v6 = vrot.slane %v1609_v62, 4  ;;  %v3150_v11 = vshrl.u32 %v2954_v63, 16  ;;  %v3153_v14 = vshll.u32 %v2954_v63, 16  ;;  %v8300_v9 = vld [vmem:[#allocation2 + $0x7c] sm:$0xf] }
 0x176   : > { %v1623_v12 = vor.u32 %v1622_v23, %v1619_v0  ;;  %v1632_v13 = vrot.slane %v1630_v2, 4  ;;  %v1638_v15 = vrot.slane %v1636_v3, 5  ;;  %v3159_v16 = vshll.u32 %v2955_v1, 16 }
 0x177   : > { %v1615_v18 = vsel %vm8182_vm9, %v1610_v6, %v1614_v54  ;;  %v3152_v20 = vrot.slane %v3150_v11, 4  ;;  %v3155_v21 = vrot.slane %v3153_v14, 5  ;;  %v3163_v22 = vshrl.u32 %v2955_v1, 16  ;;  %v2960_v6 = vld [vmem:[#allocation2 + $0x78] sm:$0xf] }
 0x178   : > { %v6366_v49 = vcombine.low %v1605_v5, %v1615_v18  ;;  %v1624_v24 = vrot.slane %v1623_v12, 4  ;;  %v1633_v26 = vor.u32 %v1632_v13, %v1628_v19  ;;  %v3161_v27 = vrot.slane %v3159_v16, 5  ;;  %v8302_v5 = vld [vmem:[#allocation2 + $0x80] sm:$0x1]  ;;  %v8307_v13 = vld [vmem:[#allocation2 + $0x7c] sm:$0xf] }
 0x179   : > { %v3156_v28 = vor.u32 %v3155_v21, %v3152_v20  ;;  %v3165_v31 = vrot.slane %v3163_v22, 4  ;;  %v3169_v32 = vshll.u32 %v2956_v8, 16  ;;  %v3174_v34 = vshrl.u32 %v2957_v17, 16 }
 0x17a   : > { %6964 = vmatmul.mubr.msk.bf16.gmra.mrb[44].mxu0 %vm334_vm1, %v6366_v49  ;;  %v1629_v35 = vsel %vm8182_vm9, %v1624_v24, %v1628_v19  ;;  %v1634_v36 = vrot.slane %v1633_v26, 4  ;;  %v3177_v37 = vshll.u32 %v2957_v17, 16  ;;  %v3183_v30 = vshll.u32 %v2958_v7, 16 }
 0x17b   : > { %v3157_v40 = vrot.slane %v3156_v28, 4  ;;  %v3166_v41 = vor.u32 %v3165_v31, %v3161_v27  ;;  %v3171_v42 = vrot.slane %v3169_v32, 5  ;;  %v3176_v43 = vrot.slane %v3174_v34, 4  ;;  %v8313_v28 = vld [vmem:[#allocation2 + $0x80] sm:$0x1] }
 0x17c   : > { %v1639_v44 = vsel %vm8182_vm9, %v1634_v36, %v1638_v15  ;;  %v3179_v45 = vrot.slane %v3177_v37, 5  ;;  %v3185_v46 = vrot.slane %v3183_v30, 5  ;;  %v3187_v47 = vshrl.u32 %v2958_v7, 16  ;;  %v2963_v31 = vld [vmem:[#allocation2 + $0x84] sm:$0xf] }
 0x17d   : > { %v6367_v58 = vcombine.low %v1629_v35, %v1639_v44  ;;  %v3162_v50 = vsel %vm8182_vm9, %v3157_v40, %v3161_v27  ;;  %v3167_v51 = vrot.slane %v3166_v41, 4  ;;  %v3193_v52 = vshll.u32 %v2959_v33, 16  ;;  %v8316_v36 = vld [vmem:[#allocation2 + $0x88] sm:$0xf] }
 0x17e   : > { %v3180_v54 = vor.u32 %v3179_v45, %v3176_v43  ;;  %v3189_v56 = vrot.slane %v3187_v47, 4  ;;  %v1641_v10 = vshrl.u32 %v1400_v38, 16  ;;  %v1644_v59 = vshll.u32 %v1400_v38, 16 }
 0x17f   : > { %6967 = vmatprep.mubr.msk.bf16.mxu0 %vm334_vm1, %v6367_v58  ;;  %v3172_v29 = vsel %vm8182_vm9, %v3167_v51, %v3171_v42  ;;  %v3195_v4 = vrot.slane %v3193_v52, 5  ;;  %v1650_v60 = vshll.u32 %v1401_v25, 16  ;;  %v1654_v63 = vshrl.u32 %v1401_v25, 16  ;;  %v1406_v58 = vld [vmem:[#allocation2 + $0x84] sm:$0xf] }
 0x180   : > { %v6481_v61 = vcombine.low %v3162_v50, %v3172_v29  ;;  %v3181_v62 = vrot.slane %v3180_v54, 4  ;;  %v3190_v0 = vor.u32 %v3189_v56, %v3185_v46  ;;  %v1643_v1 = vrot.slane %v1641_v10, 4  ;;  %v8332_v29 = vld [vmem:[#allocation2 + $0x88] sm:$0xf] }
 0x181   : > { %v1646_v23 = vrot.slane %v1644_v59, 5  ;;  %v1652_v19 = vrot.slane %v1650_v60, 5  ;;  %v1656_v2 = vrot.slane %v1654_v63, 4  ;;  %v1660_v3 = vshll.u32 %v1402_v48, 16  ;;  %v8325_v48 = vld [vmem:[#allocation2 + $0x8c] sm:$0x1] }
 0x182   : > { %7066 = vmatmul.mubr.msk.bf16.gmra.mrb[28].mxu1 %vm334_vm1, %v6481_v61  ;;  %v3186_v8 = vsel %vm8182_vm9, %v3181_v62, %v3185_v46  ;;  %v3191_v11 = vrot.slane %v3190_v0, 4  ;;  %v1665_v14 = vshrl.u32 %v1403_v53, 16  ;;  %v1668_v12 = vshll.u32 %v1403_v53, 16 }
 0x183   : > { %v1647_v15 = vor.u32 %v1646_v23, %v1643_v1  ;;  %v1657_v16 = vor.u32 %v1656_v2, %v1652_v19  ;;  %v1662_v17 = vrot.slane %v1660_v3, 5  ;;  %v1674_v18 = vshll.u32 %v8300_v9, 16 }
 0x184   : > { %v3196_v20 = vsel %vm8182_vm9, %v3191_v11, %v3195_v4  ;;  %v1667_v21 = vrot.slane %v1665_v14, 4  ;;  %v1670_v22 = vrot.slane %v1668_v12, 5  ;;  %v1678_v7 = vshrl.u32 %v8300_v9, 16  ;;  %v1409_v11 = vld [vmem:[#allocation2 + $0x90] sm:$0xf] }
 0x185   : > { %v6482_v49 = vcombine.low %v3186_v8, %v3196_v20  ;;  %v1648_v24 = vrot.slane %v1647_v15, 4  ;;  %v1658_v26 = vrot.slane %v1657_v16, 4  ;;  %v1676_v27 = vrot.slane %v1674_v18, 5 }
 0x186   : > { %v1671_v32 = vor.u32 %v1670_v22, %v1667_v21  ;;  %v1680_v33 = vrot.slane %v1678_v7, 4  ;;  %v1684_v34 = vshll.u32 %v8302_v5, 16  ;;  %v3198_v35 = vshrl.u32 %v2960_v6, 16 }
 0x187   : > { %7069 = vmatprep.mubr.msk.bf16.mxu1 %vm334_vm1, %v6482_v49  ;;  %v1653_v37 = vsel %vm8182_vm9, %v1648_v24, %v1652_v19  ;;  %v1663_v30 = vsel %vm8182_vm9, %v1658_v26, %v1662_v17  ;;  %v3201_v38 = vshll.u32 %v2960_v6, 16  ;;  %v3207_v40 = vshll.u32 %v8307_v13, 16  ;;  %v8337_v19 = vld [vmem:[#allocation2 + $0x8c] sm:$0x1]  ;;  %v8343_v17 = vld [vmem:[#allocation2 + $0x94] sm:$0xf] }
 0x188   : > { %v6368_v41 = vcombine.low %v1653_v37, %v1663_v30  ;;  %v1672_v42 = vrot.slane %v1671_v32, 4  ;;  %v1681_v43 = vor.u32 %v1680_v33, %v1676_v27  ;;  %v1686_v25 = vrot.slane %v1684_v34, 5 }
 0x189   : > { %v3200_v44 = vrot.slane %v3198_v35, 4  ;;  %v3203_v45 = vrot.slane %v3201_v38, 5  ;;  %v3209_v46 = vrot.slane %v3207_v40, 5  ;;  %v3211_v47 = vshrl.u32 %v8307_v13, 16  ;;  %v2966_v35 = vld [vmem:[#allocation2 + $0x90] sm:$0xf] }
 0x18a   : > { %6968 = vmatmul.mubr.msk.bf16.gmra.mrb[48].mxu0 %vm334_vm1, %v6368_v41  ;;  %v1677_v50 = vsel %vm8182_vm9, %v1672_v42, %v1676_v27  ;;  %v1682_v51 = vrot.slane %v1681_v43, 4  ;;  %v3217_v52 = vshll.u32 %v8313_v28, 16  ;;  %v3222_v53 = vshrl.u32 %v2963_v31, 16  ;;  %v8349_v27 = vld [vmem:[#allocation2 + $0x98] sm:$0x1] }
 0x18b   : > { %v3204_v54 = vor.u32 %v3203_v45, %v3200_v44  ;;  %v3213_v56 = vrot.slane %v3211_v47, 4  ;;  %v3225_v10 = vshll.u32 %v2963_v31, 16  ;;  %v3231_v59 = vshll.u32 %v8316_v36, 16  ;;  %v8354_v41 = vld [vmem:[#allocation2 + $0x94] sm:$0xf] }
 0x18c   : > { %v1687_v4 = vsel %vm8182_vm9, %v1682_v51, %v1686_v25  ;;  %v3219_v60 = vrot.slane %v3217_v52, 5  ;;  %v3224_v63 = vrot.slane %v3222_v53, 4  ;;  %v3235_v61 = vshrl.u32 %v8316_v36, 16 }
 0x18d   : > { %v6369_v62 = vcombine.low %v1677_v50, %v1687_v4  ;;  %v3205_v0 = vrot.slane %v3204_v54, 4  ;;  %v3214_v1 = vor.u32 %v3213_v56, %v3209_v46  ;;  %v3227_v23 = vrot.slane %v3225_v10, 5  ;;  %v8362_v54 = vld [vmem:[#allocation2 + $0x98] sm:$0x1]  ;;  %v2969_v56 = vld [vmem:[#allocation2 + $0x9c] sm:$0xf] }
 0x18e   : > { %v3233_v2 = vrot.slane %v3231_v59, 5  ;;  %v3237_v3 = vrot.slane %v3235_v61, 4  ;;  %v3241_v6 = vshll.u32 %v8325_v48, 16  ;;  %v1689_v8 = vshrl.u32 %v1406_v58, 16 }
 0x18f   : > { %6971 = vmatprep.mubr.msk.bf16.mxu0 %vm334_vm1, %v6369_v62  ;;  %v3210_v14 = vsel %vm8182_vm9, %v3205_v0, %v3209_v46  ;;  %v3215_v12 = vrot.slane %v3214_v1, 4  ;;  %v3228_v15 = vor.u32 %v3227_v23, %v3224_v63  ;;  %v1692_v16 = vshll.u32 %v1406_v58, 16  ;;  %v8367_v63 = vld [vmem:[#allocation2 + $0xa0] sm:$0xf] }
 0x190   : > { %v3238_v18 = vor.u32 %v3237_v3, %v3233_v2  ;;  %v3243_v20 = vrot.slane %v3241_v6, 5  ;;  %v1691_v21 = vrot.slane %v1689_v8, 4  ;;  %v1698_v22 = vshll.u32 %v8332_v29, 16 }
 0x191   : > { %v3220_v7 = vsel %vm8182_vm9, %v3215_v12, %v3219_v60  ;;  %v3229_v49 = vrot.slane %v3228_v15, 4  ;;  %v1694_v24 = vrot.slane %v1692_v16, 5  ;;  %v1702_v26 = vshrl.u32 %v8332_v29, 16  ;;  %v8373_v15 = vld [vmem:[#allocation2 + $0xa4] sm:$0x1] }
 0x192   : > { %v6483_v31 = vcombine.low %v3210_v14, %v3220_v7  ;;  %v3239_v32 = vrot.slane %v3238_v18, 4  ;;  %v1700_v33 = vrot.slane %v1698_v22, 5  ;;  %v1708_v34 = vshll.u32 %v8337_v19, 16  ;;  %v1412_v22 = vld [vmem:[#allocation2 + $0x9c] sm:$0xf] }
 0x193   : > { %v3234_v37 = vsel %vm8182_vm9, %v3229_v49, %v3233_v2  ;;  %v1695_v30 = vor.u32 %v1694_v24, %v1691_v21  ;;  %v1704_v38 = vrot.slane %v1702_v26, 4  ;;  %v1713_v40 = vshrl.u32 %v1409_v11, 16 }
 0x194   : > { %7070 = vmatmul.mubr.msk.bf16.gmra.mrb[0].mxu1 %vm334_vm1, %v6483_v31  ;;  %v3244_v42 = vsel %vm8182_vm9, %v3239_v32, %v3243_v20  ;;  %v1710_v43 = vrot.slane %v1708_v34, 5  ;;  %v1716_v25 = vshll.u32 %v1409_v11, 16  ;;  %v1722_v44 = vshll.u32 %v8343_v17, 16  ;;  %v8380_v31 = vld [vmem:[#allocation2 + $0xa0] sm:$0xf] }
 0x195   : > { %v6484_v45 = vcombine.low %v3234_v37, %v3244_v42  ;;  %v1696_v46 = vrot.slane %v1695_v30, 4  ;;  %v1705_v47 = vor.u32 %v1704_v38, %v1700_v33  ;;  %v1715_v58 = vrot.slane %v1713_v40, 4  ;;  %v8385_v42 = vld [vmem:[#allocation2 + $0xa4] sm:$0x1] }
 0x196   : > { %v1718_v50 = vrot.slane %v1716_v25, 5  ;;  %v1724_v51 = vrot.slane %v1722_v44, 5  ;;  %v1726_v52 = vshrl.u32 %v8343_v17, 16  ;;  %v1732_v53 = vshll.u32 %v8349_v27, 16 }
 0x197   : > { %7073 = vmatprep.mubr.msk.bf16.mxu1 %vm334_vm1, %v6484_v45  ;;  %v1701_v10 = vsel %vm8182_vm9, %v1696_v46, %v1700_v33  ;;  %v1706_v59 = vrot.slane %v1705_v47, 4  ;;  %v3246_v4 = vshrl.u32 %v2966_v35, 16  ;;  %v3249_v60 = vshll.u32 %v2966_v35, 16  ;;  %v1415_v46 = vld [vmem:[#allocation2 + $0xa8] sm:$0xf] }
 0x198   : > { %v1719_v61 = vor.u32 %v1718_v50, %v1715_v58  ;;  %v1728_v62 = vrot.slane %v1726_v52, 4  ;;  %v1734_v0 = vrot.slane %v1732_v53, 5  ;;  %v3255_v1 = vshll.u32 %v8354_v41, 16 }
 0x199   : > { %v1711_v23 = vsel %vm8182_vm9, %v1706_v59, %v1710_v43  ;;  %v3248_v2 = vrot.slane %v3246_v4, 4  ;;  %v3251_v3 = vrot.slane %v3249_v60, 5  ;;  %v3259_v6 = vshrl.u32 %v8354_v41, 16 }
 0x19a   : > { %v6370_v8 = vcombine.low %v1701_v10, %v1711_v23  ;;  %v1720_v11 = vrot.slane %v1719_v61, 4  ;;  %v1729_v14 = vor.u32 %v1728_v62, %v1724_v51  ;;  %v3257_v12 = vrot.slane %v3255_v1, 5  ;;  %v8395_v62 = vld [vmem:[#allocation2 + $0xac] sm:$0xf] }
 0x19b   : > { %v3252_v16 = vor.u32 %v3251_v3, %v3248_v2  ;;  %v3261_v18 = vrot.slane %v3259_v6, 4  ;;  %v3265_v20 = vshll.u32 %v8362_v54, 16  ;;  %v3270_v21 = vshrl.u32 %v2969_v56, 16 }
 0x19c   : > { %6972 = vmatmul.mubr.msk.bf16.gmra.mrb[52].mxu0 %vm334_vm1, %v6370_v8  ;;  %v1725_v7 = vsel %vm8182_vm9, %v1720_v11, %v1724_v51  ;;  %v1730_v49 = vrot.slane %v1729_v14, 4  ;;  %v3273_v24 = vshll.u32 %v2969_v56, 16  ;;  %v3279_v26 = vshll.u32 %v8367_v63, 16 }
 0x19d   : > { %v3253_v32 = vrot.slane %v3252_v16, 4  ;;  %v3262_v33 = vor.u32 %v3261_v18, %v3257_v12  ;;  %v3267_v34 = vrot.slane %v3265_v20, 5  ;;  %v3272_v35 = vrot.slane %v3270_v21, 4  ;;  %v8401_v18 = vld [vmem:[#allocation2 + $0xb0] sm:$0x1] }
 0x19e   : > { %v1735_v37 = vsel %vm8182_vm9, %v1730_v49, %v1734_v0  ;;  %v3275_v30 = vrot.slane %v3273_v24, 5  ;;  %v3281_v38 = vrot.slane %v3279_v26, 5  ;;  %v3283_v40 = vshrl.u32 %v8367_v63, 16  ;;  %v2972_v21 = vld [vmem:[#allocation2 + $0xa8] sm:$0xf] }
 0x19f   : > { %v6371_v43 = vcombine.low %v1725_v7, %v1735_v37  ;;  %v3258_v25 = vsel %vm8182_vm9, %v3253_v32, %v3257_v12  ;;  %v3263_v44 = vrot.slane %v3262_v33, 4  ;;  %v3289_v45 = vshll.u32 %v8373_v15, 16  ;;  %v8407_v26 = vld [vmem:[#allocation2 + $0xac] sm:$0xf] }
 0x1a0   : > { %v3276_v47 = vor.u32 %v3275_v30, %v3272_v35  ;;  %v3285_v58 = vrot.slane %v3283_v40, 4  ;;  %v1737_v50 = vshrl.u32 %v1412_v22, 16  ;;  %v1740_v51 = vshll.u32 %v1412_v22, 16 }
 0x1a1   : > { %6975 = vmatprep.mubr.msk.bf16.mxu0 %vm334_vm1, %v6371_v43  ;;  %v3268_v52 = vsel %vm8182_vm9, %v3263_v44, %v3267_v34  ;;  %v3291_v53 = vrot.slane %v3289_v45, 5  ;;  %v1746_v56 = vshll.u32 %v8380_v31, 16  ;;  %v1750_v10 = vshrl.u32 %v8380_v31, 16  ;;  %v8415_v44 = vld [vmem:[#allocation2 + $0xb0] sm:$0x1] }
 0x1a2   : > { %v6485_v59 = vcombine.low %v3258_v25, %v3268_v52  ;;  %v3277_v4 = vrot.slane %v3276_v47, 4  ;;  %v3286_v60 = vor.u32 %v3285_v58, %v3281_v38  ;;  %v1739_v61 = vrot.slane %v1737_v50, 4  ;;  %v2975_v47 = vld [vmem:[#allocation2 + $0xb4] sm:$0xf] }
 0x1a3   : > { %v1742_v0 = vrot.slane %v1740_v51, 5  ;;  %v1748_v1 = vrot.slane %v1746_v56, 5  ;;  %v1752_v23 = vrot.slane %v1750_v10, 4  ;;  %v1756_v2 = vshll.u32 %v8385_v42, 16 }
 0x1a4   : > { %7074 = vmatmul.mubr.msk.bf16.gmra.mrb[4].mxu1 %vm334_vm1, %v6485_v59  ;;  %v3282_v3 = vsel %vm8182_vm9, %v3277_v4, %v3281_v38  ;;  %v3287_v6 = vrot.slane %v3286_v60, 4  ;;  %v1761_v8 = vshrl.u32 %v1415_v46, 16  ;;  %v1764_v11 = vshll.u32 %v1415_v46, 16 }
 0x1a5   : > { %v1743_v14 = vor.u32 %v1742_v0, %v1739_v61  ;;  %v1753_v12 = vor.u32 %v1752_v23, %v1748_v1  ;;  %v1758_v16 = vrot.slane %v1756_v2, 5  ;;  %v1770_v20 = vshll.u32 %v8395_v62, 16 }
 0x1a6   : > { %v3292_v22 = vsel %vm8182_vm9, %v3287_v6, %v3291_v53  ;;  %v1763_v7 = vrot.slane %v1761_v8, 4  ;;  %v1766_v49 = vrot.slane %v1764_v11, 5  ;;  %v1774_v24 = vshrl.u32 %v8395_v62, 16  ;;  %v8418_v53 = vld [vmem:[#allocation2 + $0xb8] sm:$0xf] }
 0x1a7   : > { %v6486_v32 = vcombine.low %v3282_v3, %v3292_v22  ;;  %v1744_v33 = vrot.slane %v1743_v14, 4  ;;  %v1754_v34 = vrot.slane %v1753_v12, 4  ;;  %v1772_v35 = vrot.slane %v1770_v20, 5  ;;  %v1418_v11 = vld [vmem:[#allocation2 + $0xb4] sm:$0xf] }
 0x1a8   : > { %v1767_v37 = vor.u32 %v1766_v49, %v1763_v7  ;;  %v1776_v30 = vrot.slane %v1774_v24, 4  ;;  %v1780_v38 = vshll.u32 %v8401_v18, 16  ;;  %v3294_v40 = vshrl.u32 %v2972_v21, 16  ;;  %v8431_v24 = vld [vmem:[#allocation2 + $0xb8] sm:$0xf] }
 0x1a9   : > { %7077 = vmatprep.mubr.msk.bf16.mxu1 %vm334_vm1, %v6486_v32  ;;  %v1749_v43 = vsel %vm8182_vm9, %v1744_v33, %v1748_v1  ;;  %v1759_v25 = vsel %vm8182_vm9, %v1754_v34, %v1758_v16  ;;  %v3297_v45 = vshll.u32 %v2972_v21, 16  ;;  %v3303_v46 = vshll.u32 %v8407_v26, 16  ;;  %v8425_v1 = vld [vmem:[#allocation2 + $0xbc] sm:$0x1] }
 0x1aa   : > { %v6372_v58 = vcombine.low %v1749_v43, %v1759_v25  ;;  %v1768_v50 = vrot.slane %v1767_v37, 4  ;;  %v1777_v51 = vor.u32 %v1776_v30, %v1772_v35  ;;  %v1782_v52 = vrot.slane %v1780_v38, 5 }
 0x1ab   : > { %v3296_v56 = vrot.slane %v3294_v40, 4  ;;  %v3299_v10 = vrot.slane %v3297_v45, 5  ;;  %v3305_v59 = vrot.slane %v3303_v46, 5  ;;  %v3307_v4 = vshrl.u32 %v8407_v26, 16  ;;  %v8437_v40 = vld [vmem:[#allocation2 + $0xbc] sm:$0x1] }
 0x1ac   : > { %6976 = vmatmul.mubr.msk.bf16.gmra.mrb[56].mxu0 %vm334_vm1, %v6372_v58  ;;  %v1773_v60 = vsel %vm8182_vm9, %v1768_v50, %v1772_v35  ;;  %v1778_v61 = vrot.slane %v1777_v51, 4  ;;  %v3313_v0 = vshll.u32 %v8415_v44, 16  ;;  %v3318_v23 = vshrl.u32 %v2975_v47, 16  ;;  %v2978_v58 = vld [vmem:[#allocation2 + $0xc0] sm:$0xf] }
 0x1ad   : > { %v3300_v2 = vor.u32 %v3299_v10, %v3296_v56  ;;  %v3309_v3 = vrot.slane %v3307_v4, 4  ;;  %v3321_v6 = vshll.u32 %v2975_v47, 16  ;;  %v3327_v8 = vshll.u32 %v8418_v53, 16  ;;  %v8443_v10 = vld [vmem:[#allocation2 + $0xc4] sm:$0xf] }
 0x1ae   : > { %v1783_v14 = vsel %vm8182_vm9, %v1778_v61, %v1782_v52  ;;  %v3315_v12 = vrot.slane %v3313_v0, 5  ;;  %v3320_v16 = vrot.slane %v3318_v23, 4  ;;  %v3331_v20 = vshrl.u32 %v8418_v53, 16 }
 0x1af   : > { %v6373_v21 = vcombine.low %v1773_v60, %v1783_v14  ;;  %v3301_v22 = vrot.slane %v3300_v2, 4  ;;  %v3310_v7 = vor.u32 %v3309_v3, %v3305_v59  ;;  %v3323_v49 = vrot.slane %v3321_v6, 5  ;;  %v8448_v3 = vld [vmem:[#allocation2 + $0xc8] sm:$0x1] }
 0x1b0   : > { %v3329_v32 = vrot.slane %v3327_v8, 5  ;;  %v3333_v33 = vrot.slane %v3331_v20, 4  ;;  %v3337_v34 = vshll.u32 %v8425_v1, 16  ;;  %v1785_v35 = vshrl.u32 %v1418_v11, 16 }
 0x1b1   : > { %6979 = vmatprep.mubr.msk.bf16.mxu0 %vm334_vm1, %v6373_v21  ;;  %v3306_v37 = vsel %vm8182_vm9, %v3301_v22, %v3305_v59  ;;  %v3311_v30 = vrot.slane %v3310_v7, 4  ;;  %v3324_v38 = vor.u32 %v3323_v49, %v3320_v16  ;;  %v1788_v43 = vshll.u32 %v1418_v11, 16  ;;  %v3659_v16 = vld [vmem:[#allocation2 + $0xc] sm:$0xe] }
 0x1b2   : > { %v3334_v25 = vor.u32 %v3333_v33, %v3329_v32  ;;  %v3339_v45 = vrot.slane %v3337_v34, 5  ;;  %v1787_v46 = vrot.slane %v1785_v35, 4  ;;  %v1794_v47 = vshll.u32 %v8431_v24, 16 }
 0x1b3   : > { %v3316_v50 = vsel %vm8182_vm9, %v3311_v30, %v3315_v12  ;;  %v3325_v51 = vrot.slane %v3324_v38, 4  ;;  %v1790_v52 = vrot.slane %v1788_v43, 5  ;;  %v1798_v56 = vshrl.u32 %v8431_v24, 16  ;;  %v7648_v38 = vld [vmem:[#allocation2 + $0x10] sm:$0xf] }
 0x1b4   : > { %v6487_v59 = vcombine.low %v3306_v37, %v3316_v50  ;;  %v3335_v4 = vrot.slane %v3334_v25, 4  ;;  %v1796_v60 = vrot.slane %v1794_v47, 5  ;;  %v1804_v61 = vshll.u32 %v8437_v40, 16  ;;  %v2102_v25 = vld [vmem:[#allocation2] sm:$0xe] }
 0x1b5   : > { %v3330_v0 = vsel %vm8182_vm9, %v3325_v51, %v3329_v32  ;;  %v1791_v23 = vor.u32 %v1790_v52, %v1787_v46  ;;  %v1800_v2 = vrot.slane %v1798_v56, 4  ;;  %v3342_v6 = vshrl.u32 %v2978_v58, 16  ;;  %v7649_v51 = vld [vmem:[#allocation2 + $0x14] sm:$0x1] }
 0x1b6   : > { %7078 = vmatmul.mubr.msk.bf16.gmra.mrb[8].mxu1 %vm334_vm1, %v6487_v59  ;;  %v3340_v8 = vsel %vm8182_vm9, %v3335_v4, %v3339_v45  ;;  %v1806_v11 = vrot.slane %v1804_v61, 5  ;;  %v3345_v14 = vshll.u32 %v2978_v58, 16  ;;  %v3351_v12 = vshll.u32 %v8443_v10, 16 }
 0x1b7   : > { %v6488_v20 = vcombine.low %v3330_v0, %v3340_v8  ;;  %v1792_v21 = vrot.slane %v1791_v23, 4  ;;  %v1801_v22 = vor.u32 %v1800_v2, %v1796_v60  ;;  %v3344_v7 = vrot.slane %v3342_v6, 4  ;;  %v2103_v0 = vld [vmem:[#allocation2 + $0xc] sm:$0xe]  ;;  %v7650_v6 = vld [vmem:[#allocation2 + $0x4] sm:$0xf] }
 0x1b8   : > { %v3347_v49 = vrot.slane %v3345_v14, 5  ;;  %v3353_v32 = vrot.slane %v3351_v12, 5  ;;  %v3355_v33 = vshrl.u32 %v8443_v10, 16  ;;  %v3361_v34 = vshll.u32 %v8448_v3, 16  ;;  %v7651_v14 = vld [vmem:[#allocation2 + $0x8] sm:$0x1] }
 0x1b9   : > { %7081 = vmatprep.mubr.msk.bf16.mxu1 %vm334_vm1, %v6488_v20  ;;  %v1797_v35 = vsel %vm8182_vm9, %v1792_v21, %v1796_v60  ;;  %v1802_v37 = vrot.slane %v1801_v22, 4  ;;  %v6506_v30 = vrot.slane %v3659_v16, 9  ;;  %v3725_v43 = vrot.slane %v7648_v38, 5  ;;  %v2104_v12 = vld [vmem:[#allocation2 + $0x18] sm:$0xe] }
 0x1ba   : > { %v3348_v45 = vor.u32 %v3347_v49, %v3344_v7  ;;  %v3357_v46 = vrot.slane %v3355_v33, 4  ;;  %v3728_v52 = vrot.slane %v7649_v51, 5  ;;  %v2380_v56 = vsel %vm383_vm0, %v8259_v57, 0  ;;  %v7652_v16 = vld [vmem:[%s9572_s3 + $0x6] sm:$0x3] }
 0x1bb   : > { %v1807_v58 = vsel %vm8182_vm9, %v1802_v37, %v1806_v11  ;;  %v3727_v50 = vrot.slane %v3725_v43, 4  ;;  %6984 = vmatpush3.bf16.msra.mxu0 %v2380_v56  ;;  %v6391_v61 = vrot.slane %v2102_v25, 9  ;;  %v3363_v23 = vrot.slane %v3361_v34, 5  ;;  %v7653_v22 = vld [vmem:[#allocation2 + $0x10] sm:$0xf] }
 0x1bc   : > { %v6374_v59 = vcombine.low %v1797_v35, %v1807_v58  ;;  %v3349_v4 = vrot.slane %v3348_v45, 4  ;;  %v3358_v60 = vor.u32 %v3357_v46, %v3353_v32  ;;  %v3726_v2 = vsel %vm8461_vm12, %v6506_v30, %v3725_v43  ;;  %7549 = vmatprep.subr.msk.bf16.mxu0 %vm383_vm0, %v7652_v16  ;;  %v7654_v35 = vld [vmem:[#allocation2 + $0x14] sm:$0x1]  ;;  %v7655_v25 = vld [vmem:[#allocation2 + $0x1c] sm:$0xf] }
 0x1bd   : > { %v2171_v8 = vrot.slane %v7650_v6, 5  ;;  %v2174_v11 = vrot.slane %v7651_v14, 5  ;;  %v3729_v21 = vsel %vm8461_vm12, %v3727_v50, %v3728_v52  ;;  %v2178_v7 = vrot.slane %v7653_v22, 5  ;;  %v3660_v45 = vld [vmem:[#allocation2 + $0x18] sm:$0xe] }
 0x1be   : > { %6980 = vmatmul.mubr.msk.bf16.gmra.mrb[60].mxu0 %vm334_vm1, %v6374_v59  ;;  %v3354_v57 = vsel %vm8182_vm9, %v3349_v4, %v3353_v32  ;;  %v3359_v20 = vrot.slane %v3358_v60, 4  ;;  %v6392_v34 = vrot.slane %v2103_v0, 9  ;;  %v2181_v37 = vrot.slane %v7654_v35, 5  ;;  %v7656_v59 = vld [vmem:[#allocation2 + $0x20] sm:$0x1] }
 0x1bf   : > { %v2172_v49 = vsel %vm8461_vm12, %v6391_v61, %v2171_v8  ;;  %v2173_v33 = vrot.slane %v2171_v8, 4  ;;  %v2180_v38 = vrot.slane %v2178_v7, 4  ;;  %v6393_v43 = vrot.slane %v2104_v12, 9  ;;  %v3661_v60 = vld [vmem:[#allocation2 + $0x24] sm:$0xe] }
 0x1c0   : > { %v3364_v30 = vsel %vm8182_vm9, %v3359_v20, %v3363_v23  ;;  %v2185_v32 = vrot.slane %v7655_v25, 5  ;;  %v6523_v58 = vcombine.low %v3726_v2, %v3729_v21  ;;  %v2188_v4 = vrot.slane %v7656_v59, 5  ;;  %v7657_v23 = vld [vmem:[#allocation2 + $0x1c] sm:$0xf]  ;;  %v2105_v2 = vld [vmem:[#allocation2 + $0x24] sm:$0xe] }
 0x1c1   : > { %v6489_v46 = vcombine.low %v3354_v57, %v3364_v30  ;;  %v2175_v50 = vsel %vm8461_vm12, %v2173_v33, %v2174_v11  ;;  %v2182_v52 = vsel %vm8461_vm12, %v2180_v38, %v2181_v37  ;;  %v2179_v61 = vsel %vm8461_vm12, %v6392_v34, %v2178_v7  ;;  %v7658_v12 = vld [vmem:[#allocation2 + $0x28] sm:$0xf]  ;;  %v2106_v57 = vld [vmem:[#allocation2 + $0x30] sm:$0xe]  ;;  %v7659_v22 = vld [vmem:[#allocation2 + $0x20] sm:$0x1] }
 0x1c2   : > { %v6408_v51 = vcombine.low %v2172_v49, %v2175_v50  ;;  %v2187_v56 = vrot.slane %v2185_v32, 4  ;;  %v6507_v0 = vrot.slane %v3660_v45, 9  ;;  %v3732_v6 = vrot.slane %v7657_v23, 5  ;;  %v7660_v34 = vld [vmem:[#allocation2 + $0x2c] sm:$0x1] }
 0x1c3   : > { %7082 = vmatmul.mubr.msk.bf16.gmra.mrb[12].mxu1 %vm334_vm1, %v6489_v46  ;;  %v6409_v8 = vcombine.low %v2179_v61, %v2182_v52  ;;  %v2186_v14 = vsel %vm8461_vm12, %v6393_v43, %v2185_v32  ;;  %v3739_v16 = vrot.slane %v7658_v12, 5  ;;  %v3735_v7 = vrot.slane %v7659_v22, 5  ;;  %v7661_v30 = vld [vmem:[#allocation2 + $0x28] sm:$0xf]  ;;  %v7662_v25 = vld [vmem:[%s9572_s3 + $0xc] sm:$0x3] }
 0x1c4   : > { %7087 = vmatprep.mubr.msk.bf16.mxu1 %vm334_vm1, %v6523_v58  ;;  %6985 = vmatprep.mubr.msk.bf16.mxu0 %vm334_vm1, %v6408_v51  ;;  %v2189_v11 = vsel %vm8461_vm12, %v2187_v56, %v2188_v4  ;;  %v3734_v21 = vrot.slane %v3732_v6, 4  ;;  %v6508_v49 = vrot.slane %v3661_v60, 9  ;;  %v3742_v35 = vrot.slane %v7660_v34, 5  ;;  %v7663_v46 = vld [vmem:[#allocation2 + $0x34] sm:$0xf] }
 0x1c5   : > { %v6410_v20 = vcombine.low %v2186_v14, %v2189_v11  ;;  %v3741_v33 = vrot.slane %v3739_v16, 4  ;;  %v6394_v37 = vrot.slane %v2105_v2, 9  ;;  %v2192_v38 = vrot.slane %v7661_v30, 5  ;;  %v7664_v56 = vld [vmem:[#allocation2 + $0x2c] sm:$0x1] }
 0x1c6   : > { %6986 = vmatmul.mubr.msk.bf16.vlgmr.msra.gmra.mrb[32].mxu0 %vm334_vm1, %v6409_v8  ;;  %v3736_v43 = vsel %vm8461_vm12, %v3734_v21, %v3735_v7  ;;  %v4293_v32 = vsel %vm383_vm0, %v7662_v25, 0  ;;  %v6395_v45 = vrot.slane %v2106_v57, 9  ;;  %v2199_v58 = vrot.slane %v7663_v46, 5  ;;  %v3662_v4 = vld [vmem:[#allocation2 + $0x30] sm:$0xe] }
 0x1c7   : > { %6989 = vmatprep.mubr.msk.bf16.mxu0 %vm334_vm1, %v6410_v20  ;;  %7018 = vmatpush3.bf16.msra.mxu0 %v7922_v55  ;;  %v3733_v50 = vsel %vm8461_vm12, %v6507_v0, %v3732_v6  ;;  %v3743_v51 = vsel %vm8461_vm12, %v3741_v33, %v3742_v35  ;;  %v2194_v52 = vrot.slane %v2192_v38, 4  ;;  %v2195_v59 = vrot.slane %v7664_v56, 5  ;;  %v7665_v2 = vld [vmem:[#allocation2 + $0x38] sm:$0x1]  ;;  %v3663_v14 = vld [vmem:[#allocation2 + $0x3c] sm:$0xe] }
 0x1c8   : > { %v6524_v60 = vcombine.low %v3733_v50, %v3736_v43  ;;  %v3740_v61 = vsel %vm8461_vm12, %v6508_v49, %v3739_v16  ;;  %v2201_v23 = vrot.slane %v2199_v58, 4  ;;  %v2202_v8 = vrot.slane %v7665_v2, 5  ;;  %v7666_v6 = vld [vmem:[#allocation2 + $0x34] sm:$0xf]  ;;  %v8519_v57 = vld [vmem:[%s9572_s3 + $0xe] sm:$0x3] }
 0x1c9   : > { %v6525_v11 = vcombine.low %v3740_v61, %v3743_v51  ;;  %v2193_v55 = vsel %vm8461_vm12, %v6394_v37, %v2192_v38  ;;  %v2196_v0 = vsel %vm8461_vm12, %v2194_v52, %v2195_v59  ;;  %v3746_v12 = vrot.slane %v7666_v6, 5  ;;  %v7667_v22 = vld [vmem:[#allocation2 + $0x40] sm:$0xf]  ;;  %v2107_v49 = vld [vmem:[#allocation2 + $0x3c] sm:$0xe] }
 0x1ca   : > { %v2200_v16 = vsel %vm8461_vm12, %v6395_v45, %v2199_v58  ;;  %v2203_v20 = vsel %vm8461_vm12, %v2201_v23, %v2202_v8  ;;  %v6509_v21 = vrot.slane %v3662_v4, 9  ;;  %v3753_v7 = vrot.slane %v7667_v22, 5  ;;  %v7668_v35 = vld [vmem:[#allocation2 + $0x38] sm:$0x1]  ;;  %v2108_v38 = vld [vmem:[#allocation2 + $0x48] sm:$0xe] }
 0x1cb   : > { %7088 = vmatmul.mubr.msk.bf16.vlgmr.msra.gmra.mrb[16].mxu1 %vm334_vm1, %v6524_v60  ;;  %v6411_v33 = vcombine.low %v2193_v55, %v2196_v0  ;;  %v3748_v34 = vrot.slane %v3746_v12, 4  ;;  %v3749_v37 = vrot.slane %v7668_v35, 5  ;;  %v6510_v30 = vrot.slane %v3663_v14, 9  ;;  %v7669_v46 = vld [vmem:[#allocation2 + $0x44] sm:$0x1] }
 0x1cc   : > { %7120 = vmatpush3.bf16.msra.mxu1 %v4293_v32  ;;  %7091 = vmatprep.mubr.msk.bf16.mxu1 %vm334_vm1, %v6525_v11  ;;  %v6412_v43 = vcombine.low %v2200_v16, %v2203_v20  ;;  %v3755_v25 = vrot.slane %v3753_v7, 4  ;;  %v3756_v45 = vrot.slane %v7669_v46, 5  ;;  %v7670_v58 = vld [vmem:[#allocation2 + $0x40] sm:$0xf]  ;;  %v6396_v51 = vrot.slane %v2107_v49, 9 }
 0x1cd   : > { %v2206_v50 = vrot.slane %v7670_v58, 5  ;;  %7554 = vmatprep.subr.msk.bf16.mxu1 %vm383_vm0, %v8519_v57  ;;  %v3750_v32 = vsel %vm8461_vm12, %v3748_v34, %v3749_v37  ;;  %v7671_v52 = vld [vmem:[#allocation2 + $0x4c] sm:$0xf]  ;;  %v7672_v60 = vld [vmem:[#allocation2 + $0x44] sm:$0x1]  ;;  %v6397_v23 = vrot.slane %v2108_v38, 9  ;;  %v3747_v2 = vsel %vm8461_vm12, %v6509_v21, %v3746_v12 }
 0x1ce   : > { %6990 = vmatmul.mubr.msk.bf16.gmra.mrb[36].mxu0 %vm334_vm1, %v6411_v33  ;;  %v2213_v56 = vrot.slane %v7671_v52, 5  ;;  %v3757_v59 = vsel %vm8461_vm12, %v3755_v25, %v3756_v45  ;;  %v2209_v61 = vrot.slane %v7672_v60, 5  ;;  %v7673_v14 = vld [vmem:[#allocation2 + $0x50] sm:$0x1]  ;;  %v3664_v55 = vld [vmem:[#allocation2 + $0x48] sm:$0xe]  ;;  %v6526_v0 = vcombine.low %v3747_v2, %v3750_v32 }
 0x1cf   : > { %6993 = vmatprep.mubr.msk.bf16.mxu0 %vm334_vm1, %v6412_v43  ;;  %v2208_v4 = vrot.slane %v2206_v50, 4  ;;  %v2216_v11 = vrot.slane %v7673_v14, 5  ;;  %v3754_v6 = vsel %vm8461_vm12, %v6510_v30, %v3753_v7  ;;  %v7674_v20 = vld [vmem:[#allocation2 + $0x4c] sm:$0xf]  ;;  %v3665_v49 = vld [vmem:[#allocation2 + $0x54] sm:$0xe]  ;;  %v2207_v34 = vsel %vm8461_vm12, %v6396_v51, %v2206_v50 }
 0x1d0   : > { %v2215_v8 = vrot.slane %v2213_v56, 4  ;;  %v3760_v22 = vrot.slane %v7674_v20, 5  ;;  %v6527_v33 = vcombine.low %v3754_v6, %v3757_v59  ;;  %v7675_v21 = vld [vmem:[#allocation2 + $0x58] sm:$0xf]  ;;  %v2109_v37 = vld [vmem:[#allocation2 + $0x54] sm:$0xe]  ;;  %v2214_v7 = vsel %vm8461_vm12, %v6397_v23, %v2213_v56 }
 0x1d1   : > { %v2210_v16 = vsel %vm8461_vm12, %v2208_v4, %v2209_v61  ;;  %v3767_v35 = vrot.slane %v7675_v21, 5  ;;  %v6511_v30 = vrot.slane %v3664_v55, 9  ;;  %v7676_v43 = vld [vmem:[#allocation2 + $0x50] sm:$0x1]  ;;  %v6512_v45 = vrot.slane %v3665_v49, 9 }
 0x1d2   : > { %v2217_v12 = vsel %vm8461_vm12, %v2215_v8, %v2216_v11  ;;  %v3762_v38 = vrot.slane %v3760_v22, 4  ;;  %v3763_v25 = vrot.slane %v7676_v43, 5  ;;  %v6413_v46 = vcombine.low %v2207_v34, %v2210_v16  ;;  %v7677_v50 = vld [vmem:[#allocation2 + $0x58] sm:$0xf]  ;;  %v2110_v51 = vld [vmem:[#allocation2 + $0x60] sm:$0xe] }
 0x1d3   : > { %7092 = vmatmul.mubr.msk.bf16.gmra.mrb[20].mxu1 %vm334_vm1, %v6526_v0  ;;  %v3769_v58 = vrot.slane %v3767_v35, 4  ;;  %v2220_v32 = vrot.slane %v7677_v50, 5  ;;  %v6414_v52 = vcombine.low %v2214_v7, %v2217_v12  ;;  %v7678_v59 = vld [vmem:[#allocation2 + $0x5c] sm:$0x1]  ;;  %v6398_v60 = vrot.slane %v2109_v37, 9 }
 0x1d4   : > { %7095 = vmatprep.mubr.msk.bf16.mxu1 %vm334_vm1, %v6527_v33  ;;  %v3770_v4 = vrot.slane %v7678_v59, 5  ;;  %v7679_v61 = vld [vmem:[#allocation2 + $0x64] sm:$0xf]  ;;  %v3764_v56 = vsel %vm8461_vm12, %v3762_v38, %v3763_v25  ;;  %v7680_v14 = vld [vmem:[#allocation2 + $0x5c] sm:$0x1]  ;;  %v6399_v55 = vrot.slane %v2110_v51, 9  ;;  %v3761_v16 = vsel %vm8461_vm12, %v6511_v30, %v3760_v22 }
 0x1d5   : > { %v2227_v2 = vrot.slane %v7679_v61, 5  ;;  %v2222_v23 = vrot.slane %v2220_v32, 4  ;;  %v2223_v11 = vrot.slane %v7680_v14, 5  ;;  %v3666_v6 = vld [vmem:[#allocation2 + $0x60] sm:$0xe]  ;;  %v3768_v20 = vsel %vm8461_vm12, %v6512_v45, %v3767_v35 }
 0x1d6   : > { %6994 = vmatmul.mubr.msk.bf16.gmra.mrb[40].mxu0 %vm334_vm1, %v6413_v46  ;;  %v3771_v8 = vsel %vm8461_vm12, %v3769_v58, %v3770_v4  ;;  %v7681_v49 = vld [vmem:[#allocation2 + $0x68] sm:$0x1]  ;;  %v7682_v34 = vld [vmem:[#allocation2 + $0x64] sm:$0xf]  ;;  %v6528_v21 = vcombine.low %v3761_v16, %v3764_v56  ;;  %v2221_v37 = vsel %vm8461_vm12, %v6398_v60, %v2220_v32  ;;  %v3667_v38 = vld [vmem:[#allocation2 + $0x6c] sm:$0xe] }
 0x1d7   : > { %6997 = vmatprep.mubr.msk.bf16.mxu0 %vm334_vm1, %v6414_v52  ;;  %v2229_v0 = vrot.slane %v2227_v2, 4  ;;  %v2230_v33 = vrot.slane %v7681_v49, 5  ;;  %v3774_v12 = vrot.slane %v7682_v34, 5  ;;  %v2224_v7 = vsel %vm8461_vm12, %v2222_v23, %v2223_v11  ;;  %v7683_v43 = vld [vmem:[#allocation2 + $0x70] sm:$0xf] }
 0x1d8   : > { %v3781_v25 = vrot.slane %v7683_v43, 5  ;;  %v2111_v46 = vld [vmem:[#allocation2 + $0x6c] sm:$0xe]  ;;  %v6529_v58 = vcombine.low %v3768_v20, %v3771_v8  ;;  %v6513_v35 = vrot.slane %v3666_v6, 9  ;;  %v2228_v45 = vsel %vm8461_vm12, %v6399_v55, %v2227_v2  ;;  %v7684_v50 = vld [vmem:[#allocation2 + $0x68] sm:$0x1] }
 0x1d9   : > { %v2231_v22 = vsel %vm8461_vm12, %v2229_v0, %v2230_v33  ;;  %v3776_v30 = vrot.slane %v3774_v12, 4  ;;  %v3777_v32 = vrot.slane %v7684_v50, 5  ;;  %v7685_v52 = vld [vmem:[#allocation2 + $0x70] sm:$0xf]  ;;  %v6415_v4 = vcombine.low %v2221_v37, %v2224_v7  ;;  %v2112_v56 = vld [vmem:[#allocation2 + $0x78] sm:$0xe] }
 0x1da   : > { %v3783_v51 = vrot.slane %v3781_v25, 4  ;;  %v2234_v59 = vrot.slane %v7685_v52, 5  ;;  %v6514_v60 = vrot.slane %v3667_v38, 9  ;;  %v6400_v61 = vrot.slane %v2111_v46, 9  ;;  %v7686_v11 = vld [vmem:[#allocation2 + $0x74] sm:$0x1] }
 0x1db   : > { %7096 = vmatmul.mubr.msk.bf16.gmra.mrb[24].mxu1 %vm334_vm1, %v6528_v21  ;;  %v2241_v23 = vrot.slane %v8300_v9, 5  ;;  %v6416_v8 = vcombine.low %v2228_v45, %v2231_v22  ;;  %v3778_v14 = vsel %vm8461_vm12, %v3776_v30, %v3777_v32  ;;  %v3784_v0 = vrot.slane %v7686_v11, 5  ;;  %v7687_v6 = vld [vmem:[#allocation2 + $0x74] sm:$0x1]  ;;  %v3668_v49 = vld [vmem:[#allocation2 + $0x78] sm:$0xe] }
 0x1dc   : > { %7099 = vmatprep.mubr.msk.bf16.mxu1 %vm334_vm1, %v6529_v58  ;;  %v2236_v2 = vrot.slane %v2234_v59, 4  ;;  %v3775_v55 = vsel %vm8461_vm12, %v6513_v35, %v3774_v12  ;;  %v2237_v16 = vrot.slane %v7687_v6, 5  ;;  %v6401_v33 = vrot.slane %v2112_v56, 9  ;;  %v3669_v37 = vld [vmem:[#allocation2 + $0x84] sm:$0xe] }
 0x1dd   : > { %v2243_v20 = vrot.slane %v2241_v23, 4  ;;  %v3785_v9 = vsel %vm8461_vm12, %v3783_v51, %v3784_v0  ;;  %v2244_v34 = vrot.slane %v8302_v5, 5  ;;  %v3788_v21 = vrot.slane %v8307_v13, 5  ;;  %v2113_v32 = vld [vmem:[#allocation2 + $0x84] sm:$0xe] }
 0x1de   : > { %6998 = vmatmul.mubr.msk.bf16.gmra.mrb[44].mxu0 %vm334_vm1, %v6415_v4  ;;  %v6530_v7 = vcombine.low %v3775_v55, %v3778_v14  ;;  %v3782_v38 = vsel %vm8461_vm12, %v6514_v60, %v3781_v25  ;;  %v2235_v12 = vsel %vm8461_vm12, %v6400_v61, %v2234_v59  ;;  %v3795_v43 = vrot.slane %v8316_v36, 5  ;;  %v2114_v4 = vld [vmem:[#allocation2 + $0x90] sm:$0xe]  ;;  %v3671_v14 = vld [vmem:[#allocation2 + $0x9c] sm:$0xe] }
 0x1df   : > { %7001 = vmatprep.mubr.msk.bf16.mxu0 %vm334_vm1, %v6416_v8  ;;  %v2238_v46 = vsel %vm8461_vm12, %v2236_v2, %v2237_v16  ;;  %v2245_v58 = vsel %vm8461_vm12, %v2243_v20, %v2244_v34  ;;  %v6515_v22 = vrot.slane %v3668_v49, 9  ;;  %v3790_v5 = vrot.slane %v3788_v21, 4  ;;  %v3670_v56 = vld [vmem:[#allocation2 + $0x90] sm:$0xe] }
 0x1e0   : > { %v6531_v35 = vcombine.low %v3782_v38, %v3785_v9  ;;  %v6516_v13 = vrot.slane %v3669_v37, 9  ;;  %v3797_v30 = vrot.slane %v3795_v43, 4  ;;  %v2248_v45 = vrot.slane %v8332_v29, 5  ;;  %v2115_v9 = vld [vmem:[#allocation2 + $0x9c] sm:$0xe] }
 0x1e1   : > { %v2242_v25 = vsel %vm8461_vm12, %v6401_v33, %v2241_v23  ;;  %v3791_v36 = vrot.slane %v8313_v28, 5  ;;  %v3798_v50 = vrot.slane %v8325_v48, 5  ;;  %v2255_v51 = vrot.slane %v8343_v17, 5  ;;  %v2116_v37 = vld [vmem:[#allocation2 + $0xa8] sm:$0xe] }
 0x1e2   : > { %v6417_v52 = vcombine.low %v2235_v12, %v2238_v46  ;;  %v6418_v59 = vcombine.low %v2242_v25, %v2245_v58  ;;  %v3789_v29 = vsel %vm8461_vm12, %v6515_v22, %v3788_v21  ;;  %v2250_v28 = vrot.slane %v2248_v45, 4 }
 0x1e3   : > { %7100 = vmatmul.mubr.msk.bf16.gmra.mrb[28].mxu1 %vm334_vm1, %v6530_v7  ;;  %v3792_v60 = vsel %vm8461_vm12, %v3790_v5, %v3791_v36  ;;  %v3799_v61 = vsel %vm8461_vm12, %v3797_v30, %v3798_v50  ;;  %v3796_v48 = vsel %vm8461_vm12, %v6516_v13, %v3795_v43  ;;  %v6402_v17 = vrot.slane %v2113_v32, 9  ;;  %v2117_v13 = vld [vmem:[#allocation2 + $0xb4] sm:$0xe]  ;;  %v3674_v50 = vld [vmem:[#allocation2 + $0xc0] sm:$0xe] }
 0x1e4   : > { %7103 = vmatprep.mubr.msk.bf16.mxu1 %vm334_vm1, %v6531_v35  ;;  %v2257_v23 = vrot.slane %v2255_v51, 4  ;;  %v3802_v8 = vrot.slane %v8354_v41, 5  ;;  %v2251_v11 = vrot.slane %v8337_v19, 5  ;;  %v6403_v0 = vrot.slane %v2114_v4, 9  ;;  %v3672_v35 = vld [vmem:[#allocation2 + $0xa8] sm:$0xe] }
 0x1e5   : > { %v2258_v2 = vrot.slane %v8349_v27, 5  ;;  %v3809_v55 = vrot.slane %v8367_v63, 5  ;;  %v6532_v6 = vcombine.low %v3789_v29, %v3792_v60  ;;  %v6533_v16 = vcombine.low %v3796_v48, %v3799_v61 }
 0x1e6   : > { %7002 = vmatmul.mubr.msk.bf16.gmra.mrb[48].mxu0 %vm334_vm1, %v6417_v52  ;;  %v6517_v20 = vrot.slane %v3670_v56, 9  ;;  %v3804_v49 = vrot.slane %v3802_v8, 4  ;;  %v2252_v33 = vsel %vm8461_vm12, %v2250_v28, %v2251_v11  ;;  %v6518_v34 = vrot.slane %v3671_v14, 9 }
 0x1e7   : > { %7005 = vmatprep.mubr.msk.bf16.mxu0 %vm334_vm1, %v6418_v59  ;;  %v3811_v41 = vrot.slane %v3809_v55, 4  ;;  %v2262_v21 = vrot.slane %v8380_v31, 5  ;;  %v2259_v19 = vsel %vm8461_vm12, %v2257_v23, %v2258_v2  ;;  %v3805_v27 = vrot.slane %v8362_v54, 5 }
 0x1e8   : > { %v3812_v63 = vrot.slane %v8373_v15, 5  ;;  %v2269_v7 = vrot.slane %v8395_v62, 5  ;;  %v2249_v38 = vsel %vm8461_vm12, %v6402_v17, %v2248_v45  ;;  %v2256_v12 = vsel %vm8461_vm12, %v6403_v0, %v2255_v51 }
 0x1e9   : > { %v6404_v43 = vrot.slane %v2115_v9, 9  ;;  %v6419_v31 = vcombine.low %v2249_v38, %v2252_v33  ;;  %v3806_v46 = vsel %vm8461_vm12, %v3804_v49, %v3805_v27  ;;  %v6405_v15 = vrot.slane %v2116_v37, 9  ;;  %v7626_v37 = vld [vmem:[#allocation2 + $0x18] sm:$0xff]   ;;  %v7628_v27 = vld [vmem:[#allocation2 + $0x24] sm:$0xff]   ;;  %v8686_v38 = vld [vmem:[%s9572_s3 + $0x10] sm:$0x3] }
 0x1ea   : > { %v3813_v54 = vsel %vm8461_vm12, %v3811_v41, %v3812_v63  ;;  %v6420_v62 = vcombine.low %v2256_v12, %v2259_v19  ;;  %v3803_v58 = vsel %vm8461_vm12, %v6517_v20, %v3802_v8  ;;  %v3810_v22 = vsel %vm8461_vm12, %v6518_v34, %v3809_v55  ;;  %v7624_v41 = vld [vmem:[#allocation2 + $0xc] sm:$0xff]   ;;  %v7627_v19 = vld [vmem:[#allocation2 + $0x24] sm:$0xff]  }
 0x1eb   : > { %7104 = vmatmul.mubr.msk.bf16.gmra.mrb[0].mxu1 %vm334_vm1, %v6532_v6  ;;  %v2264_v5 = vrot.slane %v2262_v21, 4  ;;  %v2265_v30 = vrot.slane %v8385_v42, 5  ;;  %v2271_v45 = vrot.slane %v2269_v7, 4  ;;  %v2272_v25 = vrot.slane %v8401_v18, 5  ;;  %v3673_v42 = vld [vmem:[#allocation2 + $0xb4] sm:$0xe] }
 0x1ec   : > { %7107 = vmatprep.mubr.msk.bf16.mxu1 %vm334_vm1, %v6533_v16  ;;  %v3816_v36 = vrot.slane %v8407_v26, 5  ;;  %v6534_v32 = vcombine.low %v3803_v58, %v3806_v46  ;;  %v6535_v51 = vcombine.low %v3810_v22, %v3813_v54  ;;  %v2263_v52 = vsel %vm8461_vm12, %v6404_v43, %v2262_v21  ;;  %v7625_v21 = vld [vmem:[#allocation2 + $0x18] sm:$0xff]   ;;  %v7630_v12 = vld [vmem:[#allocation2 + $0x30] sm:$0xff]   ;;  %v4491_v22 = vld [vmem:[#allocation2 + $0x24] sm:$0xf] }
 0x1ed   : > { %v3823_v59 = vrot.slane %v8418_v53, 5  ;;  %v2270_v4 = vsel %vm8461_vm12, %v6405_v15, %v2269_v7  ;;  %v6519_v29 = vrot.slane %v3672_v35, 9  ;;  %v6406_v60 = vrot.slane %v2117_v13, 9  ;;  %v7629_v7 = vld [vmem:[#allocation2 + $0x30] sm:$0xff]   ;;  %v4488_v43 = vld [vmem:[#allocation2 + $0x18] sm:$0xf] }
 0x1ee   : > { %7006 = vmatmul.mubr.msk.bf16.gmra.mrb[52].mxu0 %vm334_vm1, %v6419_v31  ;;  %v2276_v18 = vrot.slane %v8431_v24, 5  ;;  %v2266_v26 = vsel %vm8461_vm12, %v2264_v5, %v2265_v30  ;;  %v3819_v61 = vrot.slane %v8415_v44, 5  ;;  %v6521_v28 = vrot.slane %v3674_v50, 9  ;;  %v7631_v31 = vld [vmem:[#allocation2 + $0x3c] sm:$0xff]   ;;  %v7633_v5 = vld [vmem:[#allocation2 + $0x48] sm:$0xff]  }
 0x1ef   : > { %7009 = vmatprep.mubr.msk.bf16.mxu0 %vm334_vm1, %v6420_v62  ;;  %v3830_v56 = vrot.slane %v8443_v10, 5  ;;  %v2273_v48 = vsel %vm8461_vm12, %v2271_v45, %v2272_v25  ;;  %v3818_v53 = vrot.slane %v3816_v36, 4  ;;  %v2279_v23 = vrot.slane %v8437_v40, 5  ;;  %v8690_v46 = vld [vmem:[#allocation2 + $0x1c] sm:$0xf]  ;;  %v7634_v45 = vld [vmem:[#allocation2 + $0x48] sm:$0xff]  }
 0x1f0   : > { %v2278_v17 = vrot.slane %v2276_v18, 4  ;;  %v6520_v8 = vrot.slane %v3673_v42, 9  ;;  %v3825_v14 = vrot.slane %v3823_v59, 4  ;;  %v3833_v11 = vrot.slane %v8448_v3, 5  ;;  %v7632_v58 = vld [vmem:[#allocation2 + $0x3c] sm:$0xff]  }
 0x1f1   : > { %v3832_v24 = vrot.slane %v3830_v56, 4  ;;  %v6421_v44 = vcombine.low %v2263_v52, %v2266_v26  ;;  %v3826_v0 = vrot.slane %v8425_v1, 5  ;;  %v2277_v10 = vsel %vm8461_vm12, %v6406_v60, %v2276_v18  ;;  %v8698_v35 = vld [vmem:[#allocation2 + $0x28] sm:$0xf]  ;;  %v7636_v26 = vld [vmem:[#allocation2 + $0x54] sm:$0xff]  }
 0x1f2   : > { %v2280_v2 = vsel %vm8461_vm12, %v2278_v17, %v2279_v23  ;;  %v6422_v55 = vcombine.low %v2270_v4, %v2273_v48  ;;  %v3831_v6 = vsel %vm8461_vm12, %v6521_v28, %v3830_v56  ;;  %v3820_v3 = vsel %vm8461_vm12, %v3818_v53, %v3819_v61  ;;  %v8706_v4 = vld [vmem:[#allocation2 + $0x20] sm:$0x1]  ;;  %v4494_v56 = vld [vmem:[#allocation2 + $0x30] sm:$0xf]  ;;  %v8711_v17 = vld [vmem:[#allocation2 + $0x34] sm:$0xf] }
 0x1f3   : > { %7108 = vmatmul.mubr.msk.bf16.gmra.mrb[4].mxu1 %vm334_vm1, %v6534_v32  ;;  %v6423_v40 = vcombine.low %v2277_v10, %v2280_v2  ;;  %v3834_v16 = vsel %vm8461_vm12, %v3832_v24, %v3833_v11  ;;  %v3827_v20 = vsel %vm8461_vm12, %v3825_v14, %v3826_v0  ;;  %v3817_v49 = vsel %vm8461_vm12, %v6519_v29, %v3816_v36  ;;  %v7637_v48 = vld [vmem:[#allocation2 + $0x60] sm:$0xff]   ;;  %v8715_v24 = vld [vmem:[#allocation2 + $0x2c] sm:$0x1] }
 0x1f4   : > { %7111 = vmatprep.mubr.msk.bf16.mxu1 %vm334_vm1, %v6535_v51  ;;  %v6538_v1 = vcombine.low %v3831_v6, %v3834_v16  ;;  %v6536_v9 = vcombine.low %v3817_v49, %v3820_v3  ;;  %v3824_v33 = vsel %vm8461_vm12, %v6520_v8, %v3823_v59  ;;  %v5019_v63 = vsel %vm383_vm0, %v8519_v57, 0  ;;  %v7635_v51 = vld [vmem:[#allocation2 + $0x54] sm:$0xff]   ;;  %v7638_v23 = vld [vmem:[#allocation2 + $0x60] sm:$0xff]   ;;  %v4497_v16 = vld [vmem:[#allocation2 + $0x3c] sm:$0xf] }
 0x1f5   : > { %v6537_v34 = vcombine.low %v3824_v33, %v3827_v20  ;;  %v4537_v57 = vshrl.u32 %v4488_v43, 16  ;;  %v4540_v54 = vshll.u32 %v4488_v43, 16  ;;  %v4546_v15 = vshll.u32 %v8690_v46, 16  ;;  %v8722_v3 = vld [vmem:[#allocation2 + $0x40] sm:$0xf] }
 0x1f6   : > { %7010 = vmatmul.mubr.msk.bf16.gmra.mrb[56].mxu0 %vm334_vm1, %v6421_v44  ;;  %v4550_v62 = vshrl.u32 %v8690_v46, 16  ;;  %v4561_v50 = vshrl.u32 %v4491_v22, 16  ;;  %v4564_v32 = vshll.u32 %v4491_v22, 16  ;;  %v4570_v52 = vshll.u32 %v8698_v35, 16  ;;  %v4500_v33 = vld [vmem:[#allocation2 + $0x48] sm:$0xf] }
 0x1f7   : > { %7013 = vmatprep.mubr.msk.bf16.mxu0 %vm334_vm1, %v6422_v55  ;;  %v4539_v13 = vrot.slane %v4537_v57, 4  ;;  %v4542_v30 = vrot.slane %v4540_v54, 5  ;;  %v4548_v25 = vrot.slane %v4546_v15, 5  ;;  %v4574_v59 = vshrl.u32 %v8698_v35, 16 }
 0x1f8   : > { %v4552_v36 = vrot.slane %v4550_v62, 4  ;;  %v4563_v60 = vrot.slane %v4561_v50, 4  ;;  %v4566_v18 = vrot.slane %v4564_v32, 5  ;;  %v8708_v61 = vrot.slane %v4570_v52, 5  ;;  %v4506_v52 = vld [vmem:[#allocation2 + $0x60] sm:$0xf] }
 0x1f9   : > { %v4543_v29 = vor.u32 %v4542_v30, %v4539_v13  ;;  %v4576_v28 = vrot.slane %v4574_v59, 4  ;;  %v4556_v53 = vshll.u32 %v8706_v4, 16  ;;  %v4585_v44 = vshrl.u32 %v4494_v56, 16 }
 0x1fa   : > { %v4553_v42 = vor.u32 %v4552_v36, %v4548_v25  ;;  %v4567_v11 = vor.u32 %v4566_v18, %v4563_v60  ;;  %v4588_v10 = vshll.u32 %v4494_v56, 16  ;;  %v4594_v2 = vshll.u32 %v8711_v17, 16  ;;  %v8757_v60 = vld [vmem:[#allocation2 + $0x64] sm:$0xf] }
 0x1fb   : > { %7112 = vmatmul.mubr.msk.bf16.gmra.mrb[8].mxu1 %vm334_vm1, %v6536_v9  ;;  %v4544_v8 = vrot.slane %v4543_v29, 4  ;;  %v4577_v0 = vor.u32 %v4576_v28, %v8708_v61  ;;  %v4598_v55 = vshrl.u32 %v8711_v17, 16  ;;  %v4580_v6 = vshll.u32 %v8715_v24, 16 }
 0x1fc   : > { %7115 = vmatprep.mubr.msk.bf16.mxu1 %vm334_vm1, %v6537_v34  ;;  %v4554_v14 = vrot.slane %v4553_v42, 4  ;;  %v4568_v49 = vrot.slane %v4567_v11, 4  ;;  %v4587_v9 = vrot.slane %v4585_v44, 4  ;;  %v8728_v34 = vld [vmem:[#allocation2 + $0x4c] sm:$0xf]  ;;  %v4612_v43 = vshll.u32 %v4497_v16, 16 }
 0x1fd   : > { %v4622_v57 = vshrl.u32 %v8722_v3, 16  ;;  %v4582_v54 = vrot.slane %v4580_v6, 5  ;;  %v4633_v15 = vshrl.u32 %v4500_v33, 16  ;;  %v4636_v62 = vshll.u32 %v4500_v33, 16 }
 0x1fe   : > { %7014 = vmatmul.mubr.msk.bf16.gmra.mrb[60].mxu0 %vm334_vm1, %v6423_v40  ;;  %v4558_v40 = vrot.slane %v4556_v53, 5  ;;  %v8746_v13 = vsel %vm383_vm0, %v8686_v38, 0  ;;  %v4646_v30 = vshrl.u32 %v8728_v34, 16  ;;  %v4614_v29 = vrot.slane %v4612_v43, 5 }
 0x1ff   : > { %7019 = vmatprep.mubr.msk.bf16.mxu0 %vm334_vm1, %v7624_v41  ;;  %v7639_v41 = vld [vmem:[#allocation2 + $0x6c] sm:$0xff]   ;;  %v4635_v18 = vrot.slane %v4633_v15, 4  ;;  %v4684_v11 = vshll.u32 %v4506_v52, 16  ;;  %v4690_v44 = vshll.u32 %v8757_v60, 16 }
 0x200   : > { %v4559_v20 = vsel %vm8182_vm9, %v4554_v14, %v4558_v40  ;;  %v4648_v56 = vrot.slane %v4646_v30, 4  ;;  %v4681_v14 = vshrl.u32 %v4506_v52, 16 }
 0x202   : > { %v4683_v43 = vrot.slane %v4681_v14, 4 }
 0x203   : > { %7116 = vmatmul.mubr.msk.bf16.gmra.mrb[12].mxu1 %vm334_vm1, %v6538_v1  ;;  %v4549_v1 = vsel %vm8182_vm9, %v4544_v8, %v4548_v25  ;;  %v7641_v8 = vld [vmem:[#allocation2 + $0x84] sm:$0xff]  }
 0x204   : > { %7121 = vmatprep.mubr.msk.bf16.mxu1 %vm334_vm1, %v7625_v21  ;;  %v7640_v21 = vld [vmem:[#allocation2 + $0x78] sm:$0xff]   ;;  %v8739_v22 = vcombine.low %v4549_v1, %v4559_v20 }
 0x206   : > { %7020 = vmatmul.mubr.msk.bf16.vlgmr.msra.gmra.mrb[32].mxu0 %vm334_vm1, %v7626_v37  ;;  %v4578_v37 = vrot.slane %v4577_v0, 4  ;;  %v4694_v0 = vshrl.u32 %v8757_v60, 16 }
 0x207   : > { %7023 = vmatprep.mubr.msk.bf16.mxu0 %vm334_vm1, %v7627_v19  ;;  %v4590_v19 = vrot.slane %v4588_v10, 5  ;;  %v7642_v10 = vld [vmem:[#allocation2 + $0x90] sm:$0xff]  }
 0x208   : > { %v4583_v25 = vsel %vm8182_vm9, %v4578_v37, %v4582_v54  ;;  %v4696_v54 = vrot.slane %v4694_v0, 4 }
 0x209   : > { %v4591_v36 = vor.u32 %v4590_v19, %v4587_v9 }
 0x20b   : > { %7122 = vmatmul.mubr.msk.bf16.vlgmr.msra.gmra.mrb[16].mxu1 %vm334_vm1, %v7628_v27  ;;  %v8730_v27 = vrot.slane %v4594_v2, 5 }
 0x20c   : > { %7154 = vmatpush3.bf16.msra.mxu1 %v5019_v63  ;;  %7125 = vmatprep.mubr.msk.bf16.mxu1 %vm334_vm1, %v7629_v7  ;;  %v4600_v63 = vrot.slane %v4598_v55, 4  ;;  %v8732_v7 = vld [vmem:[#allocation2 + $0x38] sm:$0x1]  ;;  %v8767_v55 = vrot.slane %v4591_v36, 4 }
 0x20d   : > { %7555 = vmatprep.subr.msk.bf16.mxu1 %vm383_vm0, %v8686_v38  ;;  %v4604_v32 = vshll.u32 %v8732_v7, 16  ;;  %v4624_v38 = vrot.slane %v4622_v57, 4  ;;  %v8785_v57 = vrot.slane %v4690_v44, 5 }
 0x20e   : > { %7024 = vmatmul.mubr.msk.bf16.gmra.mrb[36].mxu0 %vm334_vm1, %v7630_v12  ;;  %v4609_v12 = vshrl.u32 %v4497_v16, 16  ;;  %v4601_v50 = vor.u32 %v4600_v63, %v8730_v27  ;;  %v8773_v16 = vld [vmem:[#allocation2 + $0x44] sm:$0x1]  ;;  %v4597_v30 = vsel %vm8182_vm9, %v8767_v55, %v8730_v27 }
 0x20f   : > { %7027 = vmatprep.mubr.msk.bf16.mxu0 %vm334_vm1, %v7631_v31  ;;  %v4618_v31 = vshll.u32 %v8722_v3, 16  ;;  %v8771_v6 = vrot.slane %v4604_v32, 5  ;;  %v4628_v15 = vshll.u32 %v8773_v16, 16 }
 0x210   : > { %v4611_v59 = vrot.slane %v4609_v12, 4  ;;  %v8769_v40 = vrot.slane %v4601_v50, 4  ;;  %v8783_v12 = vld [vmem:[#allocation2 + $0x70] sm:$0xf] }
 0x211   : > { %v8755_v42 = vrot.slane %v4618_v31, 5  ;;  %v4686_v31 = vrot.slane %v4684_v11, 5  ;;  %v4714_v36 = vshll.u32 %v8783_v12, 16  ;;  %v4718_v50 = vshrl.u32 %v8783_v12, 16 }
 0x212   : > { %v4615_v1 = vor.u32 %v4614_v29, %v4611_v59 }
 0x213   : > { %7126 = vmatmul.mubr.msk.bf16.gmra.mrb[20].mxu1 %vm334_vm1, %v7632_v58  ;;  %v4642_v58 = vshll.u32 %v8728_v34, 16  ;;  %v4625_v20 = vor.u32 %v4624_v38, %v8755_v42  ;;  %v8801_v38 = vld [vmem:[#allocation2 + $0x68] sm:$0x1]  ;;  %v4720_v55 = vrot.slane %v4718_v50, 4 }
 0x214   : > { %7129 = vmatprep.mubr.msk.bf16.mxu1 %vm334_vm1, %v7633_v5  ;;  %v4573_v5 = vsel %vm8182_vm9, %v4568_v49, %v8708_v61  ;;  %v8777_v49 = vld [vmem:[#allocation2 + $0x50] sm:$0x1]  ;;  %v4616_v32 = vrot.slane %v4615_v1, 4  ;;  %v4700_v0 = vshll.u32 %v8801_v38, 16 }
 0x215   : > { %v8759_v61 = vrot.slane %v4642_v58, 5  ;;  %v8765_v2 = vcombine.low %v4573_v5, %v4583_v25  ;;  %v8797_v25 = vld [vmem:[#allocation2 + $0x5c] sm:$0x1]  ;;  %v4626_v52 = vrot.slane %v4625_v20, 4 }
 0x216   : > { %7028 = vmatmul.mubr.msk.bf16.gmra.mrb[40].mxu0 %vm334_vm1, %v7634_v45  ;;  %v4503_v45 = vld [vmem:[#allocation2 + $0x54] sm:$0xf]  ;;  %v4676_v44 = vshll.u32 %v8797_v25, 16 }
 0x217   : > { %7031 = vmatprep.mubr.msk.bf16.mxu0 %vm334_vm1, %v7635_v51  ;;  %v8753_v51 = vld [vmem:[#allocation2 + $0x58] sm:$0xf]  ;;  %v4657_v28 = vshrl.u32 %v4503_v45, 16 }
 0x218   : > { %v4666_v53 = vshll.u32 %v8753_v51, 16 }
 0x219   : > { %v4659_v33 = vrot.slane %v4657_v28, 4 }
 0x21a   : > { %v8781_v19 = vrot.slane %v4666_v53, 5  ;;  %v4630_v53 = vrot.slane %v4628_v15, 5  ;;  %v8834_v15 = vrot.slane %v4676_v44, 5 }
 0x21b   : > { %7130 = vmatmul.mubr.msk.bf16.gmra.mrb[24].mxu1 %vm334_vm1, %v7636_v26  ;;  %v4638_v26 = vrot.slane %v4636_v62, 5  ;;  %v4652_v62 = vshll.u32 %v8777_v49, 16 }
 0x21c   : > { %7133 = vmatprep.mubr.msk.bf16.mxu1 %vm334_vm1, %v7637_v48  ;;  %v4660_v48 = vshll.u32 %v4503_v45, 16  ;;  %v4607_v45 = vsel %vm8182_vm9, %v8769_v40, %v8771_v6  ;;  %v4512_v40 = vld [vmem:[#allocation2 + $0x78] sm:$0xf]  ;;  %v4621_v6 = vsel %vm8182_vm9, %v4616_v32, %v8755_v42  ;;  %v4631_v1 = vsel %vm8182_vm9, %v4626_v52, %v4630_v53 }
 0x21d   : > { %v4639_v9 = vor.u32 %v4638_v26, %v4635_v18  ;;  %v7643_v18 = vld [vmem:[#allocation2 + $0x9c] sm:$0xff]   ;;  %v7644_v26 = vld [vmem:[#allocation2 + $0xa8] sm:$0xff]   ;;  %v8840_v50 = vcombine.low %v4597_v30, %v4607_v45  ;;  %v8842_v32 = vcombine.low %v4621_v6, %v4631_v1  ;;  %v5304_v45 = vrot.slane %v8773_v16, 5 }
 0x21e   : > { %7032 = vmatmul.mubr.msk.bf16.gmra.mrb[44].mxu0 %vm334_vm1, %v7638_v23  ;;  %v4670_v23 = vshrl.u32 %v8753_v51, 16  ;;  %v4662_v37 = vrot.slane %v4660_v48, 5  ;;  %v4697_v48 = vor.u32 %v4696_v54, %v8785_v57  ;;  %v4732_v54 = vshll.u32 %v4512_v40, 16  ;;  %v5218_v6 = vld [vmem:[#allocation2 + $0x48] sm:$0xe] }
 0x21f   : > { %v4640_v59 = vrot.slane %v4639_v9, 4 }
 0x220   : > { %v4672_v63 = vrot.slane %v4670_v23, 4  ;;  %v4663_v29 = vor.u32 %v4662_v37, %v4659_v33  ;;  %v4654_v23 = vrot.slane %v4652_v62, 5  ;;  %v8823_v33 = vld [vmem:[#allocation2 + $0x7c] sm:$0xf] }
 0x221   : > { %v4645_v20 = vsel %vm8182_vm9, %v4640_v59, %v8759_v61  ;;  %v4742_v59 = vshrl.u32 %v8823_v33, 16 }
 0x222   : > { %v4673_v28 = vor.u32 %v4672_v63, %v8781_v19  ;;  %v8821_v9 = vrot.slane %v4663_v29, 4  ;;  %v8831_v63 = vrot.slane %v4697_v48, 4  ;;  %v5216_v29 = vld [vmem:[#allocation2 + $0x30] sm:$0xe] }
 0x223   : > { %7134 = vmatmul.mubr.msk.bf16.gmra.mrb[28].mxu1 %vm334_vm1, %v7639_v41  ;;  %v4509_v41 = vld [vmem:[#allocation2 + $0x6c] sm:$0xf]  ;;  %v8884_v1 = vrot.slane %v4742_v59, 4  ;;  %v6625_v59 = vrot.slane %v5218_v6, 9 }
 0x224   : > { %7137 = vmatprep.mubr.msk.bf16.mxu1 %vm334_vm1, %v7640_v21  ;;  %v4649_v21 = vor.u32 %v4648_v56, %v8759_v61  ;;  %v4705_v58 = vshrl.u32 %v4509_v41, 16  ;;  %v4708_v5 = vshll.u32 %v4509_v41, 16  ;;  %v4687_v56 = vor.u32 %v4686_v31, %v4683_v43 }
 0x225   : > { %v4729_v31 = vshrl.u32 %v4512_v40, 16  ;;  %v8836_v61 = vrot.slane %v4700_v0, 5  ;;  %v5294_v40 = vrot.slane %v8711_v17, 5  ;;  %v8966_v17 = vld [vmem:[#allocation2 + $0xa4] sm:$0x1] }
 0x226   : > { %v4650_v27 = vrot.slane %v4649_v21, 4  ;;  %v4707_v14 = vrot.slane %v4705_v58, 4  ;;  %v4710_v11 = vrot.slane %v4708_v5, 5  ;;  %v8827_v21 = vrot.slane %v4673_v28, 4  ;;  %v7645_v5 = vld [vmem:[#allocation2 + $0xb4] sm:$0xff]  }
 0x227   : > { %v8829_v37 = vrot.slane %v4687_v56, 4  ;;  %v4738_v58 = vshll.u32 %v8823_v33, 16  ;;  %v8865_v28 = vld [vmem:[#allocation2 + $0x84] sm:$0xf]  ;;  %v8867_v56 = vld [vmem:[#allocation2 + $0x88] sm:$0xf] }
 0x228   : > { %v4655_v41 = vsel %vm8182_vm9, %v4650_v27, %v4654_v23  ;;  %v4711_v42 = vor.u32 %v4710_v11, %v4707_v14  ;;  %v8863_v27 = vld [vmem:[#allocation2 + $0x80] sm:$0x1]  ;;  %v8873_v23 = vrot.slane %v4729_v31, 4  ;;  %v8875_v14 = vrot.slane %v4732_v54, 5  ;;  %v5217_v11 = vld [vmem:[#allocation2 + $0x3c] sm:$0xe] }
 0x229   : > { %v8844_v52 = vcombine.low %v4645_v20, %v4655_v41  ;;  %v8880_v0 = vrot.slane %v4738_v58, 5  ;;  %v5296_v54 = vrot.slane %v5294_v40, 4  ;;  %v6624_v58 = vrot.slane %v5217_v11, 9  ;;  %v7647_v20 = vld [vmem:[#allocation2 + $0xcc] sm:$0xff]  }
 0x22a   : > { %v8869_v48 = vrot.slane %v4711_v42, 4 }
 0x22b   : > { %7138 = vmatmul.mubr.msk.bf16.gmra.mrb[0].mxu1 %vm334_vm1, %v7641_v8  ;;  %v8805_v8 = vld [vmem:[#allocation2 + $0x74] sm:$0x1] }
 0x22c   : > { %7141 = vmatprep.mubr.msk.bf16.mxu1 %vm334_vm1, %v7642_v10  ;;  %v8810_v10 = vrot.slane %v4714_v36, 5  ;;  %v4724_v43 = vshll.u32 %v8805_v8, 16  ;;  %v7646_v36 = vld [vmem:[#allocation2 + $0xc0] sm:$0xff]  }
 0x22e   : > { %v4721_v62 = vor.u32 %v4720_v55, %v8810_v10  ;;  %v8871_v53 = vrot.slane %v4724_v43, 5  ;;  %v6623_v55 = vrot.slane %v5216_v29, 9  ;;  %v5219_v43 = vld [vmem:[#allocation2 + $0x54] sm:$0xe]  ;;  %v5220_v29 = vld [vmem:[#allocation2 + $0x60] sm:$0xe] }
 0x22f   : > { %v6626_v11 = vrot.slane %v5219_v43, 9 }
 0x230   : > { %v8878_v44 = vrot.slane %v4721_v62, 4  ;;  %v5297_v62 = vrot.slane %v8732_v7, 5  ;;  %v5308_v7 = vrot.slane %v8728_v34, 5  ;;  %v5221_v34 = vld [vmem:[#allocation2 + $0x6c] sm:$0xe] }
 0x232   : > { %v8899_v30 = vsel %vm8461_vm12, %v5296_v54, %v5297_v62  ;;  %v8913_v6 = vsel %vm8461_vm12, %v6625_v59, %v5308_v7  ;;  %v5310_v16 = vrot.slane %v5308_v7, 4  ;;  %v6627_v54 = vrot.slane %v5220_v29, 9 }
 0x233   : > { %7142 = vmatmul.mubr.msk.bf16.gmra.mrb[4].mxu1 %vm334_vm1, %v7643_v18  ;;  %v5222_v18 = vld [vmem:[#allocation2 + $0x78] sm:$0xe]  ;;  %v6628_v7 = vrot.slane %v5221_v34, 9  ;;  %v5332_v34 = vrot.slane %v8805_v8, 5 }
 0x234   : > { %7145 = vmatprep.mubr.msk.bf16.mxu1 %vm334_vm1, %v7644_v26 }
 0x23b   : > { %7146 = vmatmul.mubr.msk.bf16.gmra.mrb[8].mxu1 %vm334_vm1, %v7645_v5  ;;  %v8894_v5 = vsel %vm8461_vm12, %v6623_v55, %v5294_v40  ;;  %v5311_v55 = vrot.slane %v8777_v49, 5  ;;  %v5318_v49 = vrot.slane %v8797_v25, 5  ;;  %v8952_v25 = vld [vmem:[#allocation2 + $0x98] sm:$0x1] }
 0x23c   : > { %7149 = vmatprep.mubr.msk.bf16.mxu1 %vm334_vm1, %v7646_v36  ;;  %v5301_v36 = vrot.slane %v8722_v3, 5  ;;  %v5315_v3 = vrot.slane %v8753_v51, 5  ;;  %v5322_v51 = vrot.slane %v8757_v60, 5  ;;  %v8935_v60 = vld [vmem:[#allocation2 + $0x8c] sm:$0x1] }
 0x23d   : > { %v5346_v42 = vrot.slane %v8935_v60, 5 }
 0x23e   : > { %v5303_v26 = vrot.slane %v5301_v36, 4  ;;  %v8909_v40 = vsel %vm8461_vm12, %v6624_v58, %v5301_v36  ;;  %v5317_v62 = vrot.slane %v5315_v3, 4  ;;  %v8926_v36 = vsel %vm8461_vm12, %v5310_v16, %v5311_v55  ;;  %v8943_v55 = vld [vmem:[#allocation2 + $0x94] sm:$0xf]  ;;  %v5224_v16 = vld [vmem:[#allocation2 + $0x90] sm:$0xe] }
 0x23f   : > { %9602 = vst [vmem:[#allocation6_spill] sm:$0xff] %v8926_v36  ;;  %v8930_v59 = vsel %vm8461_vm12, %v6626_v11, %v5315_v3  ;;  %v5324_v29 = vrot.slane %v5322_v51, 4  ;;  %v8949_v11 = vsel %vm8461_vm12, %v6627_v54, %v5322_v51  ;;  %v6629_v3 = vrot.slane %v5222_v18, 9  ;;  %v9057_v36 = vld [vmem:[#allocation2 + $0xd0] sm:$0xf] }
 0x240   : > { %v8917_v43 = vsel %vm8461_vm12, %v5303_v26, %v5304_v45  ;;  %9603 = vst [vmem:[#allocation7_spill] sm:$0xff] %v8930_v59  ;;  %v5325_v26 = vrot.slane %v8801_v38, 5  ;;  %v5223_v45 = vld [vmem:[#allocation2 + $0x84] sm:$0xe]  ;;  %9605 = vst [vmem:[#allocation9_spill] sm:$0xff] %v8949_v11  ;;  %v5343_v18 = vrot.slane %v8867_v56, 5 }
 0x241   : > { %v6630_v58 = vrot.slane %v5223_v45, 9  ;;  %v8960_v38 = vld [vmem:[#allocation2 + $0xa0] sm:$0xf]  ;;  %v6631_v45 = vrot.slane %v5224_v16, 9  ;;  %v5350_v41 = vrot.slane %v8943_v55, 5  ;;  %v5353_v16 = vrot.slane %v8952_v25, 5 }
 0x242   : > { %v5345_v31 = vrot.slane %v5343_v18, 4  ;;  %v8982_v11 = vld [vmem:[#allocation2 + $0xac] sm:$0xf] }
 0x243   : > { %7150 = vmatmul.mubr.msk.bf16.gmra.mrb[12].mxu1 %vm334_vm1, %v7647_v20  ;;  %v8941_v20 = vsel %vm8461_vm12, %v5317_v62, %v5318_v49  ;;  %v8956_v62 = vsel %vm8461_vm12, %v5324_v29, %v5325_v26  ;;  %v5336_v49 = vrot.slane %v8823_v33, 5  ;;  %v5225_v29 = vld [vmem:[#allocation2 + $0x9c] sm:$0xe] }
 0x244   : > { %7155 = vmatprep.mubr.msk.bf16.mxu1 %vm334_vm1, %v8739_v22  ;;  %9604 = vst [vmem:[#allocation8_spill] sm:$0xff] %v8941_v20  ;;  %v5329_v22 = vrot.slane %v8783_v12, 5  ;;  %9606 = vst [vmem:[#allocation10_spill] sm:$0xff] %v8956_v62  ;;  %v5339_v12 = vrot.slane %v8863_v27, 5  ;;  %v5226_v62 = vld [vmem:[#allocation2 + $0xa8] sm:$0xe] }
 0x245   : > { %v8974_v8 = vsel %vm8461_vm12, %v6629_v3, %v5336_v49  ;;  %v5338_v33 = vrot.slane %v5336_v49, 4  ;;  %v8992_v3 = vsel %vm8461_vm12, %v6630_v58, %v5343_v18  ;;  %v8997_v49 = vld [vmem:[#allocation2 + $0xb0] sm:$0x1]  ;;  %v6632_v58 = vrot.slane %v5225_v29, 9  ;;  %v9010_v18 = vld [vmem:[#allocation2 + $0xbc] sm:$0x1] }
 0x246   : > { %v5331_v51 = vrot.slane %v5329_v22, 4  ;;  %v8970_v26 = vsel %vm8461_vm12, %v6628_v7, %v5329_v22  ;;  %9608 = vst [vmem:[#allocation12_spill] sm:$0xff] %v8974_v8  ;;  %9611 = vst [vmem:[#allocation15_spill] sm:$0xff] %v8992_v3  ;;  %v9018_v7 = vsel %vm8461_vm12, %v6631_v45, %v5350_v41  ;;  %v5364_v29 = vrot.slane %v8982_v11, 5  ;;  %v5228_v8 = vld [vmem:[#allocation2 + $0xc0] sm:$0xe] }
 0x247   : > { %9607 = vst [vmem:[#allocation11_spill] sm:$0xff] %v8970_v26  ;;  %v8988_v22 = vsel %vm8461_vm12, %v5338_v33, %v5339_v12  ;;  %v9005_v12 = vsel %vm8461_vm12, %v5345_v31, %v5346_v42  ;;  %v5352_v33 = vrot.slane %v5350_v41, 4  ;;  %9613 = vst [vmem:[#allocation17_spill] sm:$0xff] %v9018_v7  ;;  %v5357_v42 = vrot.slane %v8960_v38, 5  ;;  %v5229_v3 = vld [vmem:[#allocation2 + $0xcc] sm:$0xe] }
 0x248   : > { %v8978_v54 = vsel %vm8461_vm12, %v5331_v51, %v5332_v34  ;;  %9610 = vst [vmem:[#allocation14_spill] sm:$0xff] %v8988_v22  ;;  %v5227_v34 = vld [vmem:[#allocation2 + $0xb4] sm:$0xe]  ;;  %v8999_v51 = vld [vmem:[#allocation2 + $0xb8] sm:$0xf]  ;;  %9612 = vst [vmem:[#allocation16_spill] sm:$0xff] %v9005_v12 }
 0x249   : > { %9609 = vst [vmem:[#allocation13_spill] sm:$0xff] %v8978_v54  ;;  %v6633_v31 = vrot.slane %v5226_v62, 9  ;;  %v6634_v22 = vrot.slane %v5227_v34, 9  ;;  %v5359_v12 = vrot.slane %v5357_v42, 4  ;;  %v5367_v41 = vrot.slane %v8997_v49, 5  ;;  %v9632_v47 = vld [vmem:[#allocation7_spill] sm:$0xff] }
 0x24a   : > { %v5371_v45 = vrot.slane %v8999_v51, 5  ;;  %v9031_v62 = vld [vmem:[#allocation2 + $0xc8] sm:$0x1]  ;;  %v5366_v34 = vrot.slane %v5364_v29, 4  ;;  %v5374_v26 = vrot.slane %v9010_v18, 5  ;;  %v6635_v20 = vrot.slane %v5228_v8, 9 }
 0x24b   : > { %7156 = vmatmul.mubr.msk.bf16.vlgmr.msra.gmra.mrb[16].mxu1 %vm334_vm1, %v8765_v2  ;;  %v9012_v2 = vld [vmem:[#allocation2 + $0xc4] sm:$0xf]  ;;  %v4518_v54 = vld [vmem:[#allocation2 + $0x90] sm:$0xf] }
 0x24c   : > { %7188 = vmatpush3.bf16.msra.mxu1 %v8746_v13  ;;  %7159 = vmatprep.mubr.msk.bf16.mxu1 %vm334_vm1, %v8840_v50  ;;  %v9023_v13 = vsel %vm8461_vm12, %v5352_v33, %v5353_v16  ;;  %v5360_v50 = vrot.slane %v8966_v17, 5  ;;  %v9035_v16 = vsel %vm8461_vm12, %v6632_v58, %v5357_v42  ;;  %v9039_v33 = vsel %vm8461_vm12, %v6633_v31, %v5364_v29 }
 0x24d   : > { %9614 = vst [vmem:[#allocation18_spill] sm:$0xff] %v9023_v13  ;;  %v5373_v7 = vrot.slane %v5371_v45, 4  ;;  %v5378_v59 = vrot.slane %v9012_v2, 5  ;;  %v9051_v42 = vsel %vm8461_vm12, %v5366_v34, %v5367_v41  ;;  %v9055_v31 = vsel %vm8461_vm12, %v6634_v22, %v5371_v45 }
 0x24e   : > { %v9044_v13 = vsel %vm8461_vm12, %v5359_v12, %v5360_v50  ;;  %9615 = vst [vmem:[#allocation19_spill] sm:$0xff] %v9055_v31  ;;  %v6636_v29 = vrot.slane %v5229_v3, 9  ;;  %v9059_v12 = vld [vmem:[#allocation2 + $0xd4] sm:$0x1]  ;;  %v5381_v41 = vrot.slane %v9031_v62, 5  ;;  %v4777_v22 = vshrl.u32 %v4518_v54, 16 }
 0x24f   : > { %v9065_v50 = vsel %vm8461_vm12, %v5373_v7, %v5374_v26  ;;  %v5380_v58 = vrot.slane %v5378_v59, 4  ;;  %v5385_v45 = vrot.slane %v9057_v36, 5  ;;  %v5388_v34 = vrot.slane %v9059_v12, 5 }
 0x250   : > { %9616 = vst [vmem:[#allocation20_spill] sm:$0xff] %v9065_v50  ;;  %v4780_v8 = vshll.u32 %v4518_v54, 16  ;;  %v4786_v26 = vshll.u32 %v8943_v55, 16  ;;  %v9079_v7 = vsel %vm8461_vm12, %v6635_v20, %v5378_v59  ;;  %v4790_v3 = vshrl.u32 %v8943_v55, 16 }
 0x251   : > { %9617 = vst [vmem:[#allocation21_spill] sm:$0xff] %v9079_v7  ;;  %v9090_v31 = vsel %vm8461_vm12, %v6636_v29, %v5385_v45  ;;  %v4717_v59 = vsel %vm8182_vm9, %v8869_v48, %v8810_v10  ;;  %v4735_v20 = vor.u32 %v8875_v14, %v8873_v23  ;;  %v9619_v54 = vshrl.u32 %v8865_v28, 16 }
 0x252   : > { %v9620_v55 = vshll.u32 %v8865_v28, 16  ;;  %v4745_v50 = vor.u32 %v8884_v1, %v8880_v0  ;;  %v9621_v29 = vshll.u32 %v8867_v56, 16  ;;  %v4727_v28 = vsel %vm8182_vm9, %v8878_v44, %v8871_v53  ;;  %v4521_v53 = vld [vmem:[#allocation2 + $0x9c] sm:$0xf] }
 0x253   : > { %7160 = vmatmul.mubr.msk.bf16.gmra.mrb[20].mxu1 %vm334_vm1, %v8842_v32  ;;  %v9083_v32 = vsel %vm8461_vm12, %v5380_v58, %v5381_v41  ;;  %v4755_v58 = vrot.slane %v9619_v54, 4  ;;  %v4779_v48 = vrot.slane %v4777_v22, 4  ;;  %v4782_v23 = vrot.slane %v4780_v8, 5 }
 0x254   : > { %7163 = vmatprep.mubr.msk.bf16.mxu1 %vm334_vm1, %v8844_v52  ;;  %9618 = vst [vmem:[#allocation22_spill] sm:$0xff] %v9083_v32  ;;  %v5387_v52 = vrot.slane %v5385_v45, 4  ;;  %v4758_v41 = vrot.slane %v9620_v55, 5  ;;  %v9106_v45 = vrot.slane %v9621_v29, 5  ;;  %v9622_v32 = vshrl.u32 %v8867_v56, 16 }
 0x255   : > { %v9623_v56 = vsel %vm8182_vm9, %v8827_v21, %v8834_v15  ;;  %v9624_v1 = vsel %vm8182_vm9, %v8821_v9, %v8781_v19  ;;  %v9625_v44 = vsel %vm8182_vm9, %v8831_v63, %v8836_v61  ;;  %v9626_v21 = vsel %vm8182_vm9, %v8829_v37, %v8785_v57  ;;  %v4524_v9 = vld [vmem:[#allocation2 + $0xa8] sm:$0xf] }
 0x256   : > { %v4768_v7 = vrot.slane %v9622_v32, 4  ;;  %v9112_v10 = vsel %vm8461_vm12, %v5387_v52, %v5388_v34  ;;  %v6594_v34 = vcombine.low %v9624_v1, %v9623_v56  ;;  %v9130_v32 = vrot.slane %v4786_v26, 5 }
 0x257   : > { %v6653_v14 = vcombine.low %v9090_v31, %v9112_v10  ;;  %v4792_v52 = vrot.slane %v4790_v3, 4  ;;  %v6595_v15 = vcombine.low %v9626_v21, %v9625_v44  ;;  %v4736_v8 = vrot.slane %v4735_v20, 4 }
 0x258   : > { %v9627_v22 = vshll.u32 %v8863_v27, 16  ;;  %v6596_v3 = vcombine.low %v4717_v59, %v4727_v28  ;;  %v4746_v26 = vrot.slane %v4745_v50, 4  ;;  %v4759_v54 = vor.u32 %v4758_v41, %v4755_v58 }
 0x259   : > { %v4769_v55 = vor.u32 %v4768_v7, %v9106_v45  ;;  %v4783_v63 = vor.u32 %v4782_v23, %v4779_v48  ;;  %v4801_v61 = vshrl.u32 %v4521_v53, 16  ;;  %v4804_v29 = vshll.u32 %v4521_v53, 16 }
 0x25a   : > { %v4750_v19 = vrot.slane %v9627_v22, 5  ;;  %v4810_v57 = vshll.u32 %v8960_v38, 16  ;;  %v4793_v37 = vor.u32 %v4792_v52, %v9130_v32  ;;  %v4814_v27 = vshrl.u32 %v8960_v38, 16  ;;  %v4527_v22 = vld [vmem:[#allocation2 + $0xb4] sm:$0xf] }
 0x25b   : > { %7164 = vmatmul.mubr.msk.bf16.gmra.mrb[24].mxu1 %vm334_vm1, %v6594_v34  ;;  %v4825_v20 = vshrl.u32 %v4524_v9, 16  ;;  %v4828_v56 = vshll.u32 %v4524_v9, 16  ;;  %v4741_v50 = vsel %vm8182_vm9, %v4736_v8, %v8880_v0  ;;  %v4772_v59 = vshll.u32 %v8935_v60, 16 }
 0x25c   : > { %7167 = vmatprep.mubr.msk.bf16.mxu1 %vm334_vm1, %v6595_v15  ;;  %v4834_v7 = vshll.u32 %v8982_v11, 16  ;;  %v4838_v58 = vshrl.u32 %v8982_v11, 16  ;;  %v4751_v41 = vsel %vm8182_vm9, %v4746_v26, %v4750_v19  ;;  %v4760_v28 = vrot.slane %v4759_v54, 4 }
 0x25d   : > { %v4770_v48 = vrot.slane %v4769_v55, 4  ;;  %v4796_v23 = vshll.u32 %v8952_v25, 16  ;;  %v4784_v38 = vrot.slane %v4783_v63, 4  ;;  %v4803_v1 = vrot.slane %v4801_v61, 4  ;;  %v4530_v63 = vld [vmem:[#allocation2 + $0xc0] sm:$0xf] }
 0x25e   : > { %v4806_v34 = vrot.slane %v4804_v29, 5  ;;  %v9159_v52 = vrot.slane %v4810_v57, 5  ;;  %v4794_v53 = vrot.slane %v4793_v37, 4  ;;  %v4816_v0 = vrot.slane %v4814_v27, 4 }
 0x25f   : > { %v4827_v44 = vrot.slane %v4825_v20, 4  ;;  %v4830_v60 = vrot.slane %v4828_v56, 5  ;;  %v6597_v21 = vcombine.low %v4741_v50, %v4751_v41  ;;  %v4774_v15 = vrot.slane %v4772_v59, 5 }
 0x260   : > { %v9161_v8 = vrot.slane %v4834_v7, 5  ;;  %v4840_v11 = vrot.slane %v4838_v58, 4  ;;  %v4765_v25 = vsel %vm8182_vm9, %v4760_v28, %v9106_v45  ;;  %v4798_v19 = vrot.slane %v4796_v23, 5 }
 0x261   : > { %v4775_v9 = vsel %vm8182_vm9, %v4770_v48, %v4774_v15  ;;  %v4789_v26 = vsel %vm8182_vm9, %v4784_v38, %v9130_v32  ;;  %v4807_v54 = vor.u32 %v4806_v34, %v4803_v1  ;;  %v4820_v55 = vshll.u32 %v8966_v17, 16  ;;  %v4533_v1 = vld [vmem:[#allocation2 + $0xcc] sm:$0xf] }
 0x262   : > { %v4817_v61 = vor.u32 %v4816_v0, %v9159_v52  ;;  %v4831_v45 = vor.u32 %v4830_v60, %v4827_v44  ;;  %v4849_v29 = vshrl.u32 %v4527_v22, 16  ;;  %v4841_v57 = vor.u32 %v4840_v11, %v9161_v8 }
 0x263   : > { %7168 = vmatmul.mubr.msk.bf16.gmra.mrb[28].mxu1 %vm334_vm1, %v6596_v3  ;;  %v4799_v3 = vsel %vm8182_vm9, %v4794_v53, %v4798_v19  ;;  %v4852_v37 = vshll.u32 %v4527_v22, 16  ;;  %v4858_v27 = vshll.u32 %v8999_v51, 16  ;;  %v4862_v20 = vshrl.u32 %v8999_v51, 16 }
 0x264   : > { %7171 = vmatprep.mubr.msk.bf16.mxu1 %vm334_vm1, %v6597_v21  ;;  %v4873_v56 = vshrl.u32 %v4530_v63, 16  ;;  %v4876_v32 = vshll.u32 %v4530_v63, 16  ;;  %v4882_v50 = vshll.u32 %v9012_v2, 16  ;;  %v4886_v17 = vshrl.u32 %v9012_v2, 16 }
 0x265   : > { %v6598_v59 = vcombine.low %v4765_v25, %v4775_v9  ;;  %v6599_v7 = vcombine.low %v4789_v26, %v4799_v3  ;;  %v4808_v58 = vrot.slane %v4807_v54, 4  ;;  %v4822_v41 = vrot.slane %v4820_v55, 5 }
 0x266   : > { %v4818_v28 = vrot.slane %v4817_v61, 4  ;;  %v4832_v48 = vrot.slane %v4831_v45, 4  ;;  %v4844_v23 = vshll.u32 %v8997_v49, 16  ;;  %v4851_v38 = vrot.slane %v4849_v29, 4 }
 0x267   : > { %v4842_v34 = vrot.slane %v4841_v57, 4  ;;  %v4854_v53 = vrot.slane %v4852_v37, 5  ;;  %v4860_v0 = vrot.slane %v4858_v27, 5  ;;  %v4864_v51 = vrot.slane %v4862_v20, 4 }
 0x268   : > { %v4875_v44 = vrot.slane %v4873_v56, 4  ;;  %v4878_v60 = vrot.slane %v4876_v32, 5  ;;  %v4884_v21 = vrot.slane %v4882_v50, 5  ;;  %v4888_v2 = vrot.slane %v4886_v17, 4 }
 0x269   : > { %v4897_v15 = vshrl.u32 %v4533_v1, 16  ;;  %v4900_v11 = vshll.u32 %v4533_v1, 16  ;;  %v4906_v22 = vshll.u32 %v9057_v36, 16  ;;  %v4910_v49 = vshrl.u32 %v9057_v36, 16 }
 0x26a   : > { %v4813_v25 = vsel %vm8182_vm9, %v4808_v58, %v9159_v52  ;;  %v4846_v19 = vrot.slane %v4844_v23, 5  ;;  %v4823_v9 = vsel %vm8182_vm9, %v4818_v28, %v4822_v41  ;;  %v4855_v26 = vor.u32 %v4854_v53, %v4851_v38  ;;  %v5732_v41 = vld [vmem:[%s9574_s5] sm:$0x3] }
 0x26b   : > { %7172 = vmatmul.mubr.msk.bf16.gmra.mrb[0].mxu1 %vm334_vm1, %v6598_v59  ;;  %v4865_v54 = vor.u32 %v4864_v51, %v4860_v0  ;;  %v4868_v55 = vshll.u32 %v9010_v18, 16  ;;  %v4837_v63 = vsel %vm8182_vm9, %v4832_v48, %v9161_v8  ;;  %v4879_v36 = vor.u32 %v4878_v60, %v4875_v44  ;;  %7556 = vmatprep.subr.msk.bf16.mxu0 %vm383_vm0, %v5732_v41  ;;  %v5214_v44 = vld [vmem:[#allocation2 + $0x18] sm:$0xe] }
 0x26c   : > { %7175 = vmatprep.mubr.msk.bf16.mxu1 %vm334_vm1, %v6599_v7  ;;  %v4847_v3 = vsel %vm8182_vm9, %v4842_v34, %v4846_v19  ;;  %v4889_v61 = vor.u32 %v4888_v2, %v4884_v21  ;;  %v4899_v45 = vrot.slane %v4897_v15, 4  ;;  %v4902_v29 = vrot.slane %v4900_v11, 5  ;;  %v5215_v19 = vld [vmem:[#allocation2 + $0x24] sm:$0xe] }
 0x26d   : > { %v4908_v52 = vrot.slane %v4906_v22, 5  ;;  %v4912_v57 = vrot.slane %v4910_v49, 4  ;;  %v6600_v37 = vcombine.low %v4813_v25, %v4823_v9  ;;  %v4892_v27 = vshll.u32 %v9031_v62, 16 }
 0x26e   : > { %v6601_v20 = vcombine.low %v4837_v63, %v4847_v3  ;;  %v4856_v56 = vrot.slane %v4855_v26, 4  ;;  %v4866_v32 = vrot.slane %v4865_v54, 4  ;;  %v4880_v18 = vrot.slane %v4879_v36, 4 }
 0x26f   : > { %v4890_v50 = vrot.slane %v4889_v61, 4  ;;  %v4870_v8 = vrot.slane %v4868_v55, 5  ;;  %v4903_v17 = vor.u32 %v4902_v29, %v4899_v45  ;;  %v4913_v59 = vor.u32 %v4912_v57, %v4908_v52  ;;  %v9633_v61 = vld [vmem:[#allocation8_spill] sm:$0xff]  ;;  %v9635_v29 = vld [vmem:[#allocation9_spill] sm:$0xff] }
 0x270   : > { %v4916_v7 = vshll.u32 %v9059_v12, 16  ;;  %v4894_v58 = vrot.slane %v4892_v27, 5  ;;  %v4861_v62 = vsel %vm8182_vm9, %v4856_v56, %v4860_v0  ;;  %v5789_v48 = vsel %vm383_vm0, %v5732_v41, 0  ;;  %v9639_v57 = vld [vmem:[#allocation13_spill] sm:$0xff]  ;;  %v9644_v27 = vld [vmem:[#allocation15_spill] sm:$0xff]  ;;  %v9653_v41 = vld [vmem:[#allocation20_spill] sm:$0xff] }
 0x271   : > { %v4871_v28 = vsel %vm8182_vm9, %v4866_v32, %v4870_v8  ;;  %v4885_v23 = vsel %vm8182_vm9, %v4880_v18, %v4884_v21  ;;  %v5280_v38 = vrot.slane %v8690_v46, 5  ;;  %7222 = vmatpush3.bf16.msra.mxu0 %v5789_v48  ;;  %v4904_v1 = vrot.slane %v4903_v17, 4  ;;  %v9647_v32 = vld [vmem:[#allocation17_spill] sm:$0xff]  ;;  %v9648_v18 = vld [vmem:[#allocation18_spill] sm:$0xff] }
 0x272   : > { %v4895_v12 = vsel %vm8182_vm9, %v4890_v50, %v4894_v58  ;;  %v4914_v34 = vrot.slane %v4913_v59, 4  ;;  %v4918_v53 = vrot.slane %v4916_v7, 5  ;;  %v6602_v0 = vcombine.low %v4861_v62, %v4871_v28  ;;  %v9652_v58 = vld [vmem:[#allocation19_spill] sm:$0xff]  ;;  %v9655_v48 = vld [vmem:[#allocation21_spill] sm:$0xff] }
 0x273   : > { %7176 = vmatmul.mubr.msk.bf16.gmra.mrb[4].mxu1 %vm334_vm1, %v6600_v37  ;;  %v6603_v51 = vcombine.low %v4885_v23, %v4895_v12  ;;  %v5282_v60 = vrot.slane %v5280_v38, 4  ;;  %v4909_v21 = vsel %vm8182_vm9, %v4904_v1, %v4908_v52  ;;  %v6621_v15 = vrot.slane %v5214_v44, 9  ;;  %v9636_v52 = vld [vmem:[#allocation10_spill] sm:$0xff] }
 0x274   : > { %7179 = vmatprep.mubr.msk.bf16.mxu1 %vm334_vm1, %v6601_v20  ;;  %v4919_v2 = vsel %vm8182_vm9, %v4914_v34, %v4918_v53  ;;  %v5283_v46 = vrot.slane %v8706_v4, 5  ;;  %v5287_v11 = vrot.slane %v8698_v35, 5  ;;  %v6622_v39 = vrot.slane %v5215_v19, 9  ;;  %v9642_v37 = vld [vmem:[#allocation14_spill] sm:$0xff]  ;;  %v9645_v20 = vld [vmem:[#allocation16_spill] sm:$0xff] }
 0x275   : > { %v6604_v22 = vcombine.low %v4909_v21, %v4919_v2  ;;  %v5281_v25 = vsel %vm8461_vm12, %v6621_v15, %v5280_v38  ;;  %v5290_v54 = vrot.slane %v8715_v24, 5  ;;  %v9628_v63 = vcombine.low %v8894_v5, %v8899_v30  ;;  %v9630_v24 = vld [vmem:[#allocation6_spill] sm:$0xff]  ;;  %v9638_v5 = vld [vmem:[#allocation11_spill] sm:$0xff] }
 0x276   : > { %v5284_v49 = vsel %vm8461_vm12, %v5282_v60, %v5283_v46  ;;  %v5289_v26 = vrot.slane %v5287_v11, 4  ;;  %v5288_v4 = vsel %vm8461_vm12, %v6622_v39, %v5287_v11  ;;  %v9629_v3 = vcombine.low %v8909_v40, %v8917_v43  ;;  %v9641_v43 = vld [vmem:[#allocation12_spill] sm:$0xff] }
 0x277   : > { %v6638_v9 = vcombine.low %v5281_v25, %v5284_v49  ;;  %v9631_v36 = vcombine.low %v8913_v6, %v9630_v24  ;;  %v9634_v45 = vcombine.low %v9632_v47, %v9633_v61  ;;  %v9637_v30 = vcombine.low %v9635_v29, %v9636_v52 }
 0x278   : > { %v5291_v35 = vsel %vm8461_vm12, %v5289_v26, %v5290_v54  ;;  %v9640_v40 = vcombine.low %v9638_v5, %v9639_v57  ;;  %v9643_v6 = vcombine.low %v9641_v43, %v9642_v37  ;;  %v9646_v56 = vcombine.low %v9644_v27, %v9645_v20 }
 0x279   : > { %v6639_v55 = vcombine.low %v5288_v4, %v5291_v35  ;;  %v9649_v50 = vcombine.low %v9647_v32, %v9648_v18  ;;  %v9650_v8 = vcombine.low %v9035_v16, %v9044_v13  ;;  %v9651_v17 = vcombine.low %v9039_v33, %v9051_v42  ;;  %v9656_v13 = vld [vmem:[#allocation22_spill] sm:$0xff]  ;;  %v9331_v4 = vld [vmem:[%s9573_s4] ss:$0 sm:$0xff] }
 0x27a   : > { %v9654_v62 = vcombine.low %v9652_v58, %v9653_v41  ;;  %v9657_v16 = vcombine.low %v9655_v48, %v9656_v13 }
 0x27b   : > { %7180 = vmatmul.mubr.msk.bf16.gmra.mrb[8].mxu1 %vm334_vm1, %v6602_v0 }
 0x27c   : > { %7183 = vmatprep.mubr.msk.bf16.mxu1 %vm334_vm1, %v6603_v51 }
 0x283   : > { %7184 = vmatmul.mubr.msk.bf16.gmra.mrb[12].mxu1 %vm334_vm1, %v6604_v22 }
 0x284   : > { %7189 = vmatprep.mubr.msk.bf16.mxu1 %vm334_vm1, %v6638_v9 }
 0x28b   : > { %7190 = vmatmul.mubr.msk.bf16.vlgmr.msra.gmra.mrb[16].mxu1 %vm334_vm1, %v6639_v55 }
 0x28c   : > { %7193 = vmatprep.mubr.msk.bf16.mxu1 %vm334_vm1, %v9628_v63 }
 0x293   : > { %7194 = vmatmul.mubr.msk.bf16.gmra.mrb[20].mxu1 %vm334_vm1, %v9629_v3 }
 0x294   : > { %7197 = vmatprep.mubr.msk.bf16.mxu1 %vm334_vm1, %v9631_v36 }
 0x29b   : > { %7198 = vmatmul.mubr.msk.bf16.gmra.mrb[24].mxu1 %vm334_vm1, %v9634_v45 }
 0x29c   : > { %7201 = vmatprep.mubr.msk.bf16.mxu1 %vm334_vm1, %v9637_v30 }
 0x2a3   : > { %7202 = vmatmul.mubr.msk.bf16.gmra.mrb[28].mxu1 %vm334_vm1, %v9640_v40 }
 0x2a4   : > { %7205 = vmatprep.mubr.msk.bf16.mxu1 %vm334_vm1, %v9643_v6 }
 0x2ab   : > { %7206 = vmatmul.mubr.msk.bf16.gmra.mrb[0].mxu1 %vm334_vm1, %v9646_v56 }
 0x2ac   : > { %7209 = vmatprep.mubr.msk.bf16.mxu1 %vm334_vm1, %v9649_v50 }
 0x2b3   : > { %7210 = vmatmul.mubr.msk.bf16.gmra.mrb[4].mxu1 %vm334_vm1, %v9650_v8 }
 0x2b4   : > { %7213 = vmatprep.mubr.msk.bf16.mxu1 %vm334_vm1, %v9651_v17 }
 0x2b9   : > { %v9280_v59 = vpop.f32.mrb[48].mxu0 }
 0x2ba   : > { %v9282_v7 = vpop.f32.mrb[49].mxu0 }
 0x2bb   : > { %7214 = vmatmul.mubr.msk.bf16.gmra.mrb[8].mxu1 %vm334_vm1, %v9654_v62  ;;  %v9288_v28 = vpop.f32.mrb[50].mxu0 }
 0x2bc   : > { %7217 = vmatprep.mubr.msk.bf16.mxu1 %vm334_vm1, %v9657_v16  ;;  %v9294_v23 = vpop.f32.mrb[51].mxu0 }
 0x2c1   : > { %v9296_v33 = vpop.f32.mrb[52].mxu0 }
 0x2c2   : > { %v9298_v42 = vpop.f32.mrb[53].mxu0 }
 0x2c3   : > { %7218 = vmatmul.mubr.msk.bf16.gmra.mrb[12].mxu1 %vm334_vm1, %v6653_v14  ;;  %v9304_v12 = vpop.f32.mrb[54].mxu0 }
 0x2c4   : > { %v9306_v38 = vpop.f32.mrb[55].mxu0 }
 0x2c9   : > { %v9308_v1 = vpop.f32.mrb[56].mxu0 }
 0x2ca   : > { %v9310_v34 = vpop.f32.mrb[57].mxu0 }
 0x2cb   : > { %v9312_v53 = vpop.f32.mrb[58].mxu0 }
 0x2cc   : > { %v9314_v0 = vpop.f32.mrb[59].mxu0 }
 0x2d1   : > { %v9316_v51 = vpop.f32.mrb[60].mxu0 }
 0x2d2   : > { %v9318_v44 = vpop.f32.mrb[61].mxu0 }
 0x2d3   : > { %v9320_v60 = vpop.f32.mrb[62].mxu0 }
 0x2d4   : > { %v9322_v31 = vpop.f32.mrb[63].mxu0 }
 0x2d9   : > { %v7021_v10 = vpop.f32.mrb[32].mxu0 }
 0x2da   : > { %v2774_v14 = vpop.f32.mrb[33].mxu0  ;;  %v7257_v55 = vadd.f32 %v7021_v10, %v9331_v4 }
 0x2db   : > { %v7022_v21 = vpop.f32.mrb[34].mxu0  ;;  %v7259_v63 = vadd.f32 %v9331_v4, %v2774_v14 }
 0x2dc   : > { %v2777_v2 = vpop.f32.mrb[35].mxu0  ;;  %v7261_v24 = vadd.f32 %v7022_v21, %v9331_v4 }
 0x2dd   : > { %v7263_v61 = vadd.f32 %v9331_v4, %v2777_v2 }
 0x2e1   : > { %v7025_v15 = vpop.f32.mrb[36].mxu0 }
 0x2e2   : > { %v2790_v46 = vpop.f32.mrb[37].mxu0  ;;  %v7265_v6 = vadd.f32 %v7025_v15, %v9331_v4 }
 0x2e3   : > { %v7026_v11 = vpop.f32.mrb[38].mxu0  ;;  %v7267_v20 = vadd.f32 %v9331_v4, %v2790_v46 }
 0x2e4   : > { %v2793_v22 = vpop.f32.mrb[39].mxu0  ;;  %v7269_v18 = vadd.f32 %v7026_v11, %v9331_v4 }
 0x2e5   : > { %v7271_v17 = vadd.f32 %v9331_v4, %v2793_v22 }
 0x2e9   : > { %v7029_v49 = vpop.f32.mrb[40].mxu0 }
 0x2ea   : > { %v2806_v25 = vpop.f32.mrb[41].mxu0  ;;  %v7273_v2 = vadd.f32 %v7029_v49, %v9331_v4 }
 0x2eb   : > { %v7030_v19 = vpop.f32.mrb[42].mxu0  ;;  %v7275_v46 = vadd.f32 %v9331_v4, %v2806_v25 }
 0x2ec   : > { %v2809_v9 = vpop.f32.mrb[43].mxu0 }
 0x2f1   : > { %v7033_v26 = vpop.f32.mrb[44].mxu0 }
 0x2f2   : > { %v2822_v39 = vpop.f32.mrb[45].mxu0 }
 0x2f3   : > { %v9324_v54 = vpop.f32.mrb[46].mxu0 }
 0x2f4   : > { %v9326_v35 = vpop.f32.mrb[47].mxu0 }
 0x35e   : > { %v7191_v3 = vpop.f32.mrb[16].mxu1 }
 0x35f   : > { %v7258_v36 = vadd.f32 %v7257_v55, %v7191_v3  ;;  %v5525_v47 = vpop.f32.mrb[17].mxu1  ;;  %v7277_v55 = vadd.f32 %v7030_v19, %v9331_v4 }
 0x360   : > { %v7260_v45 = vadd.f32 %v7259_v63, %v5525_v47  ;;  %v7192_v29 = vpop.f32.mrb[18].mxu1 }
 0x361   : > { %v7262_v52 = vadd.f32 %v7261_v24, %v7192_v29  ;;  %v5528_v30 = vpop.f32.mrb[19].mxu1  ;;  %v5686_v57 = vmax.f32 %v7258_v36, 0.0  ;;  %v7279_v24 = vadd.f32 %v9331_v4, %v2809_v9 }
 0x362   : > { %v7264_v5 = vadd.f32 %v7263_v61, %v5528_v30  ;;  %v5684_v43 = vmax.f32 %v7260_v45, 0.0 }
 0x363   : > { %v5687_v40 = vmax.f32 %v7262_v52, 0.0 }
 0x364   : > { %v5685_v37 = vmax.f32 %v7264_v5, 0.0  ;;  %v7281_v5 = vadd.f32 %v7033_v26, %v9331_v4 }
 0x365   : > { %v5717_v27 = vpack.c.bf16 %v5687_v40, %v5686_v57  ;;  %v7283_v57 = vadd.f32 %v9331_v4, %v2822_v39 }
 0x366   : > { %v5716_v56 = vpack.c.bf16 %v5685_v37, %v5684_v43  ;;  %v7195_v32 = vpop.f32.mrb[20].mxu1  ;;  %v7285_v43 = vadd.f32 %v9324_v54, %v9331_v4  ;;  %v7289_v54 = vadd.f32 %v9280_v59, %v9331_v4 }
 0x367   : > { %v7266_v50 = vadd.f32 %v7265_v6, %v7195_v32  ;;  %v5541_v8 = vpop.f32.mrb[21].mxu1 }
 0x368   : > { %v7268_v58 = vadd.f32 %v7267_v20, %v5541_v8  ;;  %v7196_v41 = vpop.f32.mrb[22].mxu1  ;;  %7223 = vmatprep.mubr.msk.bf16.mxu0 %vm334_vm1, %v5716_v56 }
 0x369   : > { %v7270_v62 = vadd.f32 %v7269_v18, %v7196_v41  ;;  %v5544_v48 = vpop.f32.mrb[23].mxu1  ;;  %7224 = vmatmul.mubr.msk.bf16.vlgmr.msra.gmra.mrb[64].mxu0 %vm334_vm1, %v5717_v27  ;;  %v5690_v16 = vmax.f32 %v7266_v50, 0.0  ;;  %v7287_v27 = vadd.f32 %v9331_v4, %v9326_v35  ;;  %v7291_v35 = vadd.f32 %v9331_v4, %v9282_v7 }
 0x36a   : > { %v7272_v13 = vadd.f32 %v7271_v17, %v5544_v48  ;;  %v5688_v14 = vmax.f32 %v7268_v58, 0.0  ;;  %v7293_v48 = vadd.f32 %v9288_v28, %v9331_v4  ;;  %v7297_v28 = vadd.f32 %v9296_v33, %v9331_v4 }
 0x36b   : > { %v5691_v10 = vmax.f32 %v7270_v62, 0.0 }
 0x36c   : > { %v5689_v21 = vmax.f32 %v7272_v13, 0.0 }
 0x36d   : > { %v5719_v15 = vpack.c.bf16 %v5691_v10, %v5690_v16  ;;  %v7295_v10 = vadd.f32 %v9331_v4, %v9294_v23  ;;  %v7299_v23 = vadd.f32 %v9331_v4, %v9298_v42 }
 0x36e   : > { %v5718_v11 = vpack.c.bf16 %v5689_v21, %v5688_v14  ;;  %v7199_v22 = vpop.f32.mrb[24].mxu1 }
 0x36f   : > { %v7274_v63 = vadd.f32 %v7273_v2, %v7199_v22  ;;  %v5557_v3 = vpop.f32.mrb[25].mxu1 }
 0x370   : > { %v7276_v36 = vadd.f32 %v7275_v46, %v5557_v3  ;;  %v7200_v47 = vpop.f32.mrb[26].mxu1  ;;  %7227 = vmatprep.mubr.msk.bf16.mxu0 %vm334_vm1, %v5718_v11 }
 0x371   : > { %v7278_v61 = vadd.f32 %v7277_v55, %v7200_v47  ;;  %v5560_v45 = vpop.f32.mrb[27].mxu1  ;;  %7228 = vmatmul.mubr.msk.bf16.gmra.mrb[68].mxu0 %vm334_vm1, %v5719_v15  ;;  %v5694_v29 = vmax.f32 %v7274_v63, 0.0 }
 0x372   : > { %v7280_v49 = vadd.f32 %v7279_v24, %v5560_v45  ;;  %v5692_v25 = vmax.f32 %v7276_v36, 0.0  ;;  %v7301_v24 = vadd.f32 %v9304_v12, %v9331_v4  ;;  %v7305_v12 = vadd.f32 %v9308_v1, %v9331_v4 }
 0x373   : > { %v5695_v52 = vmax.f32 %v7278_v61, 0.0  ;;  %v7303_v61 = vadd.f32 %v9331_v4, %v9306_v38  ;;  %v7307_v38 = vadd.f32 %v9331_v4, %v9310_v34 }
 0x374   : > { %v5693_v30 = vmax.f32 %v7280_v49, 0.0 }
 0x375   : > { %v5721_v19 = vpack.c.bf16 %v5695_v52, %v5694_v29 }
 0x376   : > { %v5720_v40 = vpack.c.bf16 %v5693_v30, %v5692_v25  ;;  %v7203_v9 = vpop.f32.mrb[28].mxu1 }
 0x377   : > { %v7282_v37 = vadd.f32 %v7281_v5, %v7203_v9  ;;  %v5573_v6 = vpop.f32.mrb[29].mxu1  ;;  %v7309_v9 = vadd.f32 %v9312_v53, %v9331_v4  ;;  %v7313_v53 = vadd.f32 %v9316_v51, %v9331_v4 }
 0x378   : > { %v7284_v20 = vadd.f32 %v7283_v57, %v5573_v6  ;;  %v7204_v56 = vpop.f32.mrb[30].mxu1  ;;  %7231 = vmatprep.mubr.msk.bf16.mxu0 %vm334_vm1, %v5720_v40  ;;  %v7311_v6 = vadd.f32 %v9331_v4, %v9314_v0  ;;  %v7315_v0 = vadd.f32 %v9331_v4, %v9318_v44 }
 0x379   : > { %v7286_v32 = vadd.f32 %v7285_v43, %v7204_v56  ;;  %v5576_v18 = vpop.f32.mrb[31].mxu1  ;;  %7232 = vmatmul.mubr.msk.bf16.gmra.mrb[72].mxu0 %vm334_vm1, %v5721_v19  ;;  %v5698_v39 = vmax.f32 %v7282_v37, 0.0 }
 0x37a   : > { %v7288_v26 = vadd.f32 %v7287_v27, %v5576_v18  ;;  %v5696_v8 = vmax.f32 %v7284_v20, 0.0 }
 0x37b   : > { %v5699_v50 = vmax.f32 %v7286_v32, 0.0 }
 0x37c   : > { %v5697_v17 = vmax.f32 %v7288_v26, 0.0 }
 0x37d   : > { %v5723_v58 = vpack.c.bf16 %v5699_v50, %v5698_v39 }
 0x37e   : > { %v5722_v41 = vpack.c.bf16 %v5697_v17, %v5696_v8  ;;  %v7207_v62 = vpop.f32.mrb[0].mxu1 }
 0x37f   : > { %v7290_v13 = vadd.f32 %v7289_v54, %v7207_v62  ;;  %v5589_v16 = vpop.f32.mrb[1].mxu1  ;;  %v7317_v54 = vadd.f32 %v9320_v60, %v9331_v4 }
 0x380   : > { %v7292_v14 = vadd.f32 %v7291_v35, %v5589_v16  ;;  %v7208_v21 = vpop.f32.mrb[2].mxu1  ;;  %7235 = vmatprep.mubr.msk.bf16.mxu0 %vm334_vm1, %v5722_v41  ;;  %v7319_v41 = vadd.f32 %v9331_v4, %v9322_v31  ;;  %v5985_v31 = vpop.permute.xlu0 %5984 }
 0x381   : > { %v7294_v2 = vadd.f32 %v7293_v48, %v7208_v21  ;;  %v5592_v59 = vpop.f32.mrb[3].mxu1  ;;  %7236 = vmatmul.mubr.msk.bf16.gmra.mrb[76].mxu0 %vm334_vm1, %v5723_v58  ;;  %v5702_v7 = vmax.f32 %v7290_v13, 0.0  ;;  %v5989_v4 = vpop.permute.xlu1 %5988 }
 0x382   : > { %v7296_v15 = vadd.f32 %v7295_v10, %v5592_v59  ;;  %v5700_v11 = vmax.f32 %v7292_v14, 0.0 }
 0x383   : > { %v5703_v46 = vmax.f32 %v7294_v2, 0.0 }
 0x384   : > { %v5701_v22 = vmax.f32 %v7296_v15, 0.0  ;;  %v5987_v59 = vpop.permute.xlu0 %5986 }
 0x385   : > { %v5725_v55 = vpack.c.bf16 %v5703_v46, %v5702_v7  ;;  %v5991_v15 = vpop.permute.xlu1 %5990 }
 0x386   : > { %v5724_v63 = vpack.c.bf16 %v5701_v22, %v5700_v11  ;;  %v7211_v3 = vpop.f32.mrb[4].mxu1 }
 0x387   : > { %v7298_v36 = vadd.f32 %v7297_v28, %v7211_v3  ;;  %v5605_v47 = vpop.f32.mrb[5].mxu1 }
 0x388   : > { %v7300_v45 = vadd.f32 %v7299_v23, %v5605_v47  ;;  %v7212_v49 = vpop.f32.mrb[6].mxu1  ;;  %7239 = vmatprep.mubr.msk.bf16.mxu0 %vm334_vm1, %v5724_v63  ;;  %v5997_v7 = vpop.permute.xlu0 %5996  ;;  %v9405_v63 = vld [vmem:[%s9575_s6] ss:$0 sm:$0xff] }
 0x389   : > { %v7302_v29 = vadd.f32 %v7301_v24, %v7212_v49  ;;  %v5608_v33 = vpop.f32.mrb[7].mxu1  ;;  %7240 = vmatmul.mubr.msk.bf16.gmra.mrb[80].mxu0 %vm334_vm1, %v5725_v55  ;;  %v5706_v42 = vmax.f32 %v7298_v36, 0.0  ;;  %v5999_v46 = vpop.permute.xlu1 %5998 }
 0x38a   : > { %v7304_v52 = vadd.f32 %v7303_v61, %v5608_v33  ;;  %v5704_v30 = vmax.f32 %v7300_v45, 0.0 }
 0x38b   : > { %v5707_v25 = vmax.f32 %v7302_v29, 0.0 }
 0x38c   : > { %v5705_v5 = vmax.f32 %v7304_v52, 0.0  ;;  %v5993_v11 = vpop.permute.xlu0 %5992 }
 0x38d   : > { %v5727_v19 = vpack.c.bf16 %v5707_v25, %v5706_v42  ;;  %v5995_v22 = vpop.permute.xlu1 %5994 }
 0x38e   : > { %v5726_v57 = vpack.c.bf16 %v5705_v5, %v5704_v30  ;;  %v7215_v40 = vpop.f32.mrb[8].mxu1 }
 0x38f   : > { %v7306_v43 = vadd.f32 %v7305_v12, %v7215_v40  ;;  %v5621_v37 = vpop.f32.mrb[9].mxu1 }
 0x390   : > { %v7308_v27 = vadd.f32 %v7307_v38, %v5621_v37  ;;  %v7216_v20 = vpop.f32.mrb[10].mxu1  ;;  %7243 = vmatprep.mubr.msk.bf16.mxu0 %vm334_vm1, %v5726_v57  ;;  %v6005_v28 = vpop.permute.xlu0 %6004 }
 0x391   : > { %v7310_v56 = vadd.f32 %v7309_v9, %v7216_v20  ;;  %v5624_v1 = vpop.f32.mrb[11].mxu1  ;;  %7244 = vmatmul.mubr.msk.bf16.gmra.mrb[84].mxu0 %vm334_vm1, %v5727_v19  ;;  %v5710_v34 = vmax.f32 %v7306_v43, 0.0  ;;  %v9399_v55 = vpop.permute.xlu1 %6006 }
 0x392   : > { %v7312_v32 = vadd.f32 %v7311_v6, %v5624_v1  ;;  %v5708_v26 = vmax.f32 %v7308_v27, 0.0 }
 0x393   : > { %v5711_v18 = vmax.f32 %v7310_v56, 0.0 }
 0x394   : > { %v5709_v39 = vmax.f32 %v7312_v32, 0.0  ;;  %v6001_v23 = vpop.permute.xlu0 %6000 }
 0x395   : > { %v5729_v50 = vpack.c.bf16 %v5711_v18, %v5710_v34  ;;  %v9407_v3 = vpop.permute.xlu1 %6002 }
 0x396   : > { %v5728_v8 = vpack.c.bf16 %v5709_v39, %v5708_v26  ;;  %v7219_v17 = vpop.f32.mrb[12].mxu1 }
 0x397   : > { %v7314_v58 = vadd.f32 %v7313_v53, %v7219_v17  ;;  %v5637_v35 = vpop.f32.mrb[13].mxu1 }
 0x398   : > { %v7316_v62 = vadd.f32 %v7315_v0, %v5637_v35  ;;  %v7220_v48 = vpop.f32.mrb[14].mxu1  ;;  %7247 = vmatprep.mubr.msk.bf16.mxu0 %vm334_vm1, %v5728_v8  ;;  %v9414_v52 = vpop.permute.xlu0 %6012 }
 0x399   : > { %v7318_v13 = vadd.f32 %v7317_v54, %v7220_v48  ;;  %v5640_v51 = vpop.f32.mrb[15].mxu1  ;;  %7248 = vmatmul.mubr.msk.bf16.gmra.mrb[88].mxu0 %vm334_vm1, %v5729_v50  ;;  %v5714_v44 = vmax.f32 %v7314_v58, 0.0  ;;  %v9417_v12 = vpop.permute.xlu1 %6014 }
 0x39a   : > { %v7320_v16 = vadd.f32 %v7319_v41, %v5640_v51  ;;  %v5712_v14 = vmax.f32 %v7316_v62, 0.0 }
 0x39b   : > { %v5715_v10 = vmax.f32 %v7318_v13, 0.0 }
 0x39c   : > { %v5713_v21 = vmax.f32 %v7320_v16, 0.0  ;;  %v6009_v6 = vpop.permute.xlu0 %6008 }
 0x39d   : > { %v5731_v60 = vpack.c.bf16 %v5715_v10, %v5714_v44  ;;  %v6011_v34 = vpop.permute.xlu1 %6010 }
 0x39e   : > { %v5730_v2 = vpack.c.bf16 %v5713_v21, %v5712_v14 }
 0x3a0   : > { %7251 = vmatprep.mubr.msk.bf16.mxu0 %vm334_vm1, %v5730_v2  ;;  %v6021_v17 = vpop.permute.xlu0 %6020 }
 0x3a1   : > { %7252 = vmatmul.mubr.msk.bf16.gmra.mrb[92].mxu0 %vm334_vm1, %v5731_v60  ;;  %v6023_v62 = vpop.permute.xlu1 %6022 }
 0x3a4   : > { %v6017_v2 = vpop.permute.xlu0 %6016 }
 0x43c   : > { %v7225_v24 = vpop.f32.mrb[64].mxu0 }
 0x43d   : > { %v5834_v36 = vadd.f32 %v7225_v24, %v9405_v63  ;;  %v5825_v47 = vpop.f32.mrb[65].mxu0 }
 0x43e   : > { %v5826_v61 = vadd.f32 %v9405_v63, %v5825_v47  ;;  %v7226_v45 = vpop.f32.mrb[66].mxu0 }
 0x43f   : > { %v6082_v49 = vadd.f32 %v5989_v4, %v5834_v36  ;;  %v5837_v29 = vadd.f32 %v7226_v45, %v9405_v63  ;;  %v5828_v33 = vpop.f32.mrb[67].mxu0  ;;  %v6029_v36 = vpop.permute.xlu0 %6028 }
 0x440   : > { %v6080_v42 = vadd.f32 %v5985_v31, %v5826_v61  ;;  %v5829_v25 = vadd.f32 %v9405_v63, %v5828_v33 }
 0x441   : > { %v6114_v30 = vmax.f32 %v6082_v49, 0.0  ;;  %v6083_v5 = vadd.f32 %v5991_v15, %v5837_v29  ;;  %v6019_v15 = vpop.permute.xlu1 %6018 }
 0x442   : > { %v6112_v19 = vmax.f32 %v6080_v42, 0.0  ;;  %v6081_v38 = vadd.f32 %v5987_v59, %v5829_v25 }
 0x443   : > { %6147 = vst.msk [vmem:[%s9419_s8 + $0x10] sm:$0xff] %vm6144_vm13, %v6114_v30  ;;  %v6115_v57 = vmax.f32 %v6083_v5, 0.0 }
 0x444   : > { %6145 = vst.msk [vmem:[%s9419_s8] sm:$0xff] %vm6144_vm13, %v6112_v19  ;;  %v6113_v40 = vmax.f32 %v6081_v38, 0.0  ;;  %v7229_v9 = vpop.f32.mrb[68].mxu0  ;;  %v6025_v38 = vpop.permute.xlu0 %6024 }
 0x445   : > { %6148 = vst.msk [vmem:[%s9419_s8 + $0x18] sm:$0xff] %vm6144_vm13, %v6115_v57  ;;  %v5850_v43 = vadd.f32 %v7229_v9, %v9405_v63  ;;  %v5841_v37 = vpop.f32.mrb[69].mxu0  ;;  %v6031_v29 = vpop.permute.xlu1 %6030 }
 0x446   : > { %6146 = vst.msk [vmem:[%s9419_s8 + $0x8] sm:$0xff] %vm6144_vm13, %v6113_v40  ;;  %v5842_v27 = vadd.f32 %v9405_v63, %v5841_v37  ;;  %v7230_v20 = vpop.f32.mrb[70].mxu0 }
 0x447   : > { %v6086_v56 = vadd.f32 %v5997_v7, %v5850_v43  ;;  %v5853_v1 = vadd.f32 %v7230_v20, %v9405_v63  ;;  %v5844_v32 = vpop.f32.mrb[71].mxu0 }
 0x448   : > { %v6084_v18 = vadd.f32 %v5993_v11, %v5842_v27  ;;  %v5845_v26 = vadd.f32 %v9405_v63, %v5844_v32 }
 0x449   : > { %v6118_v39 = vmax.f32 %v6086_v56, 0.0  ;;  %v6087_v53 = vadd.f32 %v5999_v46, %v5853_v1  ;;  %v6027_v37 = vpop.permute.xlu1 %6026 }
 0x44a   : > { %v6116_v50 = vmax.f32 %v6084_v18, 0.0  ;;  %v6085_v0 = vadd.f32 %v5995_v22, %v5845_v26  ;;  %v6037_v18 = vpop.permute.xlu0 %6036 }
 0x44b   : > { %6151 = vst.msk [vmem:[%s9419_s8 + $0x30] sm:$0xff] %vm6144_vm13, %v6118_v39  ;;  %v6119_v8 = vmax.f32 %v6087_v53, 0.0 }
 0x44c   : > { %6149 = vst.msk [vmem:[%s9419_s8 + $0x20] sm:$0xff] %vm6144_vm13, %v6116_v50  ;;  %v6117_v54 = vmax.f32 %v6085_v0, 0.0  ;;  %v7233_v58 = vpop.f32.mrb[72].mxu0 }
 0x44d   : > { %6152 = vst.msk [vmem:[%s9419_s8 + $0x38] sm:$0xff] %vm6144_vm13, %v6119_v8  ;;  %v5866_v35 = vadd.f32 %v7233_v58, %v9405_v63  ;;  %v5857_v41 = vpop.f32.mrb[73].mxu0  ;;  %v6039_v0 = vpop.permute.xlu1 %6038 }
 0x44e   : > { %6150 = vst.msk [vmem:[%s9419_s8 + $0x28] sm:$0xff] %vm6144_vm13, %v6117_v54  ;;  %v5858_v48 = vadd.f32 %v9405_v63, %v5857_v41  ;;  %v7234_v13 = vpop.f32.mrb[74].mxu0 }
 0x44f   : > { %v6090_v51 = vadd.f32 %v6005_v28, %v5866_v35  ;;  %v5869_v16 = vadd.f32 %v7234_v13, %v9405_v63  ;;  %v5860_v44 = vpop.f32.mrb[75].mxu0 }
 0x450   : > { %v6088_v10 = vadd.f32 %v6001_v23, %v5858_v48  ;;  %v5861_v14 = vadd.f32 %v9405_v63, %v5860_v44 }
 0x451   : > { %v6122_v21 = vmax.f32 %v6090_v51, 0.0  ;;  %v6091_v60 = vadd.f32 %v9399_v55, %v5869_v16  ;;  %v6033_v51 = vpop.permute.xlu0 %6032 }
 0x452   : > { %v6120_v31 = vmax.f32 %v6088_v10, 0.0  ;;  %v6089_v4 = vadd.f32 %v9407_v3, %v5861_v14  ;;  %v6035_v14 = vpop.permute.xlu1 %6034 }
 0x453   : > { %6155 = vst.msk [vmem:[%s9419_s8 + $0x50] sm:$0xff] %vm6144_vm13, %v6122_v21  ;;  %v6123_v59 = vmax.f32 %v6091_v60, 0.0 }
 0x454   : > { %6153 = vst.msk [vmem:[%s9419_s8 + $0x40] sm:$0xff] %vm6144_vm13, %v6120_v31  ;;  %v6121_v7 = vmax.f32 %v6089_v4, 0.0  ;;  %v7237_v46 = vpop.f32.mrb[76].mxu0 }
 0x455   : > { %6156 = vst.msk [vmem:[%s9419_s8 + $0x58] sm:$0xff] %vm6144_vm13, %v6123_v59  ;;  %v5882_v11 = vadd.f32 %v7237_v46, %v9405_v63  ;;  %v5873_v22 = vpop.f32.mrb[77].mxu0 }
 0x456   : > { %6154 = vst.msk [vmem:[%s9419_s8 + $0x48] sm:$0xff] %vm6144_vm13, %v6121_v7  ;;  %v5874_v28 = vadd.f32 %v9405_v63, %v5873_v22  ;;  %v7238_v55 = vpop.f32.mrb[78].mxu0 }
 0x457   : > { %v6094_v23 = vadd.f32 %v9414_v52, %v5882_v11  ;;  %v5885_v3 = vadd.f32 %v7238_v55, %v9405_v63  ;;  %v5876_v24 = vpop.f32.mrb[79].mxu0  ;;  %v6041_v11 = vpop.permute.xlu0 %6040 }
 0x458   : > { %v6092_v47 = vadd.f32 %v6009_v6, %v5874_v28  ;;  %v5877_v61 = vadd.f32 %v9405_v63, %v5876_v24 }
 0x459   : > { %v6126_v45 = vmax.f32 %v6094_v23, 0.0  ;;  %v6095_v49 = vadd.f32 %v9417_v12, %v5885_v3  ;;  %v6043_v3 = vpop.permute.xlu1 %6042 }
 0x45a   : > { %v6124_v33 = vmax.f32 %v6092_v47, 0.0  ;;  %v6093_v42 = vadd.f32 %v6011_v34, %v5877_v61 }
 0x45b   : > { %6159 = vst.msk [vmem:[%s9419_s8 + $0x70] sm:$0xff] %vm6144_vm13, %v6126_v45  ;;  %v6127_v25 = vmax.f32 %v6095_v49, 0.0 }
 0x45c   : > { %6157 = vst.msk [vmem:[%s9419_s8 + $0x60] sm:$0xff] %vm6144_vm13, %v6124_v33  ;;  %v6125_v52 = vmax.f32 %v6093_v42, 0.0  ;;  %v7241_v30 = vpop.f32.mrb[80].mxu0  ;;  %v6045_v33 = vpop.permute.xlu0 %6044 }
 0x45d   : > { %6160 = vst.msk [vmem:[%s9419_s8 + $0x78] sm:$0xff] %vm6144_vm13, %v6127_v25  ;;  %v5898_v5 = vadd.f32 %v7241_v30, %v9405_v63  ;;  %v5889_v19 = vpop.f32.mrb[81].mxu0 }
 0x45e   : > { %6158 = vst.msk [vmem:[%s9419_s8 + $0x68] sm:$0xff] %vm6144_vm13, %v6125_v52  ;;  %v5890_v12 = vadd.f32 %v9405_v63, %v5889_v19  ;;  %v7242_v57 = vpop.f32.mrb[82].mxu0  ;;  %v6047_v19 = vpop.permute.xlu1 %6046 }
 0x45f   : > { %v6098_v40 = vadd.f32 %v6021_v17, %v5898_v5  ;;  %v5901_v9 = vadd.f32 %v7242_v57, %v9405_v63  ;;  %v5892_v43 = vpop.f32.mrb[83].mxu0 }
 0x460   : > { %v6096_v6 = vadd.f32 %v6017_v2, %v5890_v12  ;;  %v5893_v27 = vadd.f32 %v9405_v63, %v5892_v43 }
 0x461   : > { %v6130_v20 = vmax.f32 %v6098_v40, 0.0  ;;  %v6099_v56 = vadd.f32 %v6023_v62, %v5901_v9 }
 0x462   : > { %v6128_v1 = vmax.f32 %v6096_v6, 0.0  ;;  %v6097_v32 = vadd.f32 %v6019_v15, %v5893_v27 }
 0x463   : > { %6163 = vst.msk [vmem:[%s9419_s8 + $0x90] sm:$0xff] %vm6144_vm13, %v6130_v20  ;;  %v6131_v34 = vmax.f32 %v6099_v56, 0.0 }
 0x464   : > { %6161 = vst.msk [vmem:[%s9419_s8 + $0x80] sm:$0xff] %vm6144_vm13, %v6128_v1  ;;  %v6129_v26 = vmax.f32 %v6097_v32, 0.0  ;;  %v7245_v39 = vpop.f32.mrb[84].mxu0 }
 0x465   : > { %6164 = vst.msk [vmem:[%s9419_s8 + $0x98] sm:$0xff] %vm6144_vm13, %v6131_v34  ;;  %v5914_v53 = vadd.f32 %v7245_v39, %v9405_v63  ;;  %v5905_v50 = vpop.f32.mrb[85].mxu0 }
 0x466   : > { %6162 = vst.msk [vmem:[%s9419_s8 + $0x88] sm:$0xff] %vm6144_vm13, %v6129_v26  ;;  %v5906_v8 = vadd.f32 %v9405_v63, %v5905_v50  ;;  %v7246_v17 = vpop.f32.mrb[86].mxu0 }
 0x467   : > { %v6102_v54 = vadd.f32 %v6029_v36, %v5914_v53  ;;  %v5917_v58 = vadd.f32 %v7246_v17, %v9405_v63  ;;  %v5908_v35 = vpop.f32.mrb[87].mxu0 }
 0x468   : > { %v6100_v41 = vadd.f32 %v6025_v38, %v5906_v8  ;;  %v5909_v62 = vadd.f32 %v9405_v63, %v5908_v35 }
 0x469   : > { %v6134_v48 = vmax.f32 %v6102_v54, 0.0  ;;  %v6103_v13 = vadd.f32 %v6031_v29, %v5917_v58 }
 0x46a   : > { %v6132_v16 = vmax.f32 %v6100_v41, 0.0  ;;  %v6101_v44 = vadd.f32 %v6027_v37, %v5909_v62 }
 0x46b   : > { %6167 = vst.msk [vmem:[%s9419_s8 + $0xb0] sm:$0xff] %vm6144_vm13, %v6134_v48  ;;  %v6135_v10 = vmax.f32 %v6103_v13, 0.0 }
 0x46c   : > { %6165 = vst.msk [vmem:[%s9419_s8 + $0xa0] sm:$0xff] %vm6144_vm13, %v6132_v16  ;;  %v6133_v21 = vmax.f32 %v6101_v44, 0.0  ;;  %v7249_v60 = vpop.f32.mrb[88].mxu0 }
 0x46d   : > { %6168 = vst.msk [vmem:[%s9419_s8 + $0xb8] sm:$0xff] %vm6144_vm13, %v6135_v10  ;;  %v5930_v2 = vadd.f32 %v7249_v60, %v9405_v63  ;;  %v5921_v31 = vpop.f32.mrb[89].mxu0 }
 0x46e   : > { %6166 = vst.msk [vmem:[%s9419_s8 + $0xa8] sm:$0xff] %vm6144_vm13, %v6133_v21  ;;  %v5922_v4 = vadd.f32 %v9405_v63, %v5921_v31  ;;  %v7250_v59 = vpop.f32.mrb[90].mxu0 }
 0x46f   : > { %v6106_v15 = vadd.f32 %v6037_v18, %v5930_v2  ;;  %v5933_v7 = vadd.f32 %v7250_v59, %v9405_v63  ;;  %v5924_v46 = vpop.f32.mrb[91].mxu0 }
 0x470   : > { %v6104_v22 = vadd.f32 %v6033_v51, %v5922_v4  ;;  %v5925_v28 = vadd.f32 %v9405_v63, %v5924_v46 }
 0x471   : > { %v6138_v55 = vmax.f32 %v6106_v15, 0.0  ;;  %v6107_v23 = vadd.f32 %v6039_v0, %v5933_v7 }
 0x472   : > { %v6136_v24 = vmax.f32 %v6104_v22, 0.0  ;;  %v6105_v36 = vadd.f32 %v6035_v14, %v5925_v28 }
 0x473   : > { %6171 = vst.msk [vmem:[%s9419_s8 + $0xd0] sm:$0xff] %vm6144_vm13, %v6138_v55  ;;  %v6139_v47 = vmax.f32 %v6107_v23, 0.0 }
 0x474   : > { %6169 = vst.msk [vmem:[%s9419_s8 + $0xc0] sm:$0xff] %vm6144_vm13, %v6136_v24  ;;  %v6137_v61 = vmax.f32 %v6105_v36, 0.0  ;;  %v7253_v45 = vpop.f32.mrb[92].mxu0 }
 0x475   : > { %6172 = vst.msk [vmem:[%s9419_s8 + $0xd8] sm:$0xff] %vm6144_vm13, %v6139_v47  ;;  %v5946_v49 = vadd.f32 %v7253_v45, %v9405_v63  ;;  %v5937_v29 = vpop.f32.mrb[93].mxu0 }
 0x476   : > { %6170 = vst.msk [vmem:[%s9419_s8 + $0xc8] sm:$0xff] %vm6144_vm13, %v6137_v61  ;;  %v5938_v42 = vadd.f32 %v9405_v63, %v5937_v29  ;;  %v7254_v25 = vpop.f32.mrb[94].mxu0 }
 0x477   : > { %v6110_v52 = vadd.f32 %v6045_v33, %v5946_v49  ;;  %v5949_v30 = vadd.f32 %v7254_v25, %v9405_v63  ;;  %v5940_v5 = vpop.f32.mrb[95].mxu0 }
 0x478   : > { %v6108_v38 = vadd.f32 %v6041_v11, %v5938_v42  ;;  %v5941_v12 = vadd.f32 %v9405_v63, %v5940_v5 }
 0x479   : > { %v6142_v57 = vmax.f32 %v6110_v52, 0.0  ;;  %v6111_v40 = vadd.f32 %v6047_v19, %v5949_v30 }
 0x47a   : > { %v6140_v9 = vmax.f32 %v6108_v38, 0.0  ;;  %v6109_v43 = vadd.f32 %v6043_v3, %v5941_v12 }
 0x47b   : > { %6175 = vst.msk [vmem:[%s9419_s8 + $0xf0] sm:$0xff] %vm6144_vm13, %v6142_v57  ;;  %v6143_v37 = vmax.f32 %v6111_v40, 0.0 }
 0x47c   : > { %6173 = vst.msk [vmem:[%s9419_s8 + $0xe0] sm:$0xff] %vm6144_vm13, %v6140_v9  ;;  %v6141_v63 = vmax.f32 %v6109_v43, 0.0 }
 0x47d   : > { %6176 = vst.msk [vmem:[%s9419_s8 + $0xf8] sm:$0xff] %vm6144_vm13, %v6143_v37 }
 0x47e   : > { %6174 = vst.msk [vmem:[%s9419_s8 + $0xe8] sm:$0xff] %vm6144_vm13, %v6141_v63 }
 0x47f   : > { %7701 = shalt.err (!%p7698_p3)
}
 0x480   : > { %s7702_s21 = scalar_lea.hbm %s9516_s16, 4096  ;;  %s7706_s29 = scalar_lea.hbm %s9576_s7, 8192 }
 0x481   : > { %p7703_p4 = scmp.ne.s32.totalorder %s9516_s16, %s7702_s21  ;;  %p7707_p9 = scmp.lt.u32.totalorder %s9516_s16, %s9576_s7 }
 0x482   : > { %p7708_p10 = scmp.lt.u32.totalorder %s7706_s29, %s7702_s21  ;;  %p7710_p12 = scmp.lt.u32.totalorder %s7702_s21, %s9516_s16 }
 0x483   : > { %p7704_p7 = pnand %p7703_p4, %p7835_p5 }
 0x484   : > { %p7709_p11 = por %p7708_p10, %p7707_p9 }
 0x485   : > { %p7705_p8 = pneg %p7704_p7 }
 0x486   : > { %p7711_p13 = por %p7710_p12, %p7709_p11 }
 0x488   : > { %p7712_p0 = pnand %p7711_p13, %p7705_p8 }
 0x48a   : > { %7715 = shalt.err (!%p7712_p0)
}
 0x48b   : > { %s7755_s14 = smov 128   ;;  %s7756_s15 = smov 8  }
 0x48c   : > { %7557 = dma.vmem_to_hbm [thread:$0]  (%p7835_p5), %s9518_s13, 4096, %s9516_s16, %s9528_s28, %s7755_s14, %s7755_s14, %s7756_s15  }
 0x48d PF: > { %p7563_p1 = scmp.ge.s32.totalorder %s7750_s27, 2  ;;  %s6206_s17 = sand.u32 1, %s7738_s24  }
 0x48e   : > { %s6207_s18 = scalar_lea.sflag [#allocation4], %s6206_s17 }
 0x48f   : > { %p7560_p2 = pnand %p7563_p1, %p7839_p6 }
 0x491   : > { %7733 = dma.done.wait (!%p7560_p2), %s6207_s18, 4096  }
 0x492   : > { %7735 = vsyncadd (!%p7560_p2), %s6207_s18, 4294963200  ;;  %p17_p3 = scmp.ge.s32.totalorder %s7822_s30, 4   ;;  %s9658_s24 = smov %s7742_s25 }
 0x493   : > { %s9659_s25 = smov %s7746_s26  ;;  %s9660_s26 = smov %s7833_s10 }
 0x494   : > { %s9661_s27 = smov %s7822_s30  ;;  %19 = sbr.rel (!%p17_p3) target bundleno = 3 (0x3), region = 94 }
 0x49b   :  { %6212 = vsyncpa [#allocation4], 1 }
 0x49c   :  { %6214 = vsyncpa [#allocation4 + $0x1], 1 }

</bundles_post_ra>
